<compile_context>
chip_gen: v7x
topology: tpu7x:2x2x1
jax: 0.10.0
libtpu: 0.0.40
codegen_flags: <defaults>
</compile_context>

<pallas_src>
import functools

import jax
import jax.numpy as jnp
from jax import lax
from jax.experimental import pallas as pl
from jax.experimental.pallas import tpu as pltpu  # noqa: F401  (TPU backend assumed)


# ----------------------------------------------------------------------------
# small in-kernel helpers
# ----------------------------------------------------------------------------

def _dot(a, b):
    return jnp.dot(a, b, preferred_element_type=jnp.float32)


def _leaky(x):
    return jnp.where(x > 0, x, 0.1 * x)


def _sigmoid(x):
    return 1.0 / (1.0 + jnp.exp(-x))


def _softmax(x):
    x = x - jnp.max(x, axis=-1, keepdims=True)
    e = jnp.exp(x)
    return e / jnp.sum(e, axis=-1, keepdims=True)


def _lstm_gates(gates, H):
    """Full-slab activation: one tanh + one sigmoid over the whole 4H-lane slab,
    select the tanh (g) lanes with an iota mask, then slice i/f/g/o."""
    lane = lax.broadcasted_iota(jnp.int32, gates.shape, 1)
    is_g = jnp.logical_and(lane >= 2 * H, lane < 3 * H)
    act = jnp.where(is_g, jnp.tanh(gates), _sigmoid(gates))
    return act[:, 0:H], act[:, H:2 * H], act[:, 2 * H:3 * H], act[:, 3 * H:4 * H]


# ----------------------------------------------------------------------------
# the fused highwayNet forward kernel (single invocation, no grid)
# ----------------------------------------------------------------------------

def _highway_kernel(x_ref, sel_ref, lat_ref, lon_ref,
                    ipw_ref, ipb_ref, ewx_ref, ewh_ref, eb_ref, dynw_ref, dynb_ref,
                    w1_ref, b1_ref, w2_ref, b2_ref,
                    hws_ref, hwd_ref, hb_ref,
                    dws_ref, dwd_ref, dwlat_ref, dwlon_ref, dwh_ref, db_ref,
                    opw_ref, opb_ref,
                    fut_ref, latlon_ref):
    B, NLAT = lat_ref.shape
    NLON = lon_ref.shape[1]
    N = sel_ref.shape[2]
    Bn = B + N
    T = x_ref.shape[0] // Bn
    H = ewh_ref.shape[0]
    DEC = dwh_ref.shape[0]
    GH = sel_ref.shape[1] // B
    OH1 = GH - 2                 # 3x3 conv (grid width 3 collapses to 1)
    OH2 = OH1 - 2                # (3,1) conv
    npool = hws_ref.shape[0]
    out_len = fut_ref.shape[0]

    # === shared encoder: hist rows [0:B), nbrs rows [B:Bn) of every timestep =========
    # x-side matmuls (ip_emb + LeakyReLU + W_ih) for ALL timesteps in one MXU pass.
    e_all = _leaky(_dot(x_ref[...], ipw_ref[...]) + ipb_ref[...])        # (T*Bn, E)
    gx_all = _dot(e_all, ewx_ref[...]) + eb_ref[...]                     # (T*Bn, 4H)
    ewh = ewh_ref[...]
    h = jnp.zeros((Bn, H), jnp.float32)
    c = jnp.zeros((Bn, H), jnp.float32)
    for t in range(T):                                   # fully unrolled, static slices
        gates = gx_all[t * Bn:(t + 1) * Bn, :] + _dot(h, ewh)
        gi, gf, gg, go = _lstm_gates(gates, H)
        c = gf * c + gi * gg
        h = go * jnp.tanh(c)
    hist_enc = _leaky(_dot(h[0:B, :], dynw_ref[...]) + dynb_ref[...])    # (B, DY)
    nbrs_enc = h[B:Bn, :]                                                # (N, H)

    # === masked_scatter as one-hot matmul + conv social pooling ======================
    # xf[kx][y*B + b, c] == soc_enc_nchw[b, c, y, kx]
    xf = [_dot(sel_ref[kx], nbrs_enc) for kx in range(3)]                # 3 x (GH*B, C)

    # soc_conv (3x3, valid): 9 shifted-row matmul accumulations (im2col-free)
    acc1 = None
    for ky in range(3):
        for kx in range(3):
            part = _dot(xf[kx][ky * B:ky * B + OH1 * B, :], w1_ref[ky * 3 + kx])
            acc1 = part if acc1 is None else acc1 + part
    c1 = _leaky(acc1 + b1_ref[...])                                      # (OH1*B, O1)

    # conv_3x1: 3 shifted-row matmul accumulations
    acc2 = _dot(c1[0:OH2 * B, :], w2_ref[0])
    acc2 = acc2 + _dot(c1[B:B + OH2 * B, :], w2_ref[1])
    acc2 = acc2 + _dot(c1[2 * B:2 * B + OH2 * B, :], w2_ref[2])
    c2 = _leaky(acc2 + b2_ref[...])                                      # (OH2*B, O2)

    # MaxPool2d((2,1), padding=(1,0)): window 0 = row 0 (top -inf pad),
    # window p >= 1 = max(row 2p-1, row 2p).  Pieces stay as separate (B, O2) slabs;
    # the channel-major flatten is folded into the head/decoder weight layout below.
    pieces = [c2[0:B, :]]
    for p in range(1, npool):
        pieces.append(jnp.maximum(c2[(2 * p - 1) * B:2 * p * B, :],
                                  c2[2 * p * B:(2 * p + 1) * B, :]))

    # === intention heads + decoder x-part (both step-invariant -> computed once) =====
    hy = hb_ref[...] + _dot(hist_enc, hwd_ref[...])
    gx = (db_ref[...] + _dot(hist_enc, dwd_ref[...])
          + _dot(lat_ref[...], dwlat_ref[...]) + _dot(lon_ref[...], dwlon_ref[...]))
    for p in range(npool):
        hy = hy + _dot(pieces[p], hws_ref[p])
        gx = gx + _dot(pieces[p], dws_ref[p])
    latlon_ref[:, 0:NLAT] = _softmax(hy[:, 0:NLAT])
    latlon_ref[:, NLAT:NLAT + NLON] = _softmax(hy[:, NLAT:NLAT + NLON])

    # === decoder LSTM (x-part hoisted) + op + outputActivation =======================
    dwh = dwh_ref[...]
    opw = opw_ref[...]
    opb = opb_ref[...]
    h = jnp.zeros((B, DEC), jnp.float32)
    c = jnp.zeros((B, DEC), jnp.float32)
    for t in range(out_len):                             # fully unrolled
        gates = gx + _dot(h, dwh)
        gi, gf, gg, go = _lstm_gates(gates, DEC)
        c = gf * c + gi * gg
        h = go * jnp.tanh(c)
        y = _dot(h, opw) + opb                                            # (B, 5)
        col = lax.broadcasted_iota(jnp.int32, y.shape, 1)
        # outputActivation (input_dim == 2): [muX, muY, exp, exp, tanh]
        fut_ref[t] = jnp.where(col < 2, y, jnp.where(col < 4, jnp.exp(y), jnp.tanh(y)))


# ----------------------------------------------------------------------------
# wrapper: XLA glue is only the hist/nbrs row-concat, the one-hot scatter-matrix
# construction from masks, and splitting the merged lat/lon output.
# ----------------------------------------------------------------------------

@functools.partial(jax.jit, static_argnames=("out_length",))
def highway_net_forward(prep, hist, nbrs, masks, lat_enc, lon_enc, *, out_length):
    T, B, D = hist.shape
    Tn, N, Dn = nbrs.shape
    assert T == Tn and D == Dn
    assert masks.shape[1] == 3, "cslstm pooling assumes grid_size[1] == 3"
    GH = masks.shape[2]
    assert (GH - 4) % 2 == 1, "cslstm pooling expects odd (grid_size[0] - 4)"
    assert prep["head_wsoc"].shape[0] == (GH - 4) // 2 + 1, "pool count / weight mismatch"

    # all timesteps of hist (+) nbrs as one row-batched 2-D slab: row = t*(B+N) + j
    x2d = jnp.concatenate([hist, nbrs], axis=1).astype(jnp.float32).reshape(T * (B + N), D)

    # torch masked_scatter_ -> per-grid-column one-hot selection matrices (from masks
    # only).  Assumes, as the torch usage does, that each occupied cell's mask covers
    # all encoder_size channels.  NOTE: if more cells are occupied than nbrs rows
    # exist, the extra cells read zeros (torch would raise).
    occ = masks[..., 0].astype(bool)                                     # (B, 3, GH)
    flat = occ.reshape(-1)
    rank = jnp.cumsum(flat.astype(jnp.int32)) - 1
    sel = (rank[:, None] == jnp.arange(N, dtype=jnp.int32)[None, :]) & flat[:, None]
    sel = sel.astype(jnp.float32).reshape(B, 3, GH, N)
    sel = jnp.transpose(sel, (1, 2, 0, 3)).reshape(3, GH * B, N)         # [kx, y*B+b, n]

    NLAT = lat_enc.shape[1]
    NLON = lon_enc.shape[1]
    NO = prep["op_w"].shape[1]

    fut, latlon = pl.pallas_call(
        _highway_kernel,
        out_shape=(jax.ShapeDtypeStruct((out_length, B, NO), jnp.float32),
                   jax.ShapeDtypeStruct((B, NLAT + NLON), jnp.float32)),
    )(x2d, sel, lat_enc.astype(jnp.float32), lon_enc.astype(jnp.float32),
      prep["ip_w"], prep["ip_b"], prep["enc_wx"], prep["enc_wh"], prep["enc_b"],
      prep["dyn_w"], prep["dyn_b"],
      prep["w1"], prep["b1"], prep["w2"], prep["b2"],
      prep["head_wsoc"], prep["head_wdyn"], prep["head_b"],
      prep["dec_wxsoc"], prep["dec_wxdyn"], prep["dec_wxlat"], prep["dec_wxlon"],
      prep["dec_wh"], prep["dec_b"], prep["op_w"], prep["op_b"])

    return fut, latlon[:, :NLAT], latlon[:, NLAT:]


# ----------------------------------------------------------------------------
# Parameters: torch-layout init + one-time conversion to kernel layout
# ----------------------------------------------------------------------------

def init_params(key, cfg):
    """Parameters in PyTorch layout (Linear: (out,in); LSTM: (4H,in) in i,f,g,o order;
    Conv2d: (O,C,kh,kw))."""
    D = cfg["input_dim"]; E = cfg["input_embedding_size"]; H = cfg["encoder_size"]
    DY = cfg["dyn_embedding_size"]; SD = cfg["soc_conv_depth"]; CD = cfg["conv_3x1_depth"]
    SOC = cfg["soc_embedding_size"]; NLAT = cfg["num_lat_classes"]; NLON = cfg["num_lon_classes"]
    DEC = cfg["decoder_size"]
    dec_in = SOC + DY + NLAT + NLON
    keys = jax.random.split(key, 22)
    nrm = lambda k, s: 0.1 * jax.random.normal(k, s, jnp.float32)
    return dict(
        ip_emb_w=nrm(keys[0], (E, D)), ip_emb_b=nrm(keys[1], (E,)),
        enc_w_ih=nrm(keys[2], (4 * H, E)), enc_w_hh=nrm(keys[3], (4 * H, H)),
        enc_b_ih=nrm(keys[4], (4 * H,)), enc_b_hh=nrm(keys[5], (4 * H,)),
        dyn_w=nrm(keys[6], (DY, H)), dyn_b=nrm(keys[7], (DY,)),
        soc_conv_w=nrm(keys[8], (SD, H, 3, 3)), soc_conv_b=nrm(keys[9], (SD,)),
        conv3x1_w=nrm(keys[10], (CD, SD, 3, 1)), conv3x1_b=nrm(keys[11], (CD,)),
        op_lat_w=nrm(keys[12], (NLAT, SOC + DY)), op_lat_b=nrm(keys[13], (NLAT,)),
        op_lon_w=nrm(keys[14], (NLON, SOC + DY)), op_lon_b=nrm(keys[15], (NLON,)),
        dec_w_ih=nrm(keys[16], (4 * DEC, dec_in)), dec_w_hh=nrm(keys[17], (4 * DEC, DEC)),
        dec_b_ih=nrm(keys[18], (4 * DEC,)), dec_b_hh=nrm(keys[19], (4 * DEC,)),
        op_w=nrm(keys[20], (5, DEC)), op_b=nrm(keys[21], (5,)),
    )


def prepare_params(p):
    """One-time conversion from torch layout to kernel layout:
      - linears transposed; LSTM gate biases pre-summed; fused 4H gate weights;
      - conv weights as per-tap (C_in, C_out) slabs for shifted-row matmul accumulation;
      - head / decoder-input weights split per enc2 segment, with the soc segment
        re-laid out per pooled slice (npool, O2, out) so the channel-major flatten of
        the pooled tensor never has to be materialized."""
    f32 = lambda a: jnp.asarray(a, jnp.float32)
    O1, C = p["soc_conv_w"].shape[0], p["soc_conv_w"].shape[1]
    O2 = p["conv3x1_w"].shape[0]
    DY = p["dyn_w"].shape[0]
    SOC = p["op_lat_w"].shape[1] - DY
    npool = SOC // O2
    NLAT = p["op_lat_w"].shape[0]
    NLON = p["op_lon_w"].shape[0]
    G4 = p["dec_w_ih"].shape[0]                                   # 4 * decoder_size

    w1 = jnp.transpose(p["soc_conv_w"], (2, 3, 1, 0)).reshape(9, C, O1)      # [ky*3+kx]
    w2 = jnp.transpose(p["conv3x1_w"], (2, 3, 1, 0)).reshape(3, O1, O2)      # [ky]

    head_w = jnp.concatenate([p["op_lat_w"].T, p["op_lon_w"].T], axis=1)     # (SOC+DY, NLAT+NLON)
    dec_wx = p["dec_w_ih"].T                                                 # (SOC+DY+NLAT+NLON, 4*DEC)

    return dict(
        ip_w=f32(p["ip_emb_w"].T), ip_b=f32(p["ip_emb_b"][None, :]),
        enc_wx=f32(p["enc_w_ih"].T), enc_wh=f32(p["enc_w_hh"].T),
        enc_b=f32((p["enc_b_ih"] + p["enc_b_hh"])[None, :]),
        dyn_w=f32(p["dyn_w"].T), dyn_b=f32(p["dyn_b"][None, :]),
        w1=f32(w1), b1=f32(p["soc_conv_b"][None, :]),
        w2=f32(w2), b2=f32(p["conv3x1_b"][None, :]),
        head_wsoc=f32(head_w[:SOC].reshape(O2, npool, NLAT + NLON).transpose(1, 0, 2)),
        head_wdyn=f32(head_w[SOC:]),
        head_b=f32(jnp.concatenate([p["op_lat_b"], p["op_lon_b"]])[None, :]),
        dec_wxsoc=f32(dec_wx[:SOC].reshape(O2, npool, G4).transpose(1, 0, 2)),
        dec_wxdyn=f32(dec_wx[SOC:SOC + DY]),
        dec_wxlat=f32(dec_wx[SOC + DY:SOC + DY + NLAT]),
        dec_wxlon=f32(dec_wx[SOC + DY + NLAT:]),
        dec_wh=f32(p["dec_w_hh"].T),
        dec_b=f32((p["dec_b_ih"] + p["dec_b_hh"])[None, :]),
        op_w=f32(p["op_w"].T), op_b=f32(p["op_b"][None, :]),
    )


# ----------------------------------------------------------------------------
# pure-JAX/XLA reference (torch layout), used only for the in-script check
# ----------------------------------------------------------------------------

def reference_forward(p, hist, nbrs, masks, lat_enc, lon_enc, out_length):
    leaky = lambda x: jnp.where(x > 0, x, 0.1 * x)
    sigmoid = lambda x: 1.0 / (1.0 + jnp.exp(-x))

    def lstm_final_h(x, w_ih, w_hh, b_ih, b_hh):
        Bx = x.shape[1]
        Hx = w_hh.shape[1]
        h = jnp.zeros((Bx, Hx), jnp.float32)
        c = jnp.zeros((Bx, Hx), jnp.float32)
        for t in range(x.shape[0]):
            g = x[t] @ w_ih.T + b_ih + h @ w_hh.T + b_hh
            gi, gf, gg, go = jnp.split(g, 4, axis=1)
            c = sigmoid(gf) * c + sigmoid(gi) * jnp.tanh(gg)
            h = sigmoid(go) * jnp.tanh(c)
        return h

    hist_h = lstm_final_h(leaky(hist @ p["ip_emb_w"].T + p["ip_emb_b"]),
                          p["enc_w_ih"], p["enc_w_hh"], p["enc_b_ih"], p["enc_b_hh"])
    nbrs_h = lstm_final_h(leaky(nbrs @ p["ip_emb_w"].T + p["ip_emb_b"]),
                          p["enc_w_ih"], p["enc_w_hh"], p["enc_b_ih"], p["enc_b_hh"])
    hist_enc = leaky(hist_h @ p["dyn_w"].T + p["dyn_b"])

    B, G1, G0, C = masks.shape
    occ = masks[..., 0].astype(bool).reshape(-1)
    rank = jnp.cumsum(occ.astype(jnp.int32)) - 1
    gathered = nbrs_h[jnp.clip(rank, 0, nbrs_h.shape[0] - 1)]
    soc = jnp.where(occ[:, None], gathered, 0.0).reshape(B, G1, G0, C)
    soc = jnp.transpose(soc, (0, 3, 2, 1))                               # (B, C, G0, G1)

    def conv2d(x, w, b):
        y = lax.conv_general_dilated(x, w, (1, 1), "VALID",
                                     dimension_numbers=("NCHW", "OIHW", "NCHW"),
                                     precision=lax.Precision.HIGHEST)
        return y + b[None, :, None, None]

    a1 = leaky(conv2d(soc, p["soc_conv_w"], p["soc_conv_b"]))
    a2 = leaky(conv2d(a1, p["conv3x1_w"], p["conv3x1_b"]))               # (B, O2, OH2, 1)
    OH2 = a2.shape[2]
    npool = OH2 // 2 + 1
    padded = jnp.pad(a2, ((0, 0), (0, 0), (1, 1), (0, 0)), constant_values=-jnp.inf)
    pooled = jnp.stack([jnp.max(padded[:, :, 2 * k:2 * k + 2, :], axis=2)
                        for k in range(npool)], axis=2)                  # (B, O2, npool, 1)
    soc_pooled = pooled.reshape(B, -1)

    enc = jnp.concatenate([soc_pooled, hist_enc], axis=1)

    def softmax(x):
        x = x - jnp.max(x, axis=1, keepdims=True)
        e = jnp.exp(x)
        return e / jnp.sum(e, axis=1, keepdims=True)

    lat_pred = softmax(enc @ p["op_lat_w"].T + p["op_lat_b"])
    lon_pred = softmax(enc @ p["op_lon_w"].T + p["op_lon_b"])

    enc2 = jnp.concatenate([enc, lat_enc, lon_enc], axis=1)
    DEC = p["dec_w_hh"].shape[1]
    h = jnp.zeros((B, DEC), jnp.float32)
    c = jnp.zeros((B, DEC), jnp.float32)
    fut = []
    for _ in range(out_length):
        g = enc2 @ p["dec_w_ih"].T + p["dec_b_ih"] + h @ p["dec_w_hh"].T + p["dec_b_hh"]
        gi, gf, gg, go = jnp.split(g, 4, axis=1)
        c = sigmoid(gf) * c + sigmoid(gi) * jnp.tanh(gg)
        h = sigmoid(go) * jnp.tanh(c)
        y = h @ p["op_w"].T + p["op_b"]
        fut.append(jnp.concatenate([y[:, 0:2], jnp.exp(y[:, 2:4]), jnp.tanh(y[:, 4:5])],
                                   axis=1))
    return jnp.stack(fut, axis=0), lat_pred, lon_pred


# ----------------------------------------------------------------------------
# Demo
# ----------------------------------------------------------------------------

if __name__ == "__main__":
    cfg = dict(
        use_cuda=False, train_flag=True, intention_module=True, pooling="cslstm",
        input_dim=2, input_embedding_size=16, encoder_size=32, decoder_size=32,
        dyn_embedding_size=16, in_length=8, out_length=5,
        grid_size=(13, 3), soc_conv_depth=16, conv_3x1_depth=8,
        num_lat_classes=3, num_lon_classes=2,
    )
    cfg["soc_embedding_size"] = (cfg["grid_size"][0] - 4 + 1) // 2 * cfg["conv_3x1_depth"]  # 40

    key = jax.random.PRNGKey(0)
    k_p, k_h, k_n = jax.random.split(key, 3)
    params = init_params(k_p, cfg)
    prep = prepare_params(params)

    batch = 2
    n_nbrs = 6
    hist = jax.random.normal(k_h, (cfg["in_length"], batch, cfg["input_dim"]), jnp.float32)
    nbrs = jax.random.normal(k_n, (cfg["in_length"], n_nbrs, cfg["input_dim"]), jnp.float32)

    # masks: (batch, grid_size[1], grid_size[0], encoder_size) bool; 3 occupied cells each.
    cell_mask = jnp.zeros((batch, cfg["grid_size"][1], cfg["grid_size"][0]), bool)
    occupied = [(0, 0, 2), (0, 1, 6), (0, 2, 10), (1, 0, 1), (1, 1, 5), (1, 2, 12)]
    for (b, g1, g0) in occupied:
        cell_mask = cell_mask.at[b, g1, g0].set(True)
    masks = jnp.broadcast_to(cell_mask[..., None],
                             cell_mask.shape + (cfg["encoder_size"],))

    lat_enc = jax.nn.one_hot(jnp.array([0, 2]), cfg["num_lat_classes"], dtype=jnp.float32)
    lon_enc = jax.nn.one_hot(jnp.array([1, 0]), cfg["num_lon_classes"], dtype=jnp.float32)

    fut_pred, lat_pred, lon_pred = highway_net_forward(
        prep, hist, nbrs, masks, lat_enc, lon_enc, out_length=cfg["out_length"])
    jax.block_until_ready((fut_pred, lat_pred, lon_pred))

    assert fut_pred.shape == (cfg["out_length"], batch, 5)
    assert lat_pred.shape == (batch, cfg["num_lat_classes"])
    assert lon_pred.shape == (batch, cfg["num_lon_classes"])
    assert bool(jnp.all(jnp.isfinite(fut_pred)))
    assert bool(jnp.allclose(jnp.sum(lat_pred, axis=1), 1.0, atol=1e-5))
    assert bool(jnp.allclose(jnp.sum(lon_pred, axis=1), 1.0, atol=1e-5))

    # numerical check against a pure-JAX/XLA reference of the PyTorch forward
    with jax.default_matmul_precision("highest"):
        ref_fut, ref_lat, ref_lon = reference_forward(
            params, hist, nbrs, masks, lat_enc, lon_enc, cfg["out_length"])
    assert bool(jnp.allclose(fut_pred, ref_fut, rtol=2e-3, atol=2e-3)), "fut mismatch"
    assert bool(jnp.allclose(lat_pred, ref_lat, rtol=2e-3, atol=2e-3)), "lat mismatch"
    assert bool(jnp.allclose(lon_pred, ref_lon, rtol=2e-3, atol=2e-3)), "lon mismatch"

    print("KERNEL_OK")
</pallas_src>

<mosaic_0001>
module attributes {stable_mosaic.version = 11 : i64} {
  func.func @_highway_kernel(%arg0: memref<64x2xf32, #tpu.memory_space<vmem>>, %arg1: memref<3x26x6xf32, #tpu.memory_space<vmem>>, %arg2: memref<2x3xf32, #tpu.memory_space<vmem>>, %arg3: memref<2x2xf32, #tpu.memory_space<vmem>>, %arg4: memref<2x16xf32, #tpu.memory_space<vmem>>, %arg5: memref<1x16xf32, #tpu.memory_space<vmem>>, %arg6: memref<16x128xf32, #tpu.memory_space<vmem>>, %arg7: memref<32x128xf32, #tpu.memory_space<vmem>>, %arg8: memref<1x128xf32, #tpu.memory_space<vmem>>, %arg9: memref<32x16xf32, #tpu.memory_space<vmem>>, %arg10: memref<1x16xf32, #tpu.memory_space<vmem>>, %arg11: memref<9x32x16xf32, #tpu.memory_space<vmem>>, %arg12: memref<1x16xf32, #tpu.memory_space<vmem>>, %arg13: memref<3x16x8xf32, #tpu.memory_space<vmem>>, %arg14: memref<1x8xf32, #tpu.memory_space<vmem>>, %arg15: memref<5x8x5xf32, #tpu.memory_space<vmem>>, %arg16: memref<16x5xf32, #tpu.memory_space<vmem>>, %arg17: memref<1x5xf32, #tpu.memory_space<vmem>>, %arg18: memref<5x8x128xf32, #tpu.memory_space<vmem>>, %arg19: memref<16x128xf32, #tpu.memory_space<vmem>>, %arg20: memref<3x128xf32, #tpu.memory_space<vmem>>, %arg21: memref<2x128xf32, #tpu.memory_space<vmem>>, %arg22: memref<32x128xf32, #tpu.memory_space<vmem>>, %arg23: memref<1x128xf32, #tpu.memory_space<vmem>>, %arg24: memref<32x5xf32, #tpu.memory_space<vmem>>, %arg25: memref<1x5xf32, #tpu.memory_space<vmem>>, %arg26: memref<5x2x5xf32, #tpu.memory_space<vmem>>, %arg27: memref<2x5xf32, #tpu.memory_space<vmem>>) attributes {dimension_semantics = [], scalar_prefetch = 0 : i64, scratch_operands = 0 : i64, tpu.core_type = #tpu.core_type<tc>} {
    %c0 = arith.constant 0 : index
    %c0_0 = arith.constant 0 : index
    %0 = vector.load %arg0[%c0, %c0_0] : memref<64x2xf32, #tpu.memory_space<vmem>>, vector<64x2xf32>
    %c0_1 = arith.constant 0 : index
    %c0_2 = arith.constant 0 : index
    %1 = vector.load %arg4[%c0_1, %c0_2] : memref<2x16xf32, #tpu.memory_space<vmem>>, vector<2x16xf32>
    %cst = arith.constant dense<0.000000e+00> : vector<64x16xf32>
    %2 = tpu.matmul %0, %1, %cst {dimension_numbers = #tpu.dot_dimension_numbers<[1], [0], [0], [1], [0, 0, 1, 1], [], []>} : vector<64x2xf32>, vector<2x16xf32>, vector<64x16xf32> -> vector<64x16xf32>
    %c0_3 = arith.constant 0 : index
    %c0_4 = arith.constant 0 : index
    %3 = vector.load %arg5[%c0_3, %c0_4] : memref<1x16xf32, #tpu.memory_space<vmem>>, vector<1x16xf32>
    %4 = vector.broadcast %3 : vector<1x16xf32> to vector<64x16xf32>
    %5 = arith.addf %2, %4 : vector<64x16xf32>
    %cst_5 = arith.constant 0.000000e+00 : f32
    %6 = vector.broadcast %cst_5 : f32 to vector<64x16xf32>
    %7 = arith.cmpf ogt, %5, %6 : vector<64x16xf32>
    %cst_6 = arith.constant 1.000000e-01 : f32
    %8 = vector.broadcast %cst_6 : f32 to vector<64x16xf32>
    %9 = arith.mulf %8, %5 : vector<64x16xf32>
    %10 = arith.select %7, %5, %9 : vector<64x16xi1>, vector<64x16xf32>
    %c0_7 = arith.constant 0 : index
    %c0_8 = arith.constant 0 : index
    %11 = vector.load %arg6[%c0_7, %c0_8] : memref<16x128xf32, #tpu.memory_space<vmem>>, vector<16x128xf32>
    %cst_9 = arith.constant dense<0.000000e+00> : vector<64x128xf32>
    %12 = tpu.matmul %10, %11, %cst_9 {dimension_numbers = #tpu.dot_dimension_numbers<[1], [0], [0], [1], [0, 0, 1, 1], [], []>} : vector<64x16xf32>, vector<16x128xf32>, vector<64x128xf32> -> vector<64x128xf32>
    %c0_10 = arith.constant 0 : index
    %c0_11 = arith.constant 0 : index
    %13 = vector.load %arg8[%c0_10, %c0_11] : memref<1x128xf32, #tpu.memory_space<vmem>>, vector<1x128xf32>
    %14 = vector.broadcast %13 : vector<1x128xf32> to vector<64x128xf32>
    %15 = arith.addf %12, %14 : vector<64x128xf32>
    %c0_12 = arith.constant 0 : index
    %c0_13 = arith.constant 0 : index
    %16 = vector.load %arg7[%c0_12, %c0_13] : memref<32x128xf32, #tpu.memory_space<vmem>>, vector<32x128xf32>
    %cst_14 = arith.constant 0.000000e+00 : f32
    %17 = vector.broadcast %cst_14 : f32 to vector<8x32xf32>
    %cst_15 = arith.constant 0.000000e+00 : f32
    %18 = vector.broadcast %cst_15 : f32 to vector<8x32xf32>
    %19 = vector.extract_strided_slice %15 {offsets = [0, 0], sizes = [8, 128], strides = [1, 1]} : vector<64x128xf32> to vector<8x128xf32>
    %cst_16 = arith.constant dense<0.000000e+00> : vector<8x128xf32>
    %20 = tpu.matmul %17, %16, %cst_16 {dimension_numbers = #tpu.dot_dimension_numbers<[1], [0], [0], [1], [0, 0, 1, 1], [], []>} : vector<8x32xf32>, vector<32x128xf32>, vector<8x128xf32> -> vector<8x128xf32>
    %21 = arith.addf %19, %20 : vector<8x128xf32>
    %22 = tpu.iota {dimensions = array<i32: 1>} : vector<8x128xi32>
    %c64_i32 = arith.constant 64 : i32
    %23 = vector.broadcast %c64_i32 : i32 to vector<8x128xi32>
    %24 = arith.cmpi sge, %22, %23 : vector<8x128xi32>
    %c96_i32 = arith.constant 96 : i32
    %25 = vector.broadcast %c96_i32 : i32 to vector<8x128xi32>
    %26 = arith.cmpi slt, %22, %25 : vector<8x128xi32>
    %27 = arith.andi %24, %26 : vector<8x128xi1>
    %28 = math.tanh %21 : vector<8x128xf32>
    %cst_17 = arith.constant 0.000000e+00 : f32
    %29 = vector.broadcast %cst_17 : f32 to vector<8x128xf32>
    %30 = arith.subf %29, %21 : vector<8x128xf32>
    %31 = math.exp %30 : vector<8x128xf32>
    %cst_18 = arith.constant 1.000000e+00 : f32
    %32 = vector.broadcast %cst_18 : f32 to vector<8x128xf32>
    %33 = arith.addf %32, %31 : vector<8x128xf32>
    %cst_19 = arith.constant 1.000000e+00 : f32
    %34 = vector.broadcast %cst_19 : f32 to vector<8x128xf32>
    %35 = arith.divf %34, %33 : vector<8x128xf32>
    %36 = arith.select %27, %28, %35 : vector<8x128xi1>, vector<8x128xf32>
    %37 = vector.extract_strided_slice %36 {offsets = [0, 0], sizes = [8, 32], strides = [1, 1]} : vector<8x128xf32> to vector<8x32xf32>
    %38 = vector.extract_strided_slice %36 {offsets = [0, 32], sizes = [8, 32], strides = [1, 1]} : vector<8x128xf32> to vector<8x32xf32>
    %39 = vector.extract_strided_slice %36 {offsets = [0, 64], sizes = [8, 32], strides = [1, 1]} : vector<8x128xf32> to vector<8x32xf32>
    %40 = vector.extract_strided_slice %36 {offsets = [0, 96], sizes = [8, 32], strides = [1, 1]} : vector<8x128xf32> to vector<8x32xf32>
    %41 = arith.mulf %38, %18 : vector<8x32xf32>
    %42 = arith.mulf %37, %39 : vector<8x32xf32>
    %43 = arith.addf %41, %42 : vector<8x32xf32>
    %44 = math.tanh %43 : vector<8x32xf32>
    %45 = arith.mulf %40, %44 : vector<8x32xf32>
    %46 = vector.extract_strided_slice %15 {offsets = [8, 0], sizes = [8, 128], strides = [1, 1]} : vector<64x128xf32> to vector<8x128xf32>
    %cst_20 = arith.constant dense<0.000000e+00> : vector<8x128xf32>
    %47 = tpu.matmul %45, %16, %cst_20 {dimension_numbers = #tpu.dot_dimension_numbers<[1], [0], [0], [1], [0, 0, 1, 1], [], []>} : vector<8x32xf32>, vector<32x128xf32>, vector<8x128xf32> -> vector<8x128xf32>
    %48 = arith.addf %46, %47 : vector<8x128xf32>
    %49 = tpu.iota {dimensions = array<i32: 1>} : vector<8x128xi32>
    %c64_i32_21 = arith.constant 64 : i32
    %50 = vector.broadcast %c64_i32_21 : i32 to vector<8x128xi32>
    %51 = arith.cmpi sge, %49, %50 : vector<8x128xi32>
    %c96_i32_22 = arith.constant 96 : i32
    %52 = vector.broadcast %c96_i32_22 : i32 to vector<8x128xi32>
    %53 = arith.cmpi slt, %49, %52 : vector<8x128xi32>
    %54 = arith.andi %51, %53 : vector<8x128xi1>
    %55 = math.tanh %48 : vector<8x128xf32>
    %cst_23 = arith.constant 0.000000e+00 : f32
    %56 = vector.broadcast %cst_23 : f32 to vector<8x128xf32>
    %57 = arith.subf %56, %48 : vector<8x128xf32>
    %58 = math.exp %57 : vector<8x128xf32>
    %cst_24 = arith.constant 1.000000e+00 : f32
    %59 = vector.broadcast %cst_24 : f32 to vector<8x128xf32>
    %60 = arith.addf %59, %58 : vector<8x128xf32>
    %cst_25 = arith.constant 1.000000e+00 : f32
    %61 = vector.broadcast %cst_25 : f32 to vector<8x128xf32>
    %62 = arith.divf %61, %60 : vector<8x128xf32>
    %63 = arith.select %54, %55, %62 : vector<8x128xi1>, vector<8x128xf32>
    %64 = vector.extract_strided_slice %63 {offsets = [0, 0], sizes = [8, 32], strides = [1, 1]} : vector<8x128xf32> to vector<8x32xf32>
    %65 = vector.extract_strided_slice %63 {offsets = [0, 32], sizes = [8, 32], strides = [1, 1]} : vector<8x128xf32> to vector<8x32xf32>
    %66 = vector.extract_strided_slice %63 {offsets = [0, 64], sizes = [8, 32], strides = [1, 1]} : vector<8x128xf32> to vector<8x32xf32>
    %67 = vector.extract_strided_slice %63 {offsets = [0, 96], sizes = [8, 32], strides = [1, 1]} : vector<8x128xf32> to vector<8x32xf32>
    %68 = arith.mulf %65, %43 : vector<8x32xf32>
    %69 = arith.mulf %64, %66 : vector<8x32xf32>
    %70 = arith.addf %68, %69 : vector<8x32xf32>
    %71 = math.tanh %70 : vector<8x32xf32>
    %72 = arith.mulf %67, %71 : vector<8x32xf32>
    %73 = vector.extract_strided_slice %15 {offsets = [16, 0], sizes = [8, 128], strides = [1, 1]} : vector<64x128xf32> to vector<8x128xf32>
    %cst_26 = arith.constant dense<0.000000e+00> : vector<8x128xf32>
    %74 = tpu.matmul %72, %16, %cst_26 {dimension_numbers = #tpu.dot_dimension_numbers<[1], [0], [0], [1], [0, 0, 1, 1], [], []>} : vector<8x32xf32>, vector<32x128xf32>, vector<8x128xf32> -> vector<8x128xf32>
    %75 = arith.addf %73, %74 : vector<8x128xf32>
    %76 = tpu.iota {dimensions = array<i32: 1>} : vector<8x128xi32>
    %c64_i32_27 = arith.constant 64 : i32
    %77 = vector.broadcast %c64_i32_27 : i32 to vector<8x128xi32>
    %78 = arith.cmpi sge, %76, %77 : vector<8x128xi32>
    %c96_i32_28 = arith.constant 96 : i32
    %79 = vector.broadcast %c96_i32_28 : i32 to vector<8x128xi32>
    %80 = arith.cmpi slt, %76, %79 : vector<8x128xi32>
    %81 = arith.andi %78, %80 : vector<8x128xi1>
    %82 = math.tanh %75 : vector<8x128xf32>
    %cst_29 = arith.constant 0.000000e+00 : f32
    %83 = vector.broadcast %cst_29 : f32 to vector<8x128xf32>
    %84 = arith.subf %83, %75 : vector<8x128xf32>
    %85 = math.exp %84 : vector<8x128xf32>
    %cst_30 = arith.constant 1.000000e+00 : f32
    %86 = vector.broadcast %cst_30 : f32 to vector<8x128xf32>
    %87 = arith.addf %86, %85 : vector<8x128xf32>
    %cst_31 = arith.constant 1.000000e+00 : f32
    %88 = vector.broadcast %cst_31 : f32 to vector<8x128xf32>
    %89 = arith.divf %88, %87 : vector<8x128xf32>
    %90 = arith.select %81, %82, %89 : vector<8x128xi1>, vector<8x128xf32>
    %91 = vector.extract_strided_slice %90 {offsets = [0, 0], sizes = [8, 32], strides = [1, 1]} : vector<8x128xf32> to vector<8x32xf32>
    %92 = vector.extract_strided_slice %90 {offsets = [0, 32], sizes = [8, 32], strides = [1, 1]} : vector<8x128xf32> to vector<8x32xf32>
    %93 = vector.extract_strided_slice %90 {offsets = [0, 64], sizes = [8, 32], strides = [1, 1]} : vector<8x128xf32> to vector<8x32xf32>
    %94 = vector.extract_strided_slice %90 {offsets = [0, 96], sizes = [8, 32], strides = [1, 1]} : vector<8x128xf32> to vector<8x32xf32>
    %95 = arith.mulf %92, %70 : vector<8x32xf32>
    %96 = arith.mulf %91, %93 : vector<8x32xf32>
    %97 = arith.addf %95, %96 : vector<8x32xf32>
    %98 = math.tanh %97 : vector<8x32xf32>
    %99 = arith.mulf %94, %98 : vector<8x32xf32>
    %100 = vector.extract_strided_slice %15 {offsets = [24, 0], sizes = [8, 128], strides = [1, 1]} : vector<64x128xf32> to vector<8x128xf32>
    %cst_32 = arith.constant dense<0.000000e+00> : vector<8x128xf32>
    %101 = tpu.matmul %99, %16, %cst_32 {dimension_numbers = #tpu.dot_dimension_numbers<[1], [0], [0], [1], [0, 0, 1, 1], [], []>} : vector<8x32xf32>, vector<32x128xf32>, vector<8x128xf32> -> vector<8x128xf32>
    %102 = arith.addf %100, %101 : vector<8x128xf32>
    %103 = tpu.iota {dimensions = array<i32: 1>} : vector<8x128xi32>
    %c64_i32_33 = arith.constant 64 : i32
    %104 = vector.broadcast %c64_i32_33 : i32 to vector<8x128xi32>
    %105 = arith.cmpi sge, %103, %104 : vector<8x128xi32>
    %c96_i32_34 = arith.constant 96 : i32
    %106 = vector.broadcast %c96_i32_34 : i32 to vector<8x128xi32>
    %107 = arith.cmpi slt, %103, %106 : vector<8x128xi32>
    %108 = arith.andi %105, %107 : vector<8x128xi1>
    %109 = math.tanh %102 : vector<8x128xf32>
    %cst_35 = arith.constant 0.000000e+00 : f32
    %110 = vector.broadcast %cst_35 : f32 to vector<8x128xf32>
    %111 = arith.subf %110, %102 : vector<8x128xf32>
    %112 = math.exp %111 : vector<8x128xf32>
    %cst_36 = arith.constant 1.000000e+00 : f32
    %113 = vector.broadcast %cst_36 : f32 to vector<8x128xf32>
    %114 = arith.addf %113, %112 : vector<8x128xf32>
    %cst_37 = arith.constant 1.000000e+00 : f32
    %115 = vector.broadcast %cst_37 : f32 to vector<8x128xf32>
    %116 = arith.divf %115, %114 : vector<8x128xf32>
    %117 = arith.select %108, %109, %116 : vector<8x128xi1>, vector<8x128xf32>
    %118 = vector.extract_strided_slice %117 {offsets = [0, 0], sizes = [8, 32], strides = [1, 1]} : vector<8x128xf32> to vector<8x32xf32>
    %119 = vector.extract_strided_slice %117 {offsets = [0, 32], sizes = [8, 32], strides = [1, 1]} : vector<8x128xf32> to vector<8x32xf32>
    %120 = vector.extract_strided_slice %117 {offsets = [0, 64], sizes = [8, 32], strides = [1, 1]} : vector<8x128xf32> to vector<8x32xf32>
    %121 = vector.extract_strided_slice %117 {offsets = [0, 96], sizes = [8, 32], strides = [1, 1]} : vector<8x128xf32> to vector<8x32xf32>
    %122 = arith.mulf %119, %97 : vector<8x32xf32>
    %123 = arith.mulf %118, %120 : vector<8x32xf32>
    %124 = arith.addf %122, %123 : vector<8x32xf32>
    %125 = math.tanh %124 : vector<8x32xf32>
    %126 = arith.mulf %121, %125 : vector<8x32xf32>
    %127 = vector.extract_strided_slice %15 {offsets = [32, 0], sizes = [8, 128], strides = [1, 1]} : vector<64x128xf32> to vector<8x128xf32>
    %cst_38 = arith.constant dense<0.000000e+00> : vector<8x128xf32>
    %128 = tpu.matmul %126, %16, %cst_38 {dimension_numbers = #tpu.dot_dimension_numbers<[1], [0], [0], [1], [0, 0, 1, 1], [], []>} : vector<8x32xf32>, vector<32x128xf32>, vector<8x128xf32> -> vector<8x128xf32>
    %129 = arith.addf %127, %128 : vector<8x128xf32>
    %130 = tpu.iota {dimensions = array<i32: 1>} : vector<8x128xi32>
    %c64_i32_39 = arith.constant 64 : i32
    %131 = vector.broadcast %c64_i32_39 : i32 to vector<8x128xi32>
    %132 = arith.cmpi sge, %130, %131 : vector<8x128xi32>
    %c96_i32_40 = arith.constant 96 : i32
    %133 = vector.broadcast %c96_i32_40 : i32 to vector<8x128xi32>
    %134 = arith.cmpi slt, %130, %133 : vector<8x128xi32>
    %135 = arith.andi %132, %134 : vector<8x128xi1>
    %136 = math.tanh %129 : vector<8x128xf32>
    %cst_41 = arith.constant 0.000000e+00 : f32
    %137 = vector.broadcast %cst_41 : f32 to vector<8x128xf32>
    %138 = arith.subf %137, %129 : vector<8x128xf32>
    %139 = math.exp %138 : vector<8x128xf32>
    %cst_42 = arith.constant 1.000000e+00 : f32
    %140 = vector.broadcast %cst_42 : f32 to vector<8x128xf32>
    %141 = arith.addf %140, %139 : vector<8x128xf32>
    %cst_43 = arith.constant 1.000000e+00 : f32
    %142 = vector.broadcast %cst_43 : f32 to vector<8x128xf32>
    %143 = arith.divf %142, %141 : vector<8x128xf32>
    %144 = arith.select %135, %136, %143 : vector<8x128xi1>, vector<8x128xf32>
    %145 = vector.extract_strided_slice %144 {offsets = [0, 0], sizes = [8, 32], strides = [1, 1]} : vector<8x128xf32> to vector<8x32xf32>
    %146 = vector.extract_strided_slice %144 {offsets = [0, 32], sizes = [8, 32], strides = [1, 1]} : vector<8x128xf32> to vector<8x32xf32>
    %147 = vector.extract_strided_slice %144 {offsets = [0, 64], sizes = [8, 32], strides = [1, 1]} : vector<8x128xf32> to vector<8x32xf32>
    %148 = vector.extract_strided_slice %144 {offsets = [0, 96], sizes = [8, 32], strides = [1, 1]} : vector<8x128xf32> to vector<8x32xf32>
    %149 = arith.mulf %146, %124 : vector<8x32xf32>
    %150 = arith.mulf %145, %147 : vector<8x32xf32>
    %151 = arith.addf %149, %150 : vector<8x32xf32>
    %152 = math.tanh %151 : vector<8x32xf32>
    %153 = arith.mulf %148, %152 : vector<8x32xf32>
    %154 = vector.extract_strided_slice %15 {offsets = [40, 0], sizes = [8, 128], strides = [1, 1]} : vector<64x128xf32> to vector<8x128xf32>
    %cst_44 = arith.constant dense<0.000000e+00> : vector<8x128xf32>
    %155 = tpu.matmul %153, %16, %cst_44 {dimension_numbers = #tpu.dot_dimension_numbers<[1], [0], [0], [1], [0, 0, 1, 1], [], []>} : vector<8x32xf32>, vector<32x128xf32>, vector<8x128xf32> -> vector<8x128xf32>
    %156 = arith.addf %154, %155 : vector<8x128xf32>
    %157 = tpu.iota {dimensions = array<i32: 1>} : vector<8x128xi32>
    %c64_i32_45 = arith.constant 64 : i32
    %158 = vector.broadcast %c64_i32_45 : i32 to vector<8x128xi32>
    %159 = arith.cmpi sge, %157, %158 : vector<8x128xi32>
    %c96_i32_46 = arith.constant 96 : i32
    %160 = vector.broadcast %c96_i32_46 : i32 to vector<8x128xi32>
    %161 = arith.cmpi slt, %157, %160 : vector<8x128xi32>
    %162 = arith.andi %159, %161 : vector<8x128xi1>
    %163 = math.tanh %156 : vector<8x128xf32>
    %cst_47 = arith.constant 0.000000e+00 : f32
    %164 = vector.broadcast %cst_47 : f32 to vector<8x128xf32>
    %165 = arith.subf %164, %156 : vector<8x128xf32>
    %166 = math.exp %165 : vector<8x128xf32>
    %cst_48 = arith.constant 1.000000e+00 : f32
    %167 = vector.broadcast %cst_48 : f32 to vector<8x128xf32>
    %168 = arith.addf %167, %166 : vector<8x128xf32>
    %cst_49 = arith.constant 1.000000e+00 : f32
    %169 = vector.broadcast %cst_49 : f32 to vector<8x128xf32>
    %170 = arith.divf %169, %168 : vector<8x128xf32>
    %171 = arith.select %162, %163, %170 : vector<8x128xi1>, vector<8x128xf32>
    %172 = vector.extract_strided_slice %171 {offsets = [0, 0], sizes = [8, 32], strides = [1, 1]} : vector<8x128xf32> to vector<8x32xf32>
    %173 = vector.extract_strided_slice %171 {offsets = [0, 32], sizes = [8, 32], strides = [1, 1]} : vector<8x128xf32> to vector<8x32xf32>
    %174 = vector.extract_strided_slice %171 {offsets = [0, 64], sizes = [8, 32], strides = [1, 1]} : vector<8x128xf32> to vector<8x32xf32>
    %175 = vector.extract_strided_slice %171 {offsets = [0, 96], sizes = [8, 32], strides = [1, 1]} : vector<8x128xf32> to vector<8x32xf32>
    %176 = arith.mulf %173, %151 : vector<8x32xf32>
    %177 = arith.mulf %172, %174 : vector<8x32xf32>
    %178 = arith.addf %176, %177 : vector<8x32xf32>
    %179 = math.tanh %178 : vector<8x32xf32>
    %180 = arith.mulf %175, %179 : vector<8x32xf32>
    %181 = vector.extract_strided_slice %15 {offsets = [48, 0], sizes = [8, 128], strides = [1, 1]} : vector<64x128xf32> to vector<8x128xf32>
    %cst_50 = arith.constant dense<0.000000e+00> : vector<8x128xf32>
    %182 = tpu.matmul %180, %16, %cst_50 {dimension_numbers = #tpu.dot_dimension_numbers<[1], [0], [0], [1], [0, 0, 1, 1], [], []>} : vector<8x32xf32>, vector<32x128xf32>, vector<8x128xf32> -> vector<8x128xf32>
    %183 = arith.addf %181, %182 : vector<8x128xf32>
    %184 = tpu.iota {dimensions = array<i32: 1>} : vector<8x128xi32>
    %c64_i32_51 = arith.constant 64 : i32
    %185 = vector.broadcast %c64_i32_51 : i32 to vector<8x128xi32>
    %186 = arith.cmpi sge, %184, %185 : vector<8x128xi32>
    %c96_i32_52 = arith.constant 96 : i32
    %187 = vector.broadcast %c96_i32_52 : i32 to vector<8x128xi32>
    %188 = arith.cmpi slt, %184, %187 : vector<8x128xi32>
    %189 = arith.andi %186, %188 : vector<8x128xi1>
    %190 = math.tanh %183 : vector<8x128xf32>
    %cst_53 = arith.constant 0.000000e+00 : f32
    %191 = vector.broadcast %cst_53 : f32 to vector<8x128xf32>
    %192 = arith.subf %191, %183 : vector<8x128xf32>
    %193 = math.exp %192 : vector<8x128xf32>
    %cst_54 = arith.constant 1.000000e+00 : f32
    %194 = vector.broadcast %cst_54 : f32 to vector<8x128xf32>
    %195 = arith.addf %194, %193 : vector<8x128xf32>
    %cst_55 = arith.constant 1.000000e+00 : f32
    %196 = vector.broadcast %cst_55 : f32 to vector<8x128xf32>
    %197 = arith.divf %196, %195 : vector<8x128xf32>
    %198 = arith.select %189, %190, %197 : vector<8x128xi1>, vector<8x128xf32>
    %199 = vector.extract_strided_slice %198 {offsets = [0, 0], sizes = [8, 32], strides = [1, 1]} : vector<8x128xf32> to vector<8x32xf32>
    %200 = vector.extract_strided_slice %198 {offsets = [0, 32], sizes = [8, 32], strides = [1, 1]} : vector<8x128xf32> to vector<8x32xf32>
    %201 = vector.extract_strided_slice %198 {offsets = [0, 64], sizes = [8, 32], strides = [1, 1]} : vector<8x128xf32> to vector<8x32xf32>
    %202 = vector.extract_strided_slice %198 {offsets = [0, 96], sizes = [8, 32], strides = [1, 1]} : vector<8x128xf32> to vector<8x32xf32>
    %203 = arith.mulf %200, %178 : vector<8x32xf32>
    %204 = arith.mulf %199, %201 : vector<8x32xf32>
    %205 = arith.addf %203, %204 : vector<8x32xf32>
    %206 = math.tanh %205 : vector<8x32xf32>
    %207 = arith.mulf %202, %206 : vector<8x32xf32>
    %208 = vector.extract_strided_slice %15 {offsets = [56, 0], sizes = [8, 128], strides = [1, 1]} : vector<64x128xf32> to vector<8x128xf32>
    %cst_56 = arith.constant dense<0.000000e+00> : vector<8x128xf32>
    %209 = tpu.matmul %207, %16, %cst_56 {dimension_numbers = #tpu.dot_dimension_numbers<[1], [0], [0], [1], [0, 0, 1, 1], [], []>} : vector<8x32xf32>, vector<32x128xf32>, vector<8x128xf32> -> vector<8x128xf32>
    %210 = arith.addf %208, %209 : vector<8x128xf32>
    %211 = tpu.iota {dimensions = array<i32: 1>} : vector<8x128xi32>
    %c64_i32_57 = arith.constant 64 : i32
    %212 = vector.broadcast %c64_i32_57 : i32 to vector<8x128xi32>
    %213 = arith.cmpi sge, %211, %212 : vector<8x128xi32>
    %c96_i32_58 = arith.constant 96 : i32
    %214 = vector.broadcast %c96_i32_58 : i32 to vector<8x128xi32>
    %215 = arith.cmpi slt, %211, %214 : vector<8x128xi32>
    %216 = arith.andi %213, %215 : vector<8x128xi1>
    %217 = math.tanh %210 : vector<8x128xf32>
    %cst_59 = arith.constant 0.000000e+00 : f32
    %218 = vector.broadcast %cst_59 : f32 to vector<8x128xf32>
    %219 = arith.subf %218, %210 : vector<8x128xf32>
    %220 = math.exp %219 : vector<8x128xf32>
    %cst_60 = arith.constant 1.000000e+00 : f32
    %221 = vector.broadcast %cst_60 : f32 to vector<8x128xf32>
    %222 = arith.addf %221, %220 : vector<8x128xf32>
    %cst_61 = arith.constant 1.000000e+00 : f32
    %223 = vector.broadcast %cst_61 : f32 to vector<8x128xf32>
    %224 = arith.divf %223, %222 : vector<8x128xf32>
    %225 = arith.select %216, %217, %224 : vector<8x128xi1>, vector<8x128xf32>
    %226 = vector.extract_strided_slice %225 {offsets = [0, 0], sizes = [8, 32], strides = [1, 1]} : vector<8x128xf32> to vector<8x32xf32>
    %227 = vector.extract_strided_slice %225 {offsets = [0, 32], sizes = [8, 32], strides = [1, 1]} : vector<8x128xf32> to vector<8x32xf32>
    %228 = vector.extract_strided_slice %225 {offsets = [0, 64], sizes = [8, 32], strides = [1, 1]} : vector<8x128xf32> to vector<8x32xf32>
    %229 = vector.extract_strided_slice %225 {offsets = [0, 96], sizes = [8, 32], strides = [1, 1]} : vector<8x128xf32> to vector<8x32xf32>
    %230 = arith.mulf %227, %205 : vector<8x32xf32>
    %231 = arith.mulf %226, %228 : vector<8x32xf32>
    %232 = arith.addf %230, %231 : vector<8x32xf32>
    %233 = math.tanh %232 : vector<8x32xf32>
    %234 = arith.mulf %229, %233 : vector<8x32xf32>
    %235 = vector.extract_strided_slice %234 {offsets = [0, 0], sizes = [2, 32], strides = [1, 1]} : vector<8x32xf32> to vector<2x32xf32>
    %c0_62 = arith.constant 0 : index
    %c0_63 = arith.constant 0 : index
    %236 = vector.load %arg9[%c0_62, %c0_63] : memref<32x16xf32, #tpu.memory_space<vmem>>, vector<32x16xf32>
    %cst_64 = arith.constant dense<0.000000e+00> : vector<2x16xf32>
    %237 = tpu.matmul %235, %236, %cst_64 {dimension_numbers = #tpu.dot_dimension_numbers<[1], [0], [0], [1], [0, 0, 1, 1], [], []>} : vector<2x32xf32>, vector<32x16xf32>, vector<2x16xf32> -> vector<2x16xf32>
    %c0_65 = arith.constant 0 : index
    %c0_66 = arith.constant 0 : index
    %238 = vector.load %arg10[%c0_65, %c0_66] : memref<1x16xf32, #tpu.memory_space<vmem>>, vector<1x16xf32>
    %239 = vector.broadcast %238 : vector<1x16xf32> to vector<2x16xf32>
    %240 = arith.addf %237, %239 : vector<2x16xf32>
    %cst_67 = arith.constant 0.000000e+00 : f32
    %241 = vector.broadcast %cst_67 : f32 to vector<2x16xf32>
    %242 = arith.cmpf ogt, %240, %241 : vector<2x16xf32>
    %cst_68 = arith.constant 1.000000e-01 : f32
    %243 = vector.broadcast %cst_68 : f32 to vector<2x16xf32>
    %244 = arith.mulf %243, %240 : vector<2x16xf32>
    %245 = arith.select %242, %240, %244 : vector<2x16xi1>, vector<2x16xf32>
    %246 = vector.extract_strided_slice %234 {offsets = [2, 0], sizes = [6, 32], strides = [1, 1]} : vector<8x32xf32> to vector<6x32xf32>
    %c0_69 = arith.constant 0 : index
    %c0_70 = arith.constant 0 : index
    %c0_71 = arith.constant 0 : index
    %247 = vector.load %arg1[%c0_69, %c0_70, %c0_71] : memref<3x26x6xf32, #tpu.memory_space<vmem>>, vector<1x26x6xf32>
    %248 = vector.shape_cast %247 : vector<1x26x6xf32> to vector<26x6xf32>
    %cst_72 = arith.constant dense<0.000000e+00> : vector<26x32xf32>
    %249 = tpu.matmul %248, %246, %cst_72 {dimension_numbers = #tpu.dot_dimension_numbers<[1], [0], [0], [1], [0, 0, 1, 1], [], []>} : vector<26x6xf32>, vector<6x32xf32>, vector<26x32xf32> -> vector<26x32xf32>
    %c1 = arith.constant 1 : index
    %c0_73 = arith.constant 0 : index
    %c0_74 = arith.constant 0 : index
    %250 = vector.load %arg1[%c1, %c0_73, %c0_74] : memref<3x26x6xf32, #tpu.memory_space<vmem>>, vector<1x26x6xf32>
    %251 = vector.shape_cast %250 : vector<1x26x6xf32> to vector<26x6xf32>
    %cst_75 = arith.constant dense<0.000000e+00> : vector<26x32xf32>
    %252 = tpu.matmul %251, %246, %cst_75 {dimension_numbers = #tpu.dot_dimension_numbers<[1], [0], [0], [1], [0, 0, 1, 1], [], []>} : vector<26x6xf32>, vector<6x32xf32>, vector<26x32xf32> -> vector<26x32xf32>
    %c2 = arith.constant 2 : index
    %c0_76 = arith.constant 0 : index
    %c0_77 = arith.constant 0 : index
    %253 = vector.load %arg1[%c2, %c0_76, %c0_77] : memref<3x26x6xf32, #tpu.memory_space<vmem>>, vector<1x26x6xf32>
    %254 = vector.shape_cast %253 : vector<1x26x6xf32> to vector<26x6xf32>
    %cst_78 = arith.constant dense<0.000000e+00> : vector<26x32xf32>
    %255 = tpu.matmul %254, %246, %cst_78 {dimension_numbers = #tpu.dot_dimension_numbers<[1], [0], [0], [1], [0, 0, 1, 1], [], []>} : vector<26x6xf32>, vector<6x32xf32>, vector<26x32xf32> -> vector<26x32xf32>
    %256 = vector.extract_strided_slice %249 {offsets = [0, 0], sizes = [22, 32], strides = [1, 1]} : vector<26x32xf32> to vector<22x32xf32>
    %c0_79 = arith.constant 0 : index
    %c0_80 = arith.constant 0 : index
    %c0_81 = arith.constant 0 : index
    %257 = vector.load %arg11[%c0_79, %c0_80, %c0_81] : memref<9x32x16xf32, #tpu.memory_space<vmem>>, vector<1x32x16xf32>
    %258 = vector.shape_cast %257 : vector<1x32x16xf32> to vector<32x16xf32>
    %cst_82 = arith.constant dense<0.000000e+00> : vector<22x16xf32>
    %259 = tpu.matmul %256, %258, %cst_82 {dimension_numbers = #tpu.dot_dimension_numbers<[1], [0], [0], [1], [0, 0, 1, 1], [], []>} : vector<22x32xf32>, vector<32x16xf32>, vector<22x16xf32> -> vector<22x16xf32>
    %260 = vector.extract_strided_slice %252 {offsets = [0, 0], sizes = [22, 32], strides = [1, 1]} : vector<26x32xf32> to vector<22x32xf32>
    %c1_83 = arith.constant 1 : index
    %c0_84 = arith.constant 0 : index
    %c0_85 = arith.constant 0 : index
    %261 = vector.load %arg11[%c1_83, %c0_84, %c0_85] : memref<9x32x16xf32, #tpu.memory_space<vmem>>, vector<1x32x16xf32>
    %262 = vector.shape_cast %261 : vector<1x32x16xf32> to vector<32x16xf32>
    %cst_86 = arith.constant dense<0.000000e+00> : vector<22x16xf32>
    %263 = tpu.matmul %260, %262, %cst_86 {dimension_numbers = #tpu.dot_dimension_numbers<[1], [0], [0], [1], [0, 0, 1, 1], [], []>} : vector<22x32xf32>, vector<32x16xf32>, vector<22x16xf32> -> vector<22x16xf32>
    %264 = arith.addf %259, %263 : vector<22x16xf32>
    %265 = vector.extract_strided_slice %255 {offsets = [0, 0], sizes = [22, 32], strides = [1, 1]} : vector<26x32xf32> to vector<22x32xf32>
    %c2_87 = arith.constant 2 : index
    %c0_88 = arith.constant 0 : index
    %c0_89 = arith.constant 0 : index
    %266 = vector.load %arg11[%c2_87, %c0_88, %c0_89] : memref<9x32x16xf32, #tpu.memory_space<vmem>>, vector<1x32x16xf32>
    %267 = vector.shape_cast %266 : vector<1x32x16xf32> to vector<32x16xf32>
    %cst_90 = arith.constant dense<0.000000e+00> : vector<22x16xf32>
    %268 = tpu.matmul %265, %267, %cst_90 {dimension_numbers = #tpu.dot_dimension_numbers<[1], [0], [0], [1], [0, 0, 1, 1], [], []>} : vector<22x32xf32>, vector<32x16xf32>, vector<22x16xf32> -> vector<22x16xf32>
    %269 = arith.addf %264, %268 : vector<22x16xf32>
    %270 = vector.extract_strided_slice %249 {offsets = [2, 0], sizes = [22, 32], strides = [1, 1]} : vector<26x32xf32> to vector<22x32xf32>
    %c3 = arith.constant 3 : index
    %c0_91 = arith.constant 0 : index
    %c0_92 = arith.constant 0 : index
    %271 = vector.load %arg11[%c3, %c0_91, %c0_92] : memref<9x32x16xf32, #tpu.memory_space<vmem>>, vector<1x32x16xf32>
    %272 = vector.shape_cast %271 : vector<1x32x16xf32> to vector<32x16xf32>
    %cst_93 = arith.constant dense<0.000000e+00> : vector<22x16xf32>
    %273 = tpu.matmul %270, %272, %cst_93 {dimension_numbers = #tpu.dot_dimension_numbers<[1], [0], [0], [1], [0, 0, 1, 1], [], []>} : vector<22x32xf32>, vector<32x16xf32>, vector<22x16xf32> -> vector<22x16xf32>
    %274 = arith.addf %269, %273 : vector<22x16xf32>
    %275 = vector.extract_strided_slice %252 {offsets = [2, 0], sizes = [22, 32], strides = [1, 1]} : vector<26x32xf32> to vector<22x32xf32>
    %c4 = arith.constant 4 : index
    %c0_94 = arith.constant 0 : index
    %c0_95 = arith.constant 0 : index
    %276 = vector.load %arg11[%c4, %c0_94, %c0_95] : memref<9x32x16xf32, #tpu.memory_space<vmem>>, vector<1x32x16xf32>
    %277 = vector.shape_cast %276 : vector<1x32x16xf32> to vector<32x16xf32>
    %cst_96 = arith.constant dense<0.000000e+00> : vector<22x16xf32>
    %278 = tpu.matmul %275, %277, %cst_96 {dimension_numbers = #tpu.dot_dimension_numbers<[1], [0], [0], [1], [0, 0, 1, 1], [], []>} : vector<22x32xf32>, vector<32x16xf32>, vector<22x16xf32> -> vector<22x16xf32>
    %279 = arith.addf %274, %278 : vector<22x16xf32>
    %280 = vector.extract_strided_slice %255 {offsets = [2, 0], sizes = [22, 32], strides = [1, 1]} : vector<26x32xf32> to vector<22x32xf32>
    %c5 = arith.constant 5 : index
    %c0_97 = arith.constant 0 : index
    %c0_98 = arith.constant 0 : index
    %281 = vector.load %arg11[%c5, %c0_97, %c0_98] : memref<9x32x16xf32, #tpu.memory_space<vmem>>, vector<1x32x16xf32>
    %282 = vector.shape_cast %281 : vector<1x32x16xf32> to vector<32x16xf32>
    %cst_99 = arith.constant dense<0.000000e+00> : vector<22x16xf32>
    %283 = tpu.matmul %280, %282, %cst_99 {dimension_numbers = #tpu.dot_dimension_numbers<[1], [0], [0], [1], [0, 0, 1, 1], [], []>} : vector<22x32xf32>, vector<32x16xf32>, vector<22x16xf32> -> vector<22x16xf32>
    %284 = arith.addf %279, %283 : vector<22x16xf32>
    %285 = vector.extract_strided_slice %249 {offsets = [4, 0], sizes = [22, 32], strides = [1, 1]} : vector<26x32xf32> to vector<22x32xf32>
    %c6 = arith.constant 6 : index
    %c0_100 = arith.constant 0 : index
    %c0_101 = arith.constant 0 : index
    %286 = vector.load %arg11[%c6, %c0_100, %c0_101] : memref<9x32x16xf32, #tpu.memory_space<vmem>>, vector<1x32x16xf32>
    %287 = vector.shape_cast %286 : vector<1x32x16xf32> to vector<32x16xf32>
    %cst_102 = arith.constant dense<0.000000e+00> : vector<22x16xf32>
    %288 = tpu.matmul %285, %287, %cst_102 {dimension_numbers = #tpu.dot_dimension_numbers<[1], [0], [0], [1], [0, 0, 1, 1], [], []>} : vector<22x32xf32>, vector<32x16xf32>, vector<22x16xf32> -> vector<22x16xf32>
    %289 = arith.addf %284, %288 : vector<22x16xf32>
    %290 = vector.extract_strided_slice %252 {offsets = [4, 0], sizes = [22, 32], strides = [1, 1]} : vector<26x32xf32> to vector<22x32xf32>
    %c7 = arith.constant 7 : index
    %c0_103 = arith.constant 0 : index
    %c0_104 = arith.constant 0 : index
    %291 = vector.load %arg11[%c7, %c0_103, %c0_104] : memref<9x32x16xf32, #tpu.memory_space<vmem>>, vector<1x32x16xf32>
    %292 = vector.shape_cast %291 : vector<1x32x16xf32> to vector<32x16xf32>
    %cst_105 = arith.constant dense<0.000000e+00> : vector<22x16xf32>
    %293 = tpu.matmul %290, %292, %cst_105 {dimension_numbers = #tpu.dot_dimension_numbers<[1], [0], [0], [1], [0, 0, 1, 1], [], []>} : vector<22x32xf32>, vector<32x16xf32>, vector<22x16xf32> -> vector<22x16xf32>
    %294 = arith.addf %289, %293 : vector<22x16xf32>
    %295 = vector.extract_strided_slice %255 {offsets = [4, 0], sizes = [22, 32], strides = [1, 1]} : vector<26x32xf32> to vector<22x32xf32>
    %c8 = arith.constant 8 : index
    %c0_106 = arith.constant 0 : index
    %c0_107 = arith.constant 0 : index
    %296 = vector.load %arg11[%c8, %c0_106, %c0_107] : memref<9x32x16xf32, #tpu.memory_space<vmem>>, vector<1x32x16xf32>
    %297 = vector.shape_cast %296 : vector<1x32x16xf32> to vector<32x16xf32>
    %cst_108 = arith.constant dense<0.000000e+00> : vector<22x16xf32>
    %298 = tpu.matmul %295, %297, %cst_108 {dimension_numbers = #tpu.dot_dimension_numbers<[1], [0], [0], [1], [0, 0, 1, 1], [], []>} : vector<22x32xf32>, vector<32x16xf32>, vector<22x16xf32> -> vector<22x16xf32>
    %299 = arith.addf %294, %298 : vector<22x16xf32>
    %c0_109 = arith.constant 0 : index
    %c0_110 = arith.constant 0 : index
    %300 = vector.load %arg12[%c0_109, %c0_110] : memref<1x16xf32, #tpu.memory_space<vmem>>, vector<1x16xf32>
    %301 = vector.broadcast %300 : vector<1x16xf32> to vector<22x16xf32>
    %302 = arith.addf %299, %301 : vector<22x16xf32>
    %cst_111 = arith.constant 0.000000e+00 : f32
    %303 = vector.broadcast %cst_111 : f32 to vector<22x16xf32>
    %304 = arith.cmpf ogt, %302, %303 : vector<22x16xf32>
    %cst_112 = arith.constant 1.000000e-01 : f32
    %305 = vector.broadcast %cst_112 : f32 to vector<22x16xf32>
    %306 = arith.mulf %305, %302 : vector<22x16xf32>
    %307 = arith.select %304, %302, %306 : vector<22x16xi1>, vector<22x16xf32>
    %308 = vector.extract_strided_slice %307 {offsets = [0, 0], sizes = [18, 16], strides = [1, 1]} : vector<22x16xf32> to vector<18x16xf32>
    %c0_113 = arith.constant 0 : index
    %c0_114 = arith.constant 0 : index
    %c0_115 = arith.constant 0 : index
    %309 = vector.load %arg13[%c0_113, %c0_114, %c0_115] : memref<3x16x8xf32, #tpu.memory_space<vmem>>, vector<1x16x8xf32>
    %310 = vector.shape_cast %309 : vector<1x16x8xf32> to vector<16x8xf32>
    %cst_116 = arith.constant dense<0.000000e+00> : vector<18x8xf32>
    %311 = tpu.matmul %308, %310, %cst_116 {dimension_numbers = #tpu.dot_dimension_numbers<[1], [0], [0], [1], [0, 0, 1, 1], [], []>} : vector<18x16xf32>, vector<16x8xf32>, vector<18x8xf32> -> vector<18x8xf32>
    %312 = vector.extract_strided_slice %307 {offsets = [2, 0], sizes = [18, 16], strides = [1, 1]} : vector<22x16xf32> to vector<18x16xf32>
    %c1_117 = arith.constant 1 : index
    %c0_118 = arith.constant 0 : index
    %c0_119 = arith.constant 0 : index
    %313 = vector.load %arg13[%c1_117, %c0_118, %c0_119] : memref<3x16x8xf32, #tpu.memory_space<vmem>>, vector<1x16x8xf32>
    %314 = vector.shape_cast %313 : vector<1x16x8xf32> to vector<16x8xf32>
    %cst_120 = arith.constant dense<0.000000e+00> : vector<18x8xf32>
    %315 = tpu.matmul %312, %314, %cst_120 {dimension_numbers = #tpu.dot_dimension_numbers<[1], [0], [0], [1], [0, 0, 1, 1], [], []>} : vector<18x16xf32>, vector<16x8xf32>, vector<18x8xf32> -> vector<18x8xf32>
    %316 = arith.addf %311, %315 : vector<18x8xf32>
    %317 = vector.extract_strided_slice %307 {offsets = [4, 0], sizes = [18, 16], strides = [1, 1]} : vector<22x16xf32> to vector<18x16xf32>
    %c2_121 = arith.constant 2 : index
    %c0_122 = arith.constant 0 : index
    %c0_123 = arith.constant 0 : index
    %318 = vector.load %arg13[%c2_121, %c0_122, %c0_123] : memref<3x16x8xf32, #tpu.memory_space<vmem>>, vector<1x16x8xf32>
    %319 = vector.shape_cast %318 : vector<1x16x8xf32> to vector<16x8xf32>
    %cst_124 = arith.constant dense<0.000000e+00> : vector<18x8xf32>
    %320 = tpu.matmul %317, %319, %cst_124 {dimension_numbers = #tpu.dot_dimension_numbers<[1], [0], [0], [1], [0, 0, 1, 1], [], []>} : vector<18x16xf32>, vector<16x8xf32>, vector<18x8xf32> -> vector<18x8xf32>
    %321 = arith.addf %316, %320 : vector<18x8xf32>
    %c0_125 = arith.constant 0 : index
    %c0_126 = arith.constant 0 : index
    %322 = vector.load %arg14[%c0_125, %c0_126] : memref<1x8xf32, #tpu.memory_space<vmem>>, vector<1x8xf32>
    %323 = vector.broadcast %322 : vector<1x8xf32> to vector<18x8xf32>
    %324 = arith.addf %321, %323 : vector<18x8xf32>
    %cst_127 = arith.constant 0.000000e+00 : f32
    %325 = vector.broadcast %cst_127 : f32 to vector<18x8xf32>
    %326 = arith.cmpf ogt, %324, %325 : vector<18x8xf32>
    %cst_128 = arith.constant 1.000000e-01 : f32
    %327 = vector.broadcast %cst_128 : f32 to vector<18x8xf32>
    %328 = arith.mulf %327, %324 : vector<18x8xf32>
    %329 = arith.select %326, %324, %328 : vector<18x8xi1>, vector<18x8xf32>
    %330 = vector.extract_strided_slice %329 {offsets = [0, 0], sizes = [2, 8], strides = [1, 1]} : vector<18x8xf32> to vector<2x8xf32>
    %331 = vector.extract_strided_slice %329 {offsets = [2, 0], sizes = [2, 8], strides = [1, 1]} : vector<18x8xf32> to vector<2x8xf32>
    %332 = vector.extract_strided_slice %329 {offsets = [4, 0], sizes = [2, 8], strides = [1, 1]} : vector<18x8xf32> to vector<2x8xf32>
    %333 = arith.maximumf %331, %332 : vector<2x8xf32>
    %334 = vector.extract_strided_slice %329 {offsets = [6, 0], sizes = [2, 8], strides = [1, 1]} : vector<18x8xf32> to vector<2x8xf32>
    %335 = vector.extract_strided_slice %329 {offsets = [8, 0], sizes = [2, 8], strides = [1, 1]} : vector<18x8xf32> to vector<2x8xf32>
    %336 = arith.maximumf %334, %335 : vector<2x8xf32>
    %337 = vector.extract_strided_slice %329 {offsets = [10, 0], sizes = [2, 8], strides = [1, 1]} : vector<18x8xf32> to vector<2x8xf32>
    %338 = vector.extract_strided_slice %329 {offsets = [12, 0], sizes = [2, 8], strides = [1, 1]} : vector<18x8xf32> to vector<2x8xf32>
    %339 = arith.maximumf %337, %338 : vector<2x8xf32>
    %340 = vector.extract_strided_slice %329 {offsets = [14, 0], sizes = [2, 8], strides = [1, 1]} : vector<18x8xf32> to vector<2x8xf32>
    %341 = vector.extract_strided_slice %329 {offsets = [16, 0], sizes = [2, 8], strides = [1, 1]} : vector<18x8xf32> to vector<2x8xf32>
    %342 = arith.maximumf %340, %341 : vector<2x8xf32>
    %c0_129 = arith.constant 0 : index
    %c0_130 = arith.constant 0 : index
    %343 = vector.load %arg17[%c0_129, %c0_130] : memref<1x5xf32, #tpu.memory_space<vmem>>, vector<1x5xf32>
    %c0_131 = arith.constant 0 : index
    %c0_132 = arith.constant 0 : index
    %344 = vector.load %arg16[%c0_131, %c0_132] : memref<16x5xf32, #tpu.memory_space<vmem>>, vector<16x5xf32>
    %cst_133 = arith.constant dense<0.000000e+00> : vector<2x5xf32>
    %345 = tpu.matmul %245, %344, %cst_133 {dimension_numbers = #tpu.dot_dimension_numbers<[1], [0], [0], [1], [0, 0, 1, 1], [], []>} : vector<2x16xf32>, vector<16x5xf32>, vector<2x5xf32> -> vector<2x5xf32>
    %346 = vector.broadcast %343 : vector<1x5xf32> to vector<2x5xf32>
    %347 = arith.addf %346, %345 : vector<2x5xf32>
    %c0_134 = arith.constant 0 : index
    %c0_135 = arith.constant 0 : index
    %348 = vector.load %arg23[%c0_134, %c0_135] : memref<1x128xf32, #tpu.memory_space<vmem>>, vector<1x128xf32>
    %c0_136 = arith.constant 0 : index
    %c0_137 = arith.constant 0 : index
    %349 = vector.load %arg19[%c0_136, %c0_137] : memref<16x128xf32, #tpu.memory_space<vmem>>, vector<16x128xf32>
    %cst_138 = arith.constant dense<0.000000e+00> : vector<2x128xf32>
    %350 = tpu.matmul %245, %349, %cst_138 {dimension_numbers = #tpu.dot_dimension_numbers<[1], [0], [0], [1], [0, 0, 1, 1], [], []>} : vector<2x16xf32>, vector<16x128xf32>, vector<2x128xf32> -> vector<2x128xf32>
    %351 = vector.broadcast %348 : vector<1x128xf32> to vector<2x128xf32>
    %352 = arith.addf %351, %350 : vector<2x128xf32>
    %c0_139 = arith.constant 0 : index
    %c0_140 = arith.constant 0 : index
    %353 = vector.load %arg2[%c0_139, %c0_140] : memref<2x3xf32, #tpu.memory_space<vmem>>, vector<2x3xf32>
    %c0_141 = arith.constant 0 : index
    %c0_142 = arith.constant 0 : index
    %354 = vector.load %arg20[%c0_141, %c0_142] : memref<3x128xf32, #tpu.memory_space<vmem>>, vector<3x128xf32>
    %cst_143 = arith.constant dense<0.000000e+00> : vector<2x128xf32>
    %355 = tpu.matmul %353, %354, %cst_143 {dimension_numbers = #tpu.dot_dimension_numbers<[1], [0], [0], [1], [0, 0, 1, 1], [], []>} : vector<2x3xf32>, vector<3x128xf32>, vector<2x128xf32> -> vector<2x128xf32>
    %356 = arith.addf %352, %355 : vector<2x128xf32>
    %c0_144 = arith.constant 0 : index
    %c0_145 = arith.constant 0 : index
    %357 = vector.load %arg3[%c0_144, %c0_145] : memref<2x2xf32, #tpu.memory_space<vmem>>, vector<2x2xf32>
    %c0_146 = arith.constant 0 : index
    %c0_147 = arith.constant 0 : index
    %358 = vector.load %arg21[%c0_146, %c0_147] : memref<2x128xf32, #tpu.memory_space<vmem>>, vector<2x128xf32>
    %cst_148 = arith.constant dense<0.000000e+00> : vector<2x128xf32>
    %359 = tpu.matmul %357, %358, %cst_148 {dimension_numbers = #tpu.dot_dimension_numbers<[1], [0], [0], [1], [0, 0, 1, 1], [], []>} : vector<2x2xf32>, vector<2x128xf32>, vector<2x128xf32> -> vector<2x128xf32>
    %360 = arith.addf %356, %359 : vector<2x128xf32>
    %c0_149 = arith.constant 0 : index
    %c0_150 = arith.constant 0 : index
    %c0_151 = arith.constant 0 : index
    %361 = vector.load %arg15[%c0_149, %c0_150, %c0_151] : memref<5x8x5xf32, #tpu.memory_space<vmem>>, vector<1x8x5xf32>
    %362 = vector.shape_cast %361 : vector<1x8x5xf32> to vector<8x5xf32>
    %cst_152 = arith.constant dense<0.000000e+00> : vector<2x5xf32>
    %363 = tpu.matmul %330, %362, %cst_152 {dimension_numbers = #tpu.dot_dimension_numbers<[1], [0], [0], [1], [0, 0, 1, 1], [], []>} : vector<2x8xf32>, vector<8x5xf32>, vector<2x5xf32> -> vector<2x5xf32>
    %364 = arith.addf %347, %363 : vector<2x5xf32>
    %c0_153 = arith.constant 0 : index
    %c0_154 = arith.constant 0 : index
    %c0_155 = arith.constant 0 : index
    %365 = vector.load %arg18[%c0_153, %c0_154, %c0_155] : memref<5x8x128xf32, #tpu.memory_space<vmem>>, vector<1x8x128xf32>
    %366 = vector.shape_cast %365 : vector<1x8x128xf32> to vector<8x128xf32>
    %cst_156 = arith.constant dense<0.000000e+00> : vector<2x128xf32>
    %367 = tpu.matmul %330, %366, %cst_156 {dimension_numbers = #tpu.dot_dimension_numbers<[1], [0], [0], [1], [0, 0, 1, 1], [], []>} : vector<2x8xf32>, vector<8x128xf32>, vector<2x128xf32> -> vector<2x128xf32>
    %368 = arith.addf %360, %367 : vector<2x128xf32>
    %c1_157 = arith.constant 1 : index
    %c0_158 = arith.constant 0 : index
    %c0_159 = arith.constant 0 : index
    %369 = vector.load %arg15[%c1_157, %c0_158, %c0_159] : memref<5x8x5xf32, #tpu.memory_space<vmem>>, vector<1x8x5xf32>
    %370 = vector.shape_cast %369 : vector<1x8x5xf32> to vector<8x5xf32>
    %cst_160 = arith.constant dense<0.000000e+00> : vector<2x5xf32>
    %371 = tpu.matmul %333, %370, %cst_160 {dimension_numbers = #tpu.dot_dimension_numbers<[1], [0], [0], [1], [0, 0, 1, 1], [], []>} : vector<2x8xf32>, vector<8x5xf32>, vector<2x5xf32> -> vector<2x5xf32>
    %372 = arith.addf %364, %371 : vector<2x5xf32>
    %c1_161 = arith.constant 1 : index
    %c0_162 = arith.constant 0 : index
    %c0_163 = arith.constant 0 : index
    %373 = vector.load %arg18[%c1_161, %c0_162, %c0_163] : memref<5x8x128xf32, #tpu.memory_space<vmem>>, vector<1x8x128xf32>
    %374 = vector.shape_cast %373 : vector<1x8x128xf32> to vector<8x128xf32>
    %cst_164 = arith.constant dense<0.000000e+00> : vector<2x128xf32>
    %375 = tpu.matmul %333, %374, %cst_164 {dimension_numbers = #tpu.dot_dimension_numbers<[1], [0], [0], [1], [0, 0, 1, 1], [], []>} : vector<2x8xf32>, vector<8x128xf32>, vector<2x128xf32> -> vector<2x128xf32>
    %376 = arith.addf %368, %375 : vector<2x128xf32>
    %c2_165 = arith.constant 2 : index
    %c0_166 = arith.constant 0 : index
    %c0_167 = arith.constant 0 : index
    %377 = vector.load %arg15[%c2_165, %c0_166, %c0_167] : memref<5x8x5xf32, #tpu.memory_space<vmem>>, vector<1x8x5xf32>
    %378 = vector.shape_cast %377 : vector<1x8x5xf32> to vector<8x5xf32>
    %cst_168 = arith.constant dense<0.000000e+00> : vector<2x5xf32>
    %379 = tpu.matmul %336, %378, %cst_168 {dimension_numbers = #tpu.dot_dimension_numbers<[1], [0], [0], [1], [0, 0, 1, 1], [], []>} : vector<2x8xf32>, vector<8x5xf32>, vector<2x5xf32> -> vector<2x5xf32>
    %380 = arith.addf %372, %379 : vector<2x5xf32>
    %c2_169 = arith.constant 2 : index
    %c0_170 = arith.constant 0 : index
    %c0_171 = arith.constant 0 : index
    %381 = vector.load %arg18[%c2_169, %c0_170, %c0_171] : memref<5x8x128xf32, #tpu.memory_space<vmem>>, vector<1x8x128xf32>
    %382 = vector.shape_cast %381 : vector<1x8x128xf32> to vector<8x128xf32>
    %cst_172 = arith.constant dense<0.000000e+00> : vector<2x128xf32>
    %383 = tpu.matmul %336, %382, %cst_172 {dimension_numbers = #tpu.dot_dimension_numbers<[1], [0], [0], [1], [0, 0, 1, 1], [], []>} : vector<2x8xf32>, vector<8x128xf32>, vector<2x128xf32> -> vector<2x128xf32>
    %384 = arith.addf %376, %383 : vector<2x128xf32>
    %c3_173 = arith.constant 3 : index
    %c0_174 = arith.constant 0 : index
    %c0_175 = arith.constant 0 : index
    %385 = vector.load %arg15[%c3_173, %c0_174, %c0_175] : memref<5x8x5xf32, #tpu.memory_space<vmem>>, vector<1x8x5xf32>
    %386 = vector.shape_cast %385 : vector<1x8x5xf32> to vector<8x5xf32>
    %cst_176 = arith.constant dense<0.000000e+00> : vector<2x5xf32>
    %387 = tpu.matmul %339, %386, %cst_176 {dimension_numbers = #tpu.dot_dimension_numbers<[1], [0], [0], [1], [0, 0, 1, 1], [], []>} : vector<2x8xf32>, vector<8x5xf32>, vector<2x5xf32> -> vector<2x5xf32>
    %388 = arith.addf %380, %387 : vector<2x5xf32>
    %c3_177 = arith.constant 3 : index
    %c0_178 = arith.constant 0 : index
    %c0_179 = arith.constant 0 : index
    %389 = vector.load %arg18[%c3_177, %c0_178, %c0_179] : memref<5x8x128xf32, #tpu.memory_space<vmem>>, vector<1x8x128xf32>
    %390 = vector.shape_cast %389 : vector<1x8x128xf32> to vector<8x128xf32>
    %cst_180 = arith.constant dense<0.000000e+00> : vector<2x128xf32>
    %391 = tpu.matmul %339, %390, %cst_180 {dimension_numbers = #tpu.dot_dimension_numbers<[1], [0], [0], [1], [0, 0, 1, 1], [], []>} : vector<2x8xf32>, vector<8x128xf32>, vector<2x128xf32> -> vector<2x128xf32>
    %392 = arith.addf %384, %391 : vector<2x128xf32>
    %c4_181 = arith.constant 4 : index
    %c0_182 = arith.constant 0 : index
    %c0_183 = arith.constant 0 : index
    %393 = vector.load %arg15[%c4_181, %c0_182, %c0_183] : memref<5x8x5xf32, #tpu.memory_space<vmem>>, vector<1x8x5xf32>
    %394 = vector.shape_cast %393 : vector<1x8x5xf32> to vector<8x5xf32>
    %cst_184 = arith.constant dense<0.000000e+00> : vector<2x5xf32>
    %395 = tpu.matmul %342, %394, %cst_184 {dimension_numbers = #tpu.dot_dimension_numbers<[1], [0], [0], [1], [0, 0, 1, 1], [], []>} : vector<2x8xf32>, vector<8x5xf32>, vector<2x5xf32> -> vector<2x5xf32>
    %396 = arith.addf %388, %395 : vector<2x5xf32>
    %c4_185 = arith.constant 4 : index
    %c0_186 = arith.constant 0 : index
    %c0_187 = arith.constant 0 : index
    %397 = vector.load %arg18[%c4_185, %c0_186, %c0_187] : memref<5x8x128xf32, #tpu.memory_space<vmem>>, vector<1x8x128xf32>
    %398 = vector.shape_cast %397 : vector<1x8x128xf32> to vector<8x128xf32>
    %cst_188 = arith.constant dense<0.000000e+00> : vector<2x128xf32>
    %399 = tpu.matmul %342, %398, %cst_188 {dimension_numbers = #tpu.dot_dimension_numbers<[1], [0], [0], [1], [0, 0, 1, 1], [], []>} : vector<2x8xf32>, vector<8x128xf32>, vector<2x128xf32> -> vector<2x128xf32>
    %400 = arith.addf %392, %399 : vector<2x128xf32>
    %401 = vector.extract_strided_slice %396 {offsets = [0, 0], sizes = [2, 3], strides = [1, 1]} : vector<2x5xf32> to vector<2x3xf32>
    %cst_189 = arith.constant dense<0xFF800000> : vector<2xf32>
    %402 = vector.multi_reduction <maximumf>, %401, %cst_189 [1] : vector<2x3xf32> to vector<2xf32>
    %403 = vector.shape_cast %402 : vector<2xf32> to vector<2x1xf32>
    %404 = vector.broadcast %403 : vector<2x1xf32> to vector<2x3xf32>
    %405 = arith.subf %401, %404 : vector<2x3xf32>
    %406 = math.exp %405 : vector<2x3xf32>
    %cst_190 = arith.constant dense<0.000000e+00> : vector<2xf32>
    %407 = vector.multi_reduction <add>, %406, %cst_190 [1] : vector<2x3xf32> to vector<2xf32>
    %408 = vector.shape_cast %407 : vector<2xf32> to vector<2x1xf32>
    %409 = vector.broadcast %408 : vector<2x1xf32> to vector<2x3xf32>
    %410 = arith.divf %406, %409 : vector<2x3xf32>
    %c0_191 = arith.constant 0 : index
    %c0_192 = arith.constant 0 : index
    %411 = vector.load %arg27[%c0_191, %c0_192] : memref<2x5xf32, #tpu.memory_space<vmem>>, vector<2x3xf32>
    tpu.vector_store %arg27[%c0_191, %c0_192], %410 {strides = array<i32>} : memref<2x5xf32, #tpu.memory_space<vmem>>, vector<2x3xf32>,
    %412 = vector.extract_strided_slice %396 {offsets = [0, 3], sizes = [2, 2], strides = [1, 1]} : vector<2x5xf32> to vector<2x2xf32>
    %cst_193 = arith.constant dense<0xFF800000> : vector<2xf32>
    %413 = vector.multi_reduction <maximumf>, %412, %cst_193 [1] : vector<2x2xf32> to vector<2xf32>
    %414 = vector.shape_cast %413 : vector<2xf32> to vector<2x1xf32>
    %415 = vector.broadcast %414 : vector<2x1xf32> to vector<2x2xf32>
    %416 = arith.subf %412, %415 : vector<2x2xf32>
    %417 = math.exp %416 : vector<2x2xf32>
    %cst_194 = arith.constant dense<0.000000e+00> : vector<2xf32>
    %418 = vector.multi_reduction <add>, %417, %cst_194 [1] : vector<2x2xf32> to vector<2xf32>
    %419 = vector.shape_cast %418 : vector<2xf32> to vector<2x1xf32>
    %420 = vector.broadcast %419 : vector<2x1xf32> to vector<2x2xf32>
    %421 = arith.divf %417, %420 : vector<2x2xf32>
    %c0_195 = arith.constant 0 : index
    %c3_196 = arith.constant 3 : index
    %422 = vector.load %arg27[%c0_195, %c3_196] : memref<2x5xf32, #tpu.memory_space<vmem>>, vector<2x2xf32>
    tpu.vector_store %arg27[%c0_195, %c3_196], %421 {strides = array<i32>} : memref<2x5xf32, #tpu.memory_space<vmem>>, vector<2x2xf32>,
    %c0_197 = arith.constant 0 : index
    %c0_198 = arith.constant 0 : index
    %423 = vector.load %arg22[%c0_197, %c0_198] : memref<32x128xf32, #tpu.memory_space<vmem>>, vector<32x128xf32>
    %c0_199 = arith.constant 0 : index
    %c0_200 = arith.constant 0 : index
    %424 = vector.load %arg24[%c0_199, %c0_200] : memref<32x5xf32, #tpu.memory_space<vmem>>, vector<32x5xf32>
    %c0_201 = arith.constant 0 : index
    %c0_202 = arith.constant 0 : index
    %425 = vector.load %arg25[%c0_201, %c0_202] : memref<1x5xf32, #tpu.memory_space<vmem>>, vector<1x5xf32>
    %cst_203 = arith.constant 0.000000e+00 : f32
    %426 = vector.broadcast %cst_203 : f32 to vector<2x32xf32>
    %cst_204 = arith.constant 0.000000e+00 : f32
    %427 = vector.broadcast %cst_204 : f32 to vector<2x32xf32>
    %cst_205 = arith.constant dense<0.000000e+00> : vector<2x128xf32>
    %428 = tpu.matmul %426, %423, %cst_205 {dimension_numbers = #tpu.dot_dimension_numbers<[1], [0], [0], [1], [0, 0, 1, 1], [], []>} : vector<2x32xf32>, vector<32x128xf32>, vector<2x128xf32> -> vector<2x128xf32>
    %429 = arith.addf %400, %428 : vector<2x128xf32>
    %430 = tpu.iota {dimensions = array<i32: 1>} : vector<2x128xi32>
    %c64_i32_206 = arith.constant 64 : i32
    %431 = vector.broadcast %c64_i32_206 : i32 to vector<2x128xi32>
    %432 = arith.cmpi sge, %430, %431 : vector<2x128xi32>
    %c96_i32_207 = arith.constant 96 : i32
    %433 = vector.broadcast %c96_i32_207 : i32 to vector<2x128xi32>
    %434 = arith.cmpi slt, %430, %433 : vector<2x128xi32>
    %435 = arith.andi %432, %434 : vector<2x128xi1>
    %436 = math.tanh %429 : vector<2x128xf32>
    %cst_208 = arith.constant 0.000000e+00 : f32
    %437 = vector.broadcast %cst_208 : f32 to vector<2x128xf32>
    %438 = arith.subf %437, %429 : vector<2x128xf32>
    %439 = math.exp %438 : vector<2x128xf32>
    %cst_209 = arith.constant 1.000000e+00 : f32
    %440 = vector.broadcast %cst_209 : f32 to vector<2x128xf32>
    %441 = arith.addf %440, %439 : vector<2x128xf32>
    %cst_210 = arith.constant 1.000000e+00 : f32
    %442 = vector.broadcast %cst_210 : f32 to vector<2x128xf32>
    %443 = arith.divf %442, %441 : vector<2x128xf32>
    %444 = arith.select %435, %436, %443 : vector<2x128xi1>, vector<2x128xf32>
    %445 = vector.extract_strided_slice %444 {offsets = [0, 0], sizes = [2, 32], strides = [1, 1]} : vector<2x128xf32> to vector<2x32xf32>
    %446 = vector.extract_strided_slice %444 {offsets = [0, 32], sizes = [2, 32], strides = [1, 1]} : vector<2x128xf32> to vector<2x32xf32>
    %447 = vector.extract_strided_slice %444 {offsets = [0, 64], sizes = [2, 32], strides = [1, 1]} : vector<2x128xf32> to vector<2x32xf32>
    %448 = vector.extract_strided_slice %444 {offsets = [0, 96], sizes = [2, 32], strides = [1, 1]} : vector<2x128xf32> to vector<2x32xf32>
    %449 = arith.mulf %446, %427 : vector<2x32xf32>
    %450 = arith.mulf %445, %447 : vector<2x32xf32>
    %451 = arith.addf %449, %450 : vector<2x32xf32>
    %452 = math.tanh %451 : vector<2x32xf32>
    %453 = arith.mulf %448, %452 : vector<2x32xf32>
    %cst_211 = arith.constant dense<0.000000e+00> : vector<2x5xf32>
    %454 = tpu.matmul %453, %424, %cst_211 {dimension_numbers = #tpu.dot_dimension_numbers<[1], [0], [0], [1], [0, 0, 1, 1], [], []>} : vector<2x32xf32>, vector<32x5xf32>, vector<2x5xf32> -> vector<2x5xf32>
    %455 = vector.broadcast %425 : vector<1x5xf32> to vector<2x5xf32>
    %456 = arith.addf %454, %455 : vector<2x5xf32>
    %457 = tpu.iota {dimensions = array<i32: 1>} : vector<2x5xi32>
    %c2_i32 = arith.constant 2 : i32
    %458 = vector.broadcast %c2_i32 : i32 to vector<2x5xi32>
    %459 = arith.cmpi slt, %457, %458 : vector<2x5xi32>
    %c4_i32 = arith.constant 4 : i32
    %460 = vector.broadcast %c4_i32 : i32 to vector<2x5xi32>
    %461 = arith.cmpi slt, %457, %460 : vector<2x5xi32>
    %462 = math.exp %456 : vector<2x5xf32>
    %463 = math.tanh %456 : vector<2x5xf32>
    %464 = arith.select %461, %462, %463 : vector<2x5xi1>, vector<2x5xf32>
    %465 = arith.select %459, %456, %464 : vector<2x5xi1>, vector<2x5xf32>
    %c0_212 = arith.constant 0 : index
    %c0_213 = arith.constant 0 : index
    %c0_214 = arith.constant 0 : index
    %466 = vector.load %arg26[%c0_212, %c0_213, %c0_214] : memref<5x2x5xf32, #tpu.memory_space<vmem>>, vector<1x2x5xf32>
    %467 = vector.shape_cast %466 : vector<1x2x5xf32> to vector<2x5xf32>
    %468 = vector.shape_cast %465 : vector<2x5xf32> to vector<1x2x5xf32>
    tpu.vector_store %arg26[%c0_212, %c0_213, %c0_214], %468 {strides = array<i32>} : memref<5x2x5xf32, #tpu.memory_space<vmem>>, vector<1x2x5xf32>,
    %cst_215 = arith.constant dense<0.000000e+00> : vector<2x128xf32>
    %469 = tpu.matmul %453, %423, %cst_215 {dimension_numbers = #tpu.dot_dimension_numbers<[1], [0], [0], [1], [0, 0, 1, 1], [], []>} : vector<2x32xf32>, vector<32x128xf32>, vector<2x128xf32> -> vector<2x128xf32>
    %470 = arith.addf %400, %469 : vector<2x128xf32>
    %471 = tpu.iota {dimensions = array<i32: 1>} : vector<2x128xi32>
    %c64_i32_216 = arith.constant 64 : i32
    %472 = vector.broadcast %c64_i32_216 : i32 to vector<2x128xi32>
    %473 = arith.cmpi sge, %471, %472 : vector<2x128xi32>
    %c96_i32_217 = arith.constant 96 : i32
    %474 = vector.broadcast %c96_i32_217 : i32 to vector<2x128xi32>
    %475 = arith.cmpi slt, %471, %474 : vector<2x128xi32>
    %476 = arith.andi %473, %475 : vector<2x128xi1>
    %477 = math.tanh %470 : vector<2x128xf32>
    %cst_218 = arith.constant 0.000000e+00 : f32
    %478 = vector.broadcast %cst_218 : f32 to vector<2x128xf32>
    %479 = arith.subf %478, %470 : vector<2x128xf32>
    %480 = math.exp %479 : vector<2x128xf32>
    %cst_219 = arith.constant 1.000000e+00 : f32
    %481 = vector.broadcast %cst_219 : f32 to vector<2x128xf32>
    %482 = arith.addf %481, %480 : vector<2x128xf32>
    %cst_220 = arith.constant 1.000000e+00 : f32
    %483 = vector.broadcast %cst_220 : f32 to vector<2x128xf32>
    %484 = arith.divf %483, %482 : vector<2x128xf32>
    %485 = arith.select %476, %477, %484 : vector<2x128xi1>, vector<2x128xf32>
    %486 = vector.extract_strided_slice %485 {offsets = [0, 0], sizes = [2, 32], strides = [1, 1]} : vector<2x128xf32> to vector<2x32xf32>
    %487 = vector.extract_strided_slice %485 {offsets = [0, 32], sizes = [2, 32], strides = [1, 1]} : vector<2x128xf32> to vector<2x32xf32>
    %488 = vector.extract_strided_slice %485 {offsets = [0, 64], sizes = [2, 32], strides = [1, 1]} : vector<2x128xf32> to vector<2x32xf32>
    %489 = vector.extract_strided_slice %485 {offsets = [0, 96], sizes = [2, 32], strides = [1, 1]} : vector<2x128xf32> to vector<2x32xf32>
    %490 = arith.mulf %487, %451 : vector<2x32xf32>
    %491 = arith.mulf %486, %488 : vector<2x32xf32>
    %492 = arith.addf %490, %491 : vector<2x32xf32>
    %493 = math.tanh %492 : vector<2x32xf32>
    %494 = arith.mulf %489, %493 : vector<2x32xf32>
    %cst_221 = arith.constant dense<0.000000e+00> : vector<2x5xf32>
    %495 = tpu.matmul %494, %424, %cst_221 {dimension_numbers = #tpu.dot_dimension_numbers<[1], [0], [0], [1], [0, 0, 1, 1], [], []>} : vector<2x32xf32>, vector<32x5xf32>, vector<2x5xf32> -> vector<2x5xf32>
    %496 = vector.broadcast %425 : vector<1x5xf32> to vector<2x5xf32>
    %497 = arith.addf %495, %496 : vector<2x5xf32>
    %498 = tpu.iota {dimensions = array<i32: 1>} : vector<2x5xi32>
    %c2_i32_222 = arith.constant 2 : i32
    %499 = vector.broadcast %c2_i32_222 : i32 to vector<2x5xi32>
    %500 = arith.cmpi slt, %498, %499 : vector<2x5xi32>
    %c4_i32_223 = arith.constant 4 : i32
    %501 = vector.broadcast %c4_i32_223 : i32 to vector<2x5xi32>
    %502 = arith.cmpi slt, %498, %501 : vector<2x5xi32>
    %503 = math.exp %497 : vector<2x5xf32>
    %504 = math.tanh %497 : vector<2x5xf32>
    %505 = arith.select %502, %503, %504 : vector<2x5xi1>, vector<2x5xf32>
    %506 = arith.select %500, %497, %505 : vector<2x5xi1>, vector<2x5xf32>
    %c1_224 = arith.constant 1 : index
    %c0_225 = arith.constant 0 : index
    %c0_226 = arith.constant 0 : index
    %507 = vector.load %arg26[%c1_224, %c0_225, %c0_226] : memref<5x2x5xf32, #tpu.memory_space<vmem>>, vector<1x2x5xf32>
    %508 = vector.shape_cast %507 : vector<1x2x5xf32> to vector<2x5xf32>
    %509 = vector.shape_cast %506 : vector<2x5xf32> to vector<1x2x5xf32>
    tpu.vector_store %arg26[%c1_224, %c0_225, %c0_226], %509 {strides = array<i32>} : memref<5x2x5xf32, #tpu.memory_space<vmem>>, vector<1x2x5xf32>,
    %cst_227 = arith.constant dense<0.000000e+00> : vector<2x128xf32>
    %510 = tpu.matmul %494, %423, %cst_227 {dimension_numbers = #tpu.dot_dimension_numbers<[1], [0], [0], [1], [0, 0, 1, 1], [], []>} : vector<2x32xf32>, vector<32x128xf32>, vector<2x128xf32> -> vector<2x128xf32>
    %511 = arith.addf %400, %510 : vector<2x128xf32>
    %512 = tpu.iota {dimensions = array<i32: 1>} : vector<2x128xi32>
    %c64_i32_228 = arith.constant 64 : i32
    %513 = vector.broadcast %c64_i32_228 : i32 to vector<2x128xi32>
    %514 = arith.cmpi sge, %512, %513 : vector<2x128xi32>
    %c96_i32_229 = arith.constant 96 : i32
    %515 = vector.broadcast %c96_i32_229 : i32 to vector<2x128xi32>
    %516 = arith.cmpi slt, %512, %515 : vector<2x128xi32>
    %517 = arith.andi %514, %516 : vector<2x128xi1>
    %518 = math.tanh %511 : vector<2x128xf32>
    %cst_230 = arith.constant 0.000000e+00 : f32
    %519 = vector.broadcast %cst_230 : f32 to vector<2x128xf32>
    %520 = arith.subf %519, %511 : vector<2x128xf32>
    %521 = math.exp %520 : vector<2x128xf32>
    %cst_231 = arith.constant 1.000000e+00 : f32
    %522 = vector.broadcast %cst_231 : f32 to vector<2x128xf32>
    %523 = arith.addf %522, %521 : vector<2x128xf32>
    %cst_232 = arith.constant 1.000000e+00 : f32
    %524 = vector.broadcast %cst_232 : f32 to vector<2x128xf32>
    %525 = arith.divf %524, %523 : vector<2x128xf32>
    %526 = arith.select %517, %518, %525 : vector<2x128xi1>, vector<2x128xf32>
    %527 = vector.extract_strided_slice %526 {offsets = [0, 0], sizes = [2, 32], strides = [1, 1]} : vector<2x128xf32> to vector<2x32xf32>
    %528 = vector.extract_strided_slice %526 {offsets = [0, 32], sizes = [2, 32], strides = [1, 1]} : vector<2x128xf32> to vector<2x32xf32>
    %529 = vector.extract_strided_slice %526 {offsets = [0, 64], sizes = [2, 32], strides = [1, 1]} : vector<2x128xf32> to vector<2x32xf32>
    %530 = vector.extract_strided_slice %526 {offsets = [0, 96], sizes = [2, 32], strides = [1, 1]} : vector<2x128xf32> to vector<2x32xf32>
    %531 = arith.mulf %528, %492 : vector<2x32xf32>
    %532 = arith.mulf %527, %529 : vector<2x32xf32>
    %533 = arith.addf %531, %532 : vector<2x32xf32>
    %534 = math.tanh %533 : vector<2x32xf32>
    %535 = arith.mulf %530, %534 : vector<2x32xf32>
    %cst_233 = arith.constant dense<0.000000e+00> : vector<2x5xf32>
    %536 = tpu.matmul %535, %424, %cst_233 {dimension_numbers = #tpu.dot_dimension_numbers<[1], [0], [0], [1], [0, 0, 1, 1], [], []>} : vector<2x32xf32>, vector<32x5xf32>, vector<2x5xf32> -> vector<2x5xf32>
    %537 = vector.broadcast %425 : vector<1x5xf32> to vector<2x5xf32>
    %538 = arith.addf %536, %537 : vector<2x5xf32>
    %539 = tpu.iota {dimensions = array<i32: 1>} : vector<2x5xi32>
    %c2_i32_234 = arith.constant 2 : i32
    %540 = vector.broadcast %c2_i32_234 : i32 to vector<2x5xi32>
    %541 = arith.cmpi slt, %539, %540 : vector<2x5xi32>
    %c4_i32_235 = arith.constant 4 : i32
    %542 = vector.broadcast %c4_i32_235 : i32 to vector<2x5xi32>
    %543 = arith.cmpi slt, %539, %542 : vector<2x5xi32>
    %544 = math.exp %538 : vector<2x5xf32>
    %545 = math.tanh %538 : vector<2x5xf32>
    %546 = arith.select %543, %544, %545 : vector<2x5xi1>, vector<2x5xf32>
    %547 = arith.select %541, %538, %546 : vector<2x5xi1>, vector<2x5xf32>
    %c2_236 = arith.constant 2 : index
    %c0_237 = arith.constant 0 : index
    %c0_238 = arith.constant 0 : index
    %548 = vector.load %arg26[%c2_236, %c0_237, %c0_238] : memref<5x2x5xf32, #tpu.memory_space<vmem>>, vector<1x2x5xf32>
    %549 = vector.shape_cast %548 : vector<1x2x5xf32> to vector<2x5xf32>
    %550 = vector.shape_cast %547 : vector<2x5xf32> to vector<1x2x5xf32>
    tpu.vector_store %arg26[%c2_236, %c0_237, %c0_238], %550 {strides = array<i32>} : memref<5x2x5xf32, #tpu.memory_space<vmem>>, vector<1x2x5xf32>,
    %cst_239 = arith.constant dense<0.000000e+00> : vector<2x128xf32>
    %551 = tpu.matmul %535, %423, %cst_239 {dimension_numbers = #tpu.dot_dimension_numbers<[1], [0], [0], [1], [0, 0, 1, 1], [], []>} : vector<2x32xf32>, vector<32x128xf32>, vector<2x128xf32> -> vector<2x128xf32>
    %552 = arith.addf %400, %551 : vector<2x128xf32>
    %553 = tpu.iota {dimensions = array<i32: 1>} : vector<2x128xi32>
    %c64_i32_240 = arith.constant 64 : i32
    %554 = vector.broadcast %c64_i32_240 : i32 to vector<2x128xi32>
    %555 = arith.cmpi sge, %553, %554 : vector<2x128xi32>
    %c96_i32_241 = arith.constant 96 : i32
    %556 = vector.broadcast %c96_i32_241 : i32 to vector<2x128xi32>
    %557 = arith.cmpi slt, %553, %556 : vector<2x128xi32>
    %558 = arith.andi %555, %557 : vector<2x128xi1>
    %559 = math.tanh %552 : vector<2x128xf32>
    %cst_242 = arith.constant 0.000000e+00 : f32
    %560 = vector.broadcast %cst_242 : f32 to vector<2x128xf32>
    %561 = arith.subf %560, %552 : vector<2x128xf32>
    %562 = math.exp %561 : vector<2x128xf32>
    %cst_243 = arith.constant 1.000000e+00 : f32
    %563 = vector.broadcast %cst_243 : f32 to vector<2x128xf32>
    %564 = arith.addf %563, %562 : vector<2x128xf32>
    %cst_244 = arith.constant 1.000000e+00 : f32
    %565 = vector.broadcast %cst_244 : f32 to vector<2x128xf32>
    %566 = arith.divf %565, %564 : vector<2x128xf32>
    %567 = arith.select %558, %559, %566 : vector<2x128xi1>, vector<2x128xf32>
    %568 = vector.extract_strided_slice %567 {offsets = [0, 0], sizes = [2, 32], strides = [1, 1]} : vector<2x128xf32> to vector<2x32xf32>
    %569 = vector.extract_strided_slice %567 {offsets = [0, 32], sizes = [2, 32], strides = [1, 1]} : vector<2x128xf32> to vector<2x32xf32>
    %570 = vector.extract_strided_slice %567 {offsets = [0, 64], sizes = [2, 32], strides = [1, 1]} : vector<2x128xf32> to vector<2x32xf32>
    %571 = vector.extract_strided_slice %567 {offsets = [0, 96], sizes = [2, 32], strides = [1, 1]} : vector<2x128xf32> to vector<2x32xf32>
    %572 = arith.mulf %569, %533 : vector<2x32xf32>
    %573 = arith.mulf %568, %570 : vector<2x32xf32>
    %574 = arith.addf %572, %573 : vector<2x32xf32>
    %575 = math.tanh %574 : vector<2x32xf32>
    %576 = arith.mulf %571, %575 : vector<2x32xf32>
    %cst_245 = arith.constant dense<0.000000e+00> : vector<2x5xf32>
    %577 = tpu.matmul %576, %424, %cst_245 {dimension_numbers = #tpu.dot_dimension_numbers<[1], [0], [0], [1], [0, 0, 1, 1], [], []>} : vector<2x32xf32>, vector<32x5xf32>, vector<2x5xf32> -> vector<2x5xf32>
    %578 = vector.broadcast %425 : vector<1x5xf32> to vector<2x5xf32>
    %579 = arith.addf %577, %578 : vector<2x5xf32>
    %580 = tpu.iota {dimensions = array<i32: 1>} : vector<2x5xi32>
    %c2_i32_246 = arith.constant 2 : i32
    %581 = vector.broadcast %c2_i32_246 : i32 to vector<2x5xi32>
    %582 = arith.cmpi slt, %580, %581 : vector<2x5xi32>
    %c4_i32_247 = arith.constant 4 : i32
    %583 = vector.broadcast %c4_i32_247 : i32 to vector<2x5xi32>
    %584 = arith.cmpi slt, %580, %583 : vector<2x5xi32>
    %585 = math.exp %579 : vector<2x5xf32>
    %586 = math.tanh %579 : vector<2x5xf32>
    %587 = arith.select %584, %585, %586 : vector<2x5xi1>, vector<2x5xf32>
    %588 = arith.select %582, %579, %587 : vector<2x5xi1>, vector<2x5xf32>
    %c3_248 = arith.constant 3 : index
    %c0_249 = arith.constant 0 : index
    %c0_250 = arith.constant 0 : index
    %589 = vector.load %arg26[%c3_248, %c0_249, %c0_250] : memref<5x2x5xf32, #tpu.memory_space<vmem>>, vector<1x2x5xf32>
    %590 = vector.shape_cast %589 : vector<1x2x5xf32> to vector<2x5xf32>
    %591 = vector.shape_cast %588 : vector<2x5xf32> to vector<1x2x5xf32>
    tpu.vector_store %arg26[%c3_248, %c0_249, %c0_250], %591 {strides = array<i32>} : memref<5x2x5xf32, #tpu.memory_space<vmem>>, vector<1x2x5xf32>,
    %cst_251 = arith.constant dense<0.000000e+00> : vector<2x128xf32>
    %592 = tpu.matmul %576, %423, %cst_251 {dimension_numbers = #tpu.dot_dimension_numbers<[1], [0], [0], [1], [0, 0, 1, 1], [], []>} : vector<2x32xf32>, vector<32x128xf32>, vector<2x128xf32> -> vector<2x128xf32>
    %593 = arith.addf %400, %592 : vector<2x128xf32>
    %594 = tpu.iota {dimensions = array<i32: 1>} : vector<2x128xi32>
    %c64_i32_252 = arith.constant 64 : i32
    %595 = vector.broadcast %c64_i32_252 : i32 to vector<2x128xi32>
    %596 = arith.cmpi sge, %594, %595 : vector<2x128xi32>
    %c96_i32_253 = arith.constant 96 : i32
    %597 = vector.broadcast %c96_i32_253 : i32 to vector<2x128xi32>
    %598 = arith.cmpi slt, %594, %597 : vector<2x128xi32>
    %599 = arith.andi %596, %598 : vector<2x128xi1>
    %600 = math.tanh %593 : vector<2x128xf32>
    %cst_254 = arith.constant 0.000000e+00 : f32
    %601 = vector.broadcast %cst_254 : f32 to vector<2x128xf32>
    %602 = arith.subf %601, %593 : vector<2x128xf32>
    %603 = math.exp %602 : vector<2x128xf32>
    %cst_255 = arith.constant 1.000000e+00 : f32
    %604 = vector.broadcast %cst_255 : f32 to vector<2x128xf32>
    %605 = arith.addf %604, %603 : vector<2x128xf32>
    %cst_256 = arith.constant 1.000000e+00 : f32
    %606 = vector.broadcast %cst_256 : f32 to vector<2x128xf32>
    %607 = arith.divf %606, %605 : vector<2x128xf32>
    %608 = arith.select %599, %600, %607 : vector<2x128xi1>, vector<2x128xf32>
    %609 = vector.extract_strided_slice %608 {offsets = [0, 0], sizes = [2, 32], strides = [1, 1]} : vector<2x128xf32> to vector<2x32xf32>
    %610 = vector.extract_strided_slice %608 {offsets = [0, 32], sizes = [2, 32], strides = [1, 1]} : vector<2x128xf32> to vector<2x32xf32>
    %611 = vector.extract_strided_slice %608 {offsets = [0, 64], sizes = [2, 32], strides = [1, 1]} : vector<2x128xf32> to vector<2x32xf32>
    %612 = vector.extract_strided_slice %608 {offsets = [0, 96], sizes = [2, 32], strides = [1, 1]} : vector<2x128xf32> to vector<2x32xf32>
    %613 = arith.mulf %610, %574 : vector<2x32xf32>
    %614 = arith.mulf %609, %611 : vector<2x32xf32>
    %615 = arith.addf %613, %614 : vector<2x32xf32>
    %616 = math.tanh %615 : vector<2x32xf32>
    %617 = arith.mulf %612, %616 : vector<2x32xf32>
    %cst_257 = arith.constant dense<0.000000e+00> : vector<2x5xf32>
    %618 = tpu.matmul %617, %424, %cst_257 {dimension_numbers = #tpu.dot_dimension_numbers<[1], [0], [0], [1], [0, 0, 1, 1], [], []>} : vector<2x32xf32>, vector<32x5xf32>, vector<2x5xf32> -> vector<2x5xf32>
    %619 = vector.broadcast %425 : vector<1x5xf32> to vector<2x5xf32>
    %620 = arith.addf %618, %619 : vector<2x5xf32>
    %621 = tpu.iota {dimensions = array<i32: 1>} : vector<2x5xi32>
    %c2_i32_258 = arith.constant 2 : i32
    %622 = vector.broadcast %c2_i32_258 : i32 to vector<2x5xi32>
    %623 = arith.cmpi slt, %621, %622 : vector<2x5xi32>
    %c4_i32_259 = arith.constant 4 : i32
    %624 = vector.broadcast %c4_i32_259 : i32 to vector<2x5xi32>
    %625 = arith.cmpi slt, %621, %624 : vector<2x5xi32>
    %626 = math.exp %620 : vector<2x5xf32>
    %627 = math.tanh %620 : vector<2x5xf32>
    %628 = arith.select %625, %626, %627 : vector<2x5xi1>, vector<2x5xf32>
    %629 = arith.select %623, %620, %628 : vector<2x5xi1>, vector<2x5xf32>
    %c4_260 = arith.constant 4 : index
    %c0_261 = arith.constant 0 : index
    %c0_262 = arith.constant 0 : index
    %630 = vector.load %arg26[%c4_260, %c0_261, %c0_262] : memref<5x2x5xf32, #tpu.memory_space<vmem>>, vector<1x2x5xf32>
    %631 = vector.shape_cast %630 : vector<1x2x5xf32> to vector<2x5xf32>
    %632 = vector.shape_cast %629 : vector<2x5xf32> to vector<1x2x5xf32>
    tpu.vector_store %arg26[%c4_260, %c0_261, %c0_262], %632 {strides = array<i32>} : memref<5x2x5xf32, #tpu.memory_space<vmem>>, vector<1x2x5xf32>,
    return
  }
}

</mosaic_0001>

<bundles_post_ra>
// kernel: highway_net_forward.1
= control target key start
LH: loop header
LB: loop body
LE: loop exit
PB: predicated region body
PF: predicated region fallthrough
CT: control target
= control target key end

     0   :  { %s7253_s0 = inlined_call_operand.vmem [shape: f32[64,2], index: 0, kind: input, shape index: {}]   ;;  %s7254_s1 = inlined_call_operand.vmem [shape: f32[3,26,6], index: 1, kind: input, shape index: {}]   ;;  %s7255_s2 = inlined_call_operand.vmem [shape: f32[2,3], index: 2, kind: input, shape index: {}]   ;;  %s7256_s3 = inlined_call_operand.vmem [shape: f32[2,2], index: 3, kind: input, shape index: {}]   ;;  %s7257_s4 = inlined_call_operand.vmem [shape: f32[2,16], index: 4, kind: input, shape index: {}]   ;;  %s7258_s5 = inlined_call_operand.vmem [shape: f32[1,16], index: 5, kind: input, shape index: {}]   ;;  %s7259_s6 = inlined_call_operand.vmem [shape: f32[16,128], index: 6, kind: input, shape index: {}]   ;;  %s7260_s7 = inlined_call_operand.vmem [shape: f32[32,128], index: 7, kind: input, shape index: {}]   ;;  %s7261_s8 = inlined_call_operand.vmem [shape: f32[1,128], index: 8, kind: input, shape index: {}]   ;;  %s7262_s9 = inlined_call_operand.vmem [shape: f32[32,16], index: 9, kind: input, shape index: {}]   ;;  %s7263_s10 = inlined_call_operand.vmem [shape: f32[1,16], index: 10, kind: input, shape index: {}]   ;;  %s7264_s11 = inlined_call_operand.vmem [shape: f32[9,32,16], index: 11, kind: input, shape index: {}]   ;;  %s7265_s12 = inlined_call_operand.vmem [shape: f32[1,16], index: 12, kind: input, shape index: {}]   ;;  %s7266_s13 = inlined_call_operand.vmem [shape: f32[3,16,8], index: 13, kind: input, shape index: {}]   ;;  %s7267_s14 = inlined_call_operand.vmem [shape: f32[1,8], index: 14, kind: input, shape index: {}]   ;;  %s7268_s15 = inlined_call_operand.vmem [shape: f32[5,8,5], index: 15, kind: input, shape index: {}]   ;;  %s7269_s16 = inlined_call_operand.vmem [shape: f32[16,5], index: 16, kind: input, shape index: {}]   ;;  %s7270_s17 = inlined_call_operand.vmem [shape: f32[1,5], index: 17, kind: input, shape index: {}]   ;;  %s7271_s18 = inlined_call_operand.vmem [shape: f32[5,8,128], index: 18, kind: input, shape index: {}]   ;;  %s7272_s19 = inlined_call_operand.vmem [shape: f32[16,128], index: 19, kind: input, shape index: {}]   ;;  %s7273_s20 = inlined_call_operand.vmem [shape: f32[3,128], index: 20, kind: input, shape index: {}]   ;;  %s7274_s21 = inlined_call_operand.vmem [shape: f32[2,128], index: 21, kind: input, shape index: {}]   ;;  %s7275_s22 = inlined_call_operand.vmem [shape: f32[32,128], index: 22, kind: input, shape index: {}]   ;;  %s7276_s23 = inlined_call_operand.vmem [shape: f32[1,128], index: 23, kind: input, shape index: {}]   ;;  %s7277_s24 = inlined_call_operand.vmem [shape: f32[32,5], index: 24, kind: input, shape index: {}]   ;;  %s7278_s25 = inlined_call_operand.vmem [shape: f32[1,5], index: 25, kind: input, shape index: {}]   ;;  %s7279_s26 = inlined_call_operand.hbm [shape: f32[5,2,5], index: 26, kind: output, shape index: {0}]   ;;  %s7280_s27 = inlined_call_operand.vmem [shape: f32[2,5], index: 27, kind: output, shape index: {1}]  }
   0x1   :  { %7287 = sst [smem:[#allocation5_spill]] %s7253_s0 }
   0x2   :  { %7288 = sst [smem:[#allocation6_spill]] %s7254_s1 }
   0x3   :  { %7289 = sst [smem:[#allocation7_spill]] %s7255_s2 }
   0x4   :  { %7290 = sst [smem:[#allocation8_spill]] %s7256_s3 }
   0x5   :  { %7291 = sst [smem:[#allocation9_spill]] %s7257_s4 }
   0x6   :  { %7292 = sst [smem:[#allocation10_spill]] %s7258_s5 }
   0x7   :  { %7293 = sst [smem:[#allocation11_spill]] %s7259_s6 }
   0x8   :  { %7294 = sst [smem:[#allocation12_spill]] %s7260_s7 }
   0x9   :  { %7295 = sst [smem:[#allocation13_spill]] %s7261_s8 }
   0xa   :  { %7296 = sst [smem:[#allocation14_spill]] %s7262_s9 }
   0xb   :  { %7297 = sst [smem:[#allocation15_spill]] %s7263_s10 }
   0xc   :  { %7298 = sst [smem:[#allocation16_spill]] %s7264_s11 }
   0xd   :  { %s7299_s8 = sld [smem:[#allocation9_spill]]  ;;  %vm127_vm0 = vcmask 1041408   ;;  %s7300_s5 = sld [smem:[#allocation5_spill]]  ;;  %vm102_vm1 = vcmask 15360  }
  0x13   :  { %v94_v0 = vld [vmem:[%s7299_s8] sm:$0x3]  ;;  %v87_v2 = vld [vmem:[%s7300_s5 + $0x8] sm:$0xff]  ;;  %v88_v3 = vld [vmem:[%s7300_s5 + $0x10] sm:$0xff] }
  0x14   :  { %v86_v1 = vld [vmem:[%s7300_s5] sm:$0xff]  ;;  %5263 = vmatprep.subr.msk.mxu0 %vm127_vm0, %v94_v0  ;;  %5979 = vmatprep.subr.msk.mxu1 %vm127_vm0, %v94_v0  ;;  %v92_v4 = vld [vmem:[%s7300_s5 + $0x30] sm:$0xff]  ;;  %v93_v5 = vld [vmem:[%s7300_s5 + $0x38] sm:$0xff] }
  0x15   :  { %5265 = vmatprep.mubr.msk.f32.mxu0 %vm102_vm1, %v86_v1  ;;  %5264 = vmatpush3.msk.msra.mxu0 %vm127_vm0, %v94_v0 }
  0x16   :  { %5266 = vmatmul.mubr.msk.f32.vlgmr.msra.gmra.mrb[0].mxu0 %vm102_vm1, %v87_v2  ;;  %5980 = vmatpush3.msk.msra.mxu1 %vm127_vm0, %v94_v0 }
  0x17   :  { %33 = vsyncpa [#allocation3], 0  ;;  %5268 = vmatprep.mubr.msk.f32.mxu0 %vm102_vm1, %v88_v3  ;;  %v89_v6 = vld [vmem:[%s7300_s5 + $0x18] sm:$0xff]  ;;  %5274 = vmatprep.mubr.msk.f32.mxu1 %vm102_vm1, %v92_v4  ;;  %v90_v7 = vld [vmem:[%s7300_s5 + $0x20] sm:$0xff]  ;;  %s7301_s10 = sld [smem:[#allocation12_spill]]  ;;  %s7302_s2 = sld [smem:[#allocation11_spill]]  ;;  %v478_v0 = vlaneseq }
  0x18   :  { %5275 = vmatmul.mubr.msk.f32.vlgmr.msra.gmra.mrb[0].mxu1 %vm102_vm1, %v93_v5  ;;  %v91_v8 = vld [vmem:[%s7300_s5 + $0x28] sm:$0xff]  ;;  %v6171_v14 = vmov 0.0|0.0   ;;  %vm6172_vm2 = vmmov 0   ;;  %v6173_v19 = vmov 0.0   ;;  %s7303_s0 = sld [smem:[#allocation10_spill]]  ;;  %vm269_vm5 = vcmask 130048  }
  0x19   :  { %5796 = vmatprep.subr.bf16.mxu0 %v6171_v14  ;;  %s7304_s1 = sld [smem:[#allocation13_spill]]  ;;  %v6415_v2 = vand.u32 127, %v478_v0  ;;  %s6174_s6 = smov 64   ;;  %vm403_vm15 = vcmask 261120  }
  0x1a   :  { %5269 = vmatmul.mubr.msk.f32.gmra.mrb[2].mxu0 %vm102_vm1, %v89_v6  ;;  %s6175_s11 = smov 32   ;;  %s7307_s7 = sld [smem:[#allocation14_spill]] }
  0x1b   :  { %5271 = vmatprep.mubr.msk.f32.mxu0 %vm102_vm1, %v90_v7  ;;  %vm480_vm12 = vcmp.ge.s32.totalorder %v6415_v2, 64  ;;  %vm481_vm13 = vcmp.lt.s32.totalorder %v6415_v2, 96  ;;  %s7308_s29 = sld [smem:[#allocation6_spill]]  ;;  %s7310_s3 = sld [smem:[#allocation15_spill]] }
  0x1c   :  { %vm6431_vm14 = vmand %vm480_vm12, %vm481_vm13  ;;  %vm3002_vm12 = vcmask 23552  }
  0x1d   :  { %v399_v9 = vld [vmem:[%s7301_s10] sm:$0xff]  ;;  %v400_v10 = vld [vmem:[%s7301_s10 + $0x8] sm:$0xff]  ;;  %v401_v16 = vld [vmem:[%s7301_s10 + $0x10] sm:$0xff] }
  0x1e   :  { %5272 = vmatmul.mubr.msk.f32.gmra.mrb[4].mxu0 %vm102_vm1, %v91_v8  ;;  %v6364_v11 = vpack.c.bf16 %v400_v10, %v399_v9  ;;  %v260_v12 = vld [vmem:[%s7302_s2] sm:$0xff]  ;;  %v261_v13 = vld [vmem:[%s7302_s2 + $0x8] sm:$0xff]  ;;  %v402_v17 = vld [vmem:[%s7301_s10 + $0x18] sm:$0xff] }
  0x1f   :  { %v5792_v15 = vpack.c.bf16 %v261_v13, %v260_v12  ;;  %v6381_v18 = vpack.c.bf16 %v402_v17, %v401_v16  ;;  %5301 = vmatprep.mubr.msk.f32.mxu0 %vm6172_vm2, %v6173_v19  ;;  %v4865_v20 = vld [vmem:[%s7303_s0] ss:$0 sm:$0xff]  ;;  %s7309_s0 = sld [smem:[#allocation16_spill]] }
  0x20   :  { %5798 = vmatpush3.bf16.msra.mxu0 %v6364_v11  ;;  %v4875_v55 = vld [vmem:[%s7304_s1] ss:$0 sm:$0xff]  ;;  %s7311_s1 = sld [smem:[#allocation7_spill]] }
  0x21   :  { %5793 = vmatprep.subr.bf16.mxu1 %v5792_v15  ;;  %5799 = vmatprep.subr.bf16.mxu0 %v6171_v14 }
  0x22   :  { %5795 = vmatpush3.bf16.msra.mxu1 %v5792_v15 }
  0x23   :  { %5802 = vmatprep.subr.bf16.mxu1 %v6171_v14 }
  0x24   :  { %5801 = vmatpush3.bf16.msra.mxu0 %v6381_v18 }
  0x25   :  { %5808 = vmatprep.subr.bf16.mxu0 %v6171_v14 }
  0x27   :  { %5302 = vmatmul.mubr.f32.vlgmr.msra.gmra.mrb[6].mxu0 %v6173_v19 }
  0x28   :  { %5810 = vmatpush3.bf16.msra.mxu0 %v6364_v11  ;;  %5323 = vmatprep.mubr.msk.f32.mxu0 %vm6172_vm2, %v6173_v19 }
  0x29   :  { %5811 = vmatprep.subr.bf16.mxu0 %v6171_v14 }
  0x2c   :  { %5813 = vmatpush3.bf16.msra.mxu0 %v6381_v18 }
  0x2d   :  { %5820 = vmatprep.subr.bf16.mxu0 %v6171_v14 }
  0xe9   :  { %v5267_v21 = vpop.f32.mrb[0].mxu0 }
  0xea   :  { %v203_v22 = vadd.f32 %v5267_v21, %v4865_v20  ;;  %v197_v23 = vpop.f32.mrb[1].mxu0 }
  0xeb   :  { %v198_v24 = vadd.f32 %v4865_v20, %v197_v23  ;;  %v5276_v25 = vpop.f32.mrb[0].mxu1 }
  0xec   :  { %v245_v26 = vmul.f32 0.1, %v203_v22  ;;  %v227_v27 = vpop.f32.mrb[1].mxu1  ;;  %vm237_vm3 = vcmp.gt.f32.partialorder %v203_v22, 0.0  ;;  %v233_v41 = vadd.f32 %v5276_v25, %v4865_v20 }
  0xed   :  { %vm236_vm4 = vcmp.gt.f32.partialorder %v198_v24, 0.0  ;;  %v244_v28 = vmul.f32 0.1, %v198_v24  ;;  %v5270_v29 = vpop.f32.mrb[2].mxu0  ;;  %v228_v34 = vadd.f32 %v4865_v20, %v227_v27 }
  0xee   :  { %v213_v30 = vadd.f32 %v5270_v29, %v4865_v20  ;;  %v207_v31 = vpop.f32.mrb[3].mxu0  ;;  %v253_v35 = vsel %vm237_vm3, %v203_v22, %v245_v26  ;;  %v251_v48 = vmul.f32 0.1, %v233_v41  ;;  %vm243_vm11 = vcmp.gt.f32.partialorder %v233_v41, 0.0 }
  0xef   :  { %v252_v32 = vsel %vm236_vm4, %v198_v24, %v244_v28  ;;  %v208_v33 = vadd.f32 %v4865_v20, %v207_v31  ;;  %v250_v45 = vmul.f32 0.1, %v228_v34  ;;  %vm242_vm9 = vcmp.gt.f32.partialorder %v228_v34, 0.0 }
  0xf0   :  { %5281 = vmatprep.mubr.msk.f32.mxu1 %vm269_vm5, %v252_v32  ;;  %vm239_vm6 = vcmp.gt.f32.partialorder %v213_v30, 0.0  ;;  %v247_v36 = vmul.f32 0.1, %v213_v30  ;;  %v259_v52 = vsel %vm243_vm11, %v233_v41, %v251_v48  ;;  %vm1311_vm3 = vcmask 48128  }
  0xf1   :  { %5282 = vmatmul.mubr.msk.f32.vlgmr.msra.gmra.mrb[2].mxu1 %vm269_vm5, %v253_v35  ;;  %vm238_vm7 = vcmp.gt.f32.partialorder %v208_v33, 0.0  ;;  %v246_v37 = vmul.f32 0.1, %v208_v33  ;;  %v5273_v38 = vpop.f32.mrb[4].mxu0  ;;  %v258_v51 = vsel %vm242_vm9, %v228_v34, %v250_v45  ;;  %vm1324_vm4 = vcmask 1045504  }
  0xf2   :  { %v223_v39 = vadd.f32 %v5273_v38, %v4865_v20  ;;  %v217_v40 = vpop.f32.mrb[5].mxu0  ;;  %v255_v42 = vsel %vm239_vm6, %v213_v30, %v247_v36  ;;  %5804 = vmatpush3.bf16.msra.mxu1 %v6364_v11  ;;  %vm2203_vm6 = vcmask 1043456   ;;  %vm3006_vm11 = vcmask 1042432  }
  0xf3   :  { %v218_v43 = vadd.f32 %v4865_v20, %v217_v40  ;;  %v254_v44 = vsel %vm238_vm7, %v208_v33, %v246_v37  ;;  %5805 = vmatprep.subr.bf16.mxu1 %v6171_v14 }
  0xf4   :  { %vm241_vm8 = vcmp.gt.f32.partialorder %v223_v39, 0.0  ;;  %v249_v46 = vmul.f32 0.1, %v223_v39  ;;  %5284 = vmatprep.mubr.msk.f32.mxu1 %vm269_vm5, %v254_v44 }
  0xf5   :  { %vm240_vm10 = vcmp.gt.f32.partialorder %v218_v43, 0.0  ;;  %v248_v47 = vmul.f32 0.1, %v218_v43  ;;  %5285 = vmatmul.mubr.msk.f32.gmra.mrb[4].mxu1 %vm269_vm5, %v255_v42 }
  0xf6   :  { %v257_v49 = vsel %vm241_vm8, %v223_v39, %v249_v46  ;;  %5807 = vmatpush3.bf16.msra.mxu1 %v6381_v18 }
  0xf7   :  { %v256_v50 = vsel %vm240_vm10, %v218_v43, %v248_v47  ;;  %5814 = vmatprep.subr.bf16.mxu1 %v6171_v14 }
  0xf8   :  { %5287 = vmatprep.mubr.msk.f32.mxu1 %vm269_vm5, %v256_v50 }
  0xf9   :  { %5288 = vmatmul.mubr.msk.f32.gmra.mrb[6].mxu1 %vm269_vm5, %v257_v49 }
  0xfa   :  { %5290 = vmatprep.mubr.msk.f32.mxu1 %vm269_vm5, %v258_v51  ;;  %v473_v53 = vpop.f32.mrb[6].mxu0 }
  0xfb   :  { %v5303_v54 = vpop.f32.mrb[7].mxu0 }
  0xfd   :  { %5291 = vmatmul.mubr.msk.f32.gmra.mrb[8].mxu1 %vm269_vm5, %v259_v52 }
  0xfe   :  { %5312 = vmatprep.mubr.msk.f32.mxu1 %vm6172_vm2, %v6173_v19 }
 0x1c4   :  { %v5283_v56 = vpop.f32.mrb[2].mxu1 }
 0x1c5   :  { %v366_v57 = vadd.f32 %v5283_v56, %v4875_v55  ;;  %v360_v58 = vpop.f32.mrb[3].mxu1 }
 0x1c6   :  { %v361_v59 = vadd.f32 %v4875_v55, %v360_v58 }
 0x1c8   :  { %v477_v60 = vadd.f32 %v473_v53, %v361_v59  ;;  %v5286_v3 = vpop.f32.mrb[4].mxu1 }
 0x1c9   :  { %v6417_v4 = vadd.f32 %v5286_v3, %v4875_v55  ;;  %v370_v5 = vpop.f32.mrb[5].mxu1 }
 0x1ca   :  { %v484_v61 = vsub.f32 0.0, %v477_v60  ;;  %v6419_v6 = vadd.f32 %v4875_v55, %v370_v5 }
 0x1cc   :  { %v485_v62 = vmul.f32 1.442695, %v484_v61  ;;  %v5289_v7 = vpop.f32.mrb[6].mxu1 }
 0x1cd   :  { %v6421_v8 = vadd.f32 %v5289_v7, %v4875_v55  ;;  %v380_v9 = vpop.f32.mrb[7].mxu1 }
 0x1ce   :  { %6015 = vpow2.f32 %v485_v62  ;;  %v6425_v10 = vadd.f32 %v4875_v55, %v380_v9 }
 0x1cf   :  { %6017 = vtanh.f32 %v477_v60 }
 0x1d0   :  { %v5292_v12 = vpop.f32.mrb[8].mxu1 }
 0x1d1   :  { %v6427_v13 = vadd.f32 %v5292_v12, %v4875_v55  ;;  %v390_v15 = vpop.f32.mrb[9].mxu1 }
 0x1d2   :  { %v6429_v16 = vadd.f32 %v4875_v55, %v390_v15 }
 0x1d8   :  { %v6016_v63 = vpop.eup %6015 }
 0x1d9   :  { %v487_v1 = vadd.f32 1.0, %v6016_v63  ;;  %v6018_v20 = vpop.eup %6017 }
 0x1db   :  { %6019 = vrcp.f32 %v487_v1 }
 0x1e5   :  { %v6020_v21 = vpop.eup %6019 }
 0x1e6   :  { %v490_v22 = vsel %vm6431_vm14, %v6018_v20, %v6020_v21 }
 0x1e7   :  { %493 = vrot.lane.b32.xlu0 %v490_v22, %s6174_s6  ;;  %v491_v25 = vmul.f32 0.0, %v490_v22 }
 0x259   :  { %v494_v23 = vpop.permute.xlu0 %493 }
 0x25a   :  { %v496_v24 = vmul.f32 %v494_v23, %v490_v22 }
 0x25c   :  { %498 = vrot.lane.b32.xlu0 %v496_v24, %s6175_s11 }
 0x2ce   :  { %v499_v26 = vpop.permute.xlu0 %498 }
 0x2cf   :  { %v501_v27 = vadd.f32 %v499_v26, %v491_v25 }
 0x2d1   :  { %6021 = vtanh.f32 %v501_v27 }
 0x2db   :  { %v6022_v28 = vpop.eup %6021 }
 0x2dc   :  { %504 = vrot.lane.b32.xlu1 %v6022_v28, %s6174_s6 }
 0x34e   :  { %v505_v29 = vpop.permute.xlu1 %504 }
 0x34f   :  { %v507_v30 = vmul.f32 %v505_v29, %v490_v22 }
 0x351   :  { %509 = vrot.lane.b32.xlu1 %v507_v30, %s6175_s11 }
 0x3c3   :  { %v510_v31 = vpop.permute.xlu1 %509 }
 0x3c4   :  { %5313 = vmatmul.mubr.msk.f32.vlgmr.msra.gmra.mrb[10].mxu1 %vm403_vm15, %v510_v31 }
 0x3c5   :  { %5816 = vmatpush3.bf16.msra.mxu1 %v6364_v11  ;;  %5334 = vmatprep.mubr.msk.f32.mxu1 %vm6172_vm2, %v6173_v19 }
 0x3c6   :  { %5817 = vmatprep.subr.bf16.mxu1 %v6171_v14 }
 0x3c9   :  { %5819 = vmatpush3.bf16.msra.mxu1 %v6381_v18 }
 0x3ca   :  { %5826 = vmatprep.subr.bf16.mxu1 %v6171_v14 }
 0x497   :  { %v579_v32 = vpop.f32.mrb[10].mxu1 }
 0x498   :  { %v583_v33 = vadd.f32 %v579_v32, %v366_v57  ;;  %v5314_v34 = vpop.f32.mrb[11].mxu1 }
 0x49a   :  { %v585_v35 = vsub.f32 0.0, %v583_v33 }
 0x49c   :  { %v586_v36 = vmul.f32 1.442695, %v585_v35 }
 0x49e   :  { %6023 = vpow2.f32 %v586_v36 }
 0x49f   :  { %6025 = vtanh.f32 %v583_v33 }
 0x4a8   :  { %v6024_v37 = vpop.eup %6023 }
 0x4a9   :  { %v588_v38 = vadd.f32 1.0, %v6024_v37  ;;  %v6026_v39 = vpop.eup %6025 }
 0x4ab   :  { %6027 = vrcp.f32 %v588_v38 }
 0x4b5   :  { %v6028_v40 = vpop.eup %6027 }
 0x4b6   :  { %v591_v41 = vsel %vm6431_vm14, %v6026_v39, %v6028_v40 }
 0x4b7   :  { %594 = vrot.lane.b32.xlu0 %v591_v41, %s6174_s6  ;;  %v592_v44 = vmul.f32 %v591_v41, %v501_v27 }
 0x529   :  { %v595_v42 = vpop.permute.xlu0 %594 }
 0x52a   :  { %v597_v43 = vmul.f32 %v595_v42, %v591_v41 }
 0x52c   :  { %599 = vrot.lane.b32.xlu1 %v597_v43, %s6175_s11 }
 0x59e   :  { %v600_v45 = vpop.permute.xlu1 %599 }
 0x59f   :  { %v602_v46 = vadd.f32 %v600_v45, %v592_v44 }
 0x5a1   :  { %6029 = vtanh.f32 %v602_v46 }
 0x5ab   :  { %v6030_v47 = vpop.eup %6029 }
 0x5ac   :  { %605 = vrot.lane.b32.xlu0 %v6030_v47, %s6174_s6 }
 0x61e   :  { %v606_v48 = vpop.permute.xlu0 %605 }
 0x61f   :  { %v608_v49 = vmul.f32 %v606_v48, %v591_v41 }
 0x621   :  { %610 = vrot.lane.b32.xlu1 %v608_v49, %s6175_s11 }
 0x693   :  { %v611_v50 = vpop.permute.xlu1 %610 }
 0x694   :  { %5324 = vmatmul.mubr.msk.f32.vlgmr.msra.gmra.mrb[8].mxu0 %vm403_vm15, %v611_v50 }
 0x695   :  { %5822 = vmatpush3.bf16.msra.mxu0 %v6364_v11  ;;  %5345 = vmatprep.mubr.msk.f32.mxu0 %vm6172_vm2, %v6173_v19 }
 0x696   :  { %5823 = vmatprep.subr.bf16.mxu0 %v6171_v14 }
 0x699   :  { %5825 = vmatpush3.bf16.msra.mxu0 %v6381_v18 }
 0x69a   :  { %5832 = vmatprep.subr.bf16.mxu0 %v6171_v14 }
 0x767   :  { %v680_v51 = vpop.f32.mrb[8].mxu0 }
 0x768   :  { %v684_v52 = vadd.f32 %v680_v51, %v6419_v6  ;;  %v5325_v53 = vpop.f32.mrb[9].mxu0 }
 0x76a   :  { %v686_v54 = vsub.f32 0.0, %v684_v52 }
 0x76c   :  { %v687_v55 = vmul.f32 1.442695, %v686_v54 }
 0x76e   :  { %6031 = vpow2.f32 %v687_v55 }
 0x76f   :  { %6033 = vtanh.f32 %v684_v52 }
 0x778   :  { %v6032_v56 = vpop.eup %6031 }
 0x779   :  { %v689_v57 = vadd.f32 1.0, %v6032_v56  ;;  %v6034_v58 = vpop.eup %6033 }
 0x77b   :  { %6035 = vrcp.f32 %v689_v57 }
 0x785   :  { %v6036_v59 = vpop.eup %6035 }
 0x786   :  { %v692_v60 = vsel %vm6431_vm14, %v6034_v58, %v6036_v59 }
 0x787   :  { %695 = vrot.lane.b32.xlu0 %v692_v60, %s6174_s6  ;;  %v693_v63 = vmul.f32 %v692_v60, %v602_v46 }
 0x7f9   :  { %v696_v61 = vpop.permute.xlu0 %695 }
 0x7fa   :  { %v698_v62 = vmul.f32 %v696_v61, %v692_v60 }
 0x7fc   :  { %700 = vrot.lane.b32.xlu1 %v698_v62, %s6175_s11 }
 0x86e   :  { %v701_v0 = vpop.permute.xlu1 %700 }
 0x86f   :  { %v703_v1 = vadd.f32 %v701_v0, %v693_v63 }
 0x871   :  { %6037 = vtanh.f32 %v703_v1 }
 0x87b   :  { %v6038_v3 = vpop.eup %6037 }
 0x87c   :  { %706 = vrot.lane.b32.xlu0 %v6038_v3, %s6174_s6 }
 0x8ee   :  { %v707_v5 = vpop.permute.xlu0 %706 }
 0x8ef   :  { %v709_v6 = vmul.f32 %v707_v5, %v692_v60 }
 0x8f1   :  { %711 = vrot.lane.b32.xlu1 %v709_v6, %s6175_s11 }
 0x963   :  { %v712_v7 = vpop.permute.xlu1 %711 }
 0x964   :  { %5335 = vmatmul.mubr.msk.f32.vlgmr.msra.gmra.mrb[12].mxu1 %vm403_vm15, %v712_v7 }
 0x965   :  { %5828 = vmatpush3.bf16.msra.mxu1 %v6364_v11  ;;  %5356 = vmatprep.mubr.msk.f32.mxu1 %vm6172_vm2, %v6173_v19 }
 0x966   :  { %5829 = vmatprep.subr.bf16.mxu1 %v6171_v14 }
 0x969   :  { %5831 = vmatpush3.bf16.msra.mxu1 %v6381_v18 }
 0x96a   :  { %5838 = vmatprep.subr.bf16.mxu1 %v6171_v14 }
 0xa37   :  { %v781_v9 = vpop.f32.mrb[12].mxu1 }
 0xa38   :  { %v785_v12 = vadd.f32 %v781_v9, %v6417_v4  ;;  %v5336_v15 = vpop.f32.mrb[13].mxu1 }
 0xa3a   :  { %v787_v20 = vsub.f32 0.0, %v785_v12 }
 0xa3c   :  { %v788_v21 = vmul.f32 1.442695, %v787_v20 }
 0xa3e   :  { %6039 = vpow2.f32 %v788_v21 }
 0xa3f   :  { %6041 = vtanh.f32 %v785_v12 }
 0xa48   :  { %v6040_v22 = vpop.eup %6039 }
 0xa49   :  { %v790_v23 = vadd.f32 1.0, %v6040_v22  ;;  %v6042_v24 = vpop.eup %6041 }
 0xa4b   :  { %6043 = vrcp.f32 %v790_v23 }
 0xa55   :  { %v6044_v25 = vpop.eup %6043 }
 0xa56   :  { %v793_v26 = vsel %vm6431_vm14, %v6042_v24, %v6044_v25 }
 0xa57   :  { %796 = vrot.lane.b32.xlu0 %v793_v26, %s6174_s6  ;;  %v794_v4 = vmul.f32 %v793_v26, %v703_v1 }
 0xac9   :  { %v797_v27 = vpop.permute.xlu0 %796 }
 0xaca   :  { %v799_v28 = vmul.f32 %v797_v27, %v793_v26 }
 0xacc   :  { %801 = vrot.lane.b32.xlu1 %v799_v28, %s6175_s11 }
 0xb3e   :  { %v802_v29 = vpop.permute.xlu1 %801 }
 0xb3f   :  { %v804_v30 = vadd.f32 %v802_v29, %v794_v4 }
 0xb41   :  { %6045 = vtanh.f32 %v804_v30 }
 0xb4b   :  { %v6046_v31 = vpop.eup %6045 }
 0xb4c   :  { %807 = vrot.lane.b32.xlu0 %v6046_v31, %s6174_s6 }
 0xbbe   :  { %v808_v32 = vpop.permute.xlu0 %807 }
 0xbbf   :  { %v810_v33 = vmul.f32 %v808_v32, %v793_v26 }
 0xbc1   :  { %812 = vrot.lane.b32.xlu1 %v810_v33, %s6175_s11 }
 0xc33   :  { %v813_v34 = vpop.permute.xlu1 %812 }
 0xc34   :  { %5346 = vmatmul.mubr.msk.f32.vlgmr.msra.gmra.mrb[10].mxu0 %vm403_vm15, %v813_v34 }
 0xc35   :  { %5834 = vmatpush3.bf16.msra.mxu0 %v6364_v11  ;;  %5367 = vmatprep.mubr.msk.f32.mxu0 %vm6172_vm2, %v6173_v19 }
 0xc36   :  { %5835 = vmatprep.subr.bf16.mxu0 %v6171_v14 }
 0xc39   :  { %5837 = vmatpush3.bf16.msra.mxu0 %v6381_v18 }
 0xc3a   :  { %5844 = vmatprep.subr.bf16.mxu0 %v6171_v14 }
 0xd07   :  { %v882_v35 = vpop.f32.mrb[10].mxu0 }
 0xd08   :  { %v886_v36 = vadd.f32 %v882_v35, %v6425_v10  ;;  %v5347_v37 = vpop.f32.mrb[11].mxu0 }
 0xd0a   :  { %v888_v38 = vsub.f32 0.0, %v886_v36 }
 0xd0c   :  { %v889_v39 = vmul.f32 1.442695, %v888_v38 }
 0xd0e   :  { %6047 = vpow2.f32 %v889_v39 }
 0xd0f   :  { %6049 = vtanh.f32 %v886_v36 }
 0xd18   :  { %v6048_v40 = vpop.eup %6047 }
 0xd19   :  { %v891_v41 = vadd.f32 1.0, %v6048_v40  ;;  %v6050_v42 = vpop.eup %6049 }
 0xd1b   :  { %6051 = vrcp.f32 %v891_v41 }
 0xd25   :  { %v6052_v43 = vpop.eup %6051 }
 0xd26   :  { %v894_v44 = vsel %vm6431_vm14, %v6050_v42, %v6052_v43 }
 0xd27   :  { %897 = vrot.lane.b32.xlu0 %v894_v44, %s6174_s6  ;;  %v895_v10 = vmul.f32 %v894_v44, %v804_v30 }
 0xd99   :  { %v898_v45 = vpop.permute.xlu0 %897 }
 0xd9a   :  { %v900_v46 = vmul.f32 %v898_v45, %v894_v44 }
 0xd9c   :  { %902 = vrot.lane.b32.xlu1 %v900_v46, %s6175_s11 }
 0xe0e   :  { %v903_v47 = vpop.permute.xlu1 %902 }
 0xe0f   :  { %v905_v48 = vadd.f32 %v903_v47, %v895_v10  ;;  %v1215_v10 = vld [vmem:[%s7307_s7] sm:$0xff]  ;;  %v1216_v47 = vld [vmem:[%s7307_s7 + $0x8] sm:$0xff] }
 0xe11   :  { %6053 = vtanh.f32 %v905_v48 }
 0xe1b   :  { %v6054_v49 = vpop.eup %6053 }
 0xe1c   :  { %908 = vrot.lane.b32.xlu0 %v6054_v49, %s6174_s6  ;;  %v5845_v49 = vpack.c.bf16 %v1216_v47, %v1215_v10 }
 0xe8e   :  { %v909_v50 = vpop.permute.xlu0 %908 }
 0xe8f   :  { %v911_v51 = vmul.f32 %v909_v50, %v894_v44  ;;  %v1218_v50 = vld [vmem:[%s7307_s7 + $0x18] sm:$0xff] }
 0xe91   :  { %913 = vrot.lane.b32.xlu1 %v911_v51, %s6175_s11 }
 0xf03   :  { %v914_v52 = vpop.permute.xlu1 %913 }
 0xf04   :  { %5357 = vmatmul.mubr.msk.f32.vlgmr.msra.gmra.mrb[14].mxu1 %vm403_vm15, %v914_v52 }
 0xf05   :  { %5840 = vmatpush3.bf16.msra.mxu1 %v6364_v11  ;;  %5378 = vmatprep.mubr.msk.f32.mxu1 %vm6172_vm2, %v6173_v19 }
 0xf06   :  { %5841 = vmatprep.subr.bf16.mxu1 %v6171_v14 }
 0xf09   :  { %5843 = vmatpush3.bf16.msra.mxu1 %v6381_v18 }
 0xfd7   :  { %v983_v53 = vpop.f32.mrb[14].mxu1 }
 0xfd8   :  { %v987_v54 = vadd.f32 %v983_v53, %v6421_v8  ;;  %v5358_v55 = vpop.f32.mrb[15].mxu1  ;;  %v1304_v53 = vld [vmem:[%s7308_s29] sm:$0xff] }
 0xfda   :  { %v989_v56 = vsub.f32 0.0, %v987_v54 }
 0xfdc   :  { %v990_v57 = vmul.f32 1.442695, %v989_v56 }
 0xfde   :  { %6055 = vpow2.f32 %v990_v57  ;;  %v4898_v57 = vld [vmem:[%s7308_s29 + $0x20] sm:$0xff] }
 0xfdf   :  { %6057 = vtanh.f32 %v987_v54 }
 0xfe8   :  { %v6056_v58 = vpop.eup %6055 }
 0xfe9   :  { %v992_v59 = vadd.f32 1.0, %v6056_v58  ;;  %v6058_v60 = vpop.eup %6057 }
 0xfeb   :  { %6059 = vrcp.f32 %v992_v59 }
 0xff5   :  { %v6060_v11 = vpop.eup %6059 }
 0xff6   :  { %v995_v61 = vsel %vm6431_vm14, %v6058_v60, %v6060_v11  ;;  %v1305_v60 = vld [vmem:[%s7308_s29 + $0x8] sm:$0xff] }
 0xff7   :  { %998 = vrot.lane.b32.xlu0 %v995_v61, %s6174_s6  ;;  %v996_v8 = vmul.f32 %v995_v61, %v905_v48  ;;  %v1217_v48 = vld [vmem:[%s7307_s7 + $0x10] sm:$0xff]  ;;  %v4899_v11 = vld [vmem:[%s7308_s29 + $0x28] sm:$0xff] }
 0xff8   :  { %v5848_v51 = vpack.c.bf16 %v1218_v50, %v1217_v48 }
0x1069   :  { %v999_v62 = vpop.permute.xlu0 %998 }
0x106a   :  { %v1001_v18 = vmul.f32 %v999_v62, %v995_v61  ;;  %v4916_v62 = vld [vmem:[%s7309_s0 + $0x20] sm:$0xff] }
0x106c   :  { %1003 = vrot.lane.b32.xlu1 %v1001_v18, %s6175_s11  ;;  %v4917_v18 = vld [vmem:[%s7309_s0 + $0x28] sm:$0xff] }
0x10de   :  { %v1004_v63 = vpop.permute.xlu1 %1003 }
0x10df   :  { %v1006_v0 = vadd.f32 %v1004_v63, %v996_v8  ;;  %v1306_v8 = vld [vmem:[%s7308_s29 + $0x10] sm:$0xff]  ;;  %v4901_v63 = vld [vmem:[%s7308_s29 + $0x38] sm:$0x3] }
0x10e1   :  { %6061 = vtanh.f32 %v1006_v0 }
0x10eb   :  { %v6062_v1 = vpop.eup %6061 }
0x10ec   :  { %1009 = vrot.lane.b32.xlu0 %v6062_v1, %s6174_s6  ;;  %v5851_v1 = vpack.c.bf16 %v4917_v18, %v4916_v62  ;;  %v4940_v62 = vld [vmem:[%s7309_s0 + $0x80] sm:$0xff] }
0x115e   :  { %v1010_v3 = vpop.permute.xlu0 %1009 }
0x115f   :  { %v1012_v5 = vmul.f32 %v1010_v3, %v995_v61  ;;  %v4900_v61 = vld [vmem:[%s7308_s29 + $0x30] sm:$0xff]  ;;  %v4907_v3 = vld [vmem:[%s7308_s29 + $0x40] sm:$0xff] }
0x1161   :  { %1014 = vrot.lane.b32.xlu1 %v1012_v5, %s6175_s11  ;;  %v1616_v5 = vld [vmem:[%s7309_s0] sm:$0xff] }
0x11d3   :  { %v1015_v6 = vpop.permute.xlu1 %1014 }
0x11d4   :  { %5368 = vmatmul.mubr.msk.f32.vlgmr.msra.gmra.mrb[12].mxu0 %vm403_vm15, %v1015_v6  ;;  %v1617_v6 = vld [vmem:[%s7309_s0 + $0x8] sm:$0xff] }
0x11d5   :  { %5389 = vmatprep.mubr.msk.f32.mxu0 %vm6172_vm2, %v6173_v19  ;;  %5846 = vmatpush3.bf16.msra.mxu0 %v5845_v49 }
0x11d6   :  { %5847 = vmatprep.subr.bf16.mxu0 %v6171_v14 }
0x11d9   :  { %5849 = vmatpush3.bf16.msra.mxu0 %v5848_v51 }
0x12a7   :  { %v1084_v7 = vpop.f32.mrb[12].mxu0 }
0x12a8   :  { %v1088_v9 = vadd.f32 %v1084_v7, %v6429_v16  ;;  %v5369_v12 = vpop.f32.mrb[13].mxu0  ;;  %v4908_v7 = vld [vmem:[%s7308_s29 + $0x48] sm:$0xff] }
0x12a9   :  { %v4909_v12 = vld [vmem:[%s7308_s29 + $0x50] sm:$0xff] }
0x12aa   :  { %v1090_v15 = vsub.f32 0.0, %v1088_v9 }
0x12ac   :  { %v1091_v20 = vmul.f32 1.442695, %v1090_v15  ;;  %v4910_v15 = vld [vmem:[%s7308_s29 + $0x58] sm:$0x3] }
0x12ae   :  { %6063 = vpow2.f32 %v1091_v20  ;;  %v4918_v20 = vld [vmem:[%s7309_s0 + $0x30] sm:$0xff] }
0x12af   :  { %6065 = vtanh.f32 %v1088_v9  ;;  %v5857_v9 = vpack.c.bf16 %v1617_v6, %v1616_v5  ;;  %v4941_v5 = vld [vmem:[%s7309_s0 + $0x88] sm:$0xff]  ;;  %v4947_v6 = vld [vmem:[%s7309_s0 + $0xa0] sm:$0xff] }
0x12b8   :  { %v6064_v21 = vpop.eup %6063 }
0x12b9   :  { %v1093_v22 = vadd.f32 1.0, %v6064_v21  ;;  %v6066_v23 = vpop.eup %6065  ;;  %v4919_v21 = vld [vmem:[%s7309_s0 + $0x38] sm:$0xff] }
0x12bb   :  { %6067 = vrcp.f32 %v1093_v22  ;;  %v1618_v22 = vld [vmem:[%s7309_s0 + $0x10] sm:$0xff] }
0x12c5   :  { %v6068_v24 = vpop.eup %6067 }
0x12c6   :  { %v1096_v25 = vsel %vm6431_vm14, %v6066_v23, %v6068_v24  ;;  %v5854_v23 = vpack.c.bf16 %v4919_v21, %v4918_v20  ;;  %v1619_v24 = vld [vmem:[%s7309_s0 + $0x18] sm:$0xff] }
0x12c7   :  { %1099 = vrot.lane.b32.xlu0 %v1096_v25, %s6174_s6  ;;  %v1097_v16 = vmul.f32 %v1096_v25, %v1006_v0  ;;  %v1307_v0 = vld [vmem:[%s7308_s29 + $0x18] sm:$0x3] }
0x1339   :  { %v1100_v26 = vpop.permute.xlu0 %1099 }
0x133a   :  { %v1102_v27 = vmul.f32 %v1100_v26, %v1096_v25 }
0x133c   :  { %1104 = vrot.lane.b32.xlu1 %v1102_v27, %s6175_s11  ;;  %v4926_v27 = vld [vmem:[%s7309_s0 + $0x40] sm:$0xff] }
0x13ae   :  { %v1105_v28 = vpop.permute.xlu1 %1104 }
0x13af   :  { %v1107_v4 = vadd.f32 %v1105_v28, %v1097_v16  ;;  %v4927_v28 = vld [vmem:[%s7309_s0 + $0x48] sm:$0xff] }
0x13b1   :  { %6069 = vtanh.f32 %v1107_v4 }
0x13bb   :  { %v6070_v29 = vpop.eup %6069 }
0x13bc   :  { %1110 = vrot.lane.b32.xlu0 %v6070_v29, %s6174_s6  ;;  %v4934_v29 = vld [vmem:[%s7309_s0 + $0x68] sm:$0xff] }
0x142e   :  { %v1111_v30 = vpop.permute.xlu0 %1110 }
0x142f   :  { %v1113_v31 = vmul.f32 %v1111_v30, %v1096_v25  ;;  %v5860_v25 = vpack.c.bf16 %v1619_v24, %v1618_v22  ;;  %v4928_v30 = vld [vmem:[%s7309_s0 + $0x50] sm:$0xff] }
0x1430   :  { %v4942_v22 = vld [vmem:[%s7309_s0 + $0x90] sm:$0xff] }
0x1431   :  { %1115 = vrot.lane.b32.xlu1 %v1113_v31, %s6175_s11 }
0x14a3   :  { %v1116_v32 = vpop.permute.xlu1 %1115 }
0x14a4   :  { %5379 = vmatmul.mubr.msk.f32.vlgmr.msra.gmra.mrb[16].mxu1 %vm403_vm15, %v1116_v32 }
0x14a5   :  { %5394 = vmatprep.mubr.msk.f32.mxu1 %vm1311_vm3, %v1304_v53 }
0x1577   :  { %v1185_v33 = vpop.f32.mrb[16].mxu1 }
0x1578   :  { %v1189_v34 = vadd.f32 %v1185_v33, %v6427_v13  ;;  %v5380_v35 = vpop.f32.mrb[17].mxu1  ;;  %v5863_v33 = vpack.c.bf16 %v4927_v28, %v4926_v27  ;;  %v5875_v27 = vpack.c.bf16 %v4941_v5, %v4940_v62  ;;  %v4943_v28 = vld [vmem:[%s7309_s0 + $0x98] sm:$0xff] }
0x1579   :  { %v4929_v35 = vld [vmem:[%s7309_s0 + $0x58] sm:$0xff] }
0x157a   :  { %v1191_v36 = vsub.f32 0.0, %v1189_v34  ;;  %v5866_v10 = vpack.c.bf16 %v4929_v35, %v4928_v30 }
0x157c   :  { %v1192_v37 = vmul.f32 1.442695, %v1191_v36  ;;  %v4935_v36 = vld [vmem:[%s7309_s0 + $0x70] sm:$0xff] }
0x157e   :  { %6071 = vpow2.f32 %v1192_v37  ;;  %v4936_v37 = vld [vmem:[%s7309_s0 + $0x78] sm:$0xff] }
0x157f   :  { %6073 = vtanh.f32 %v1189_v34  ;;  %v5872_v47 = vpack.c.bf16 %v4936_v37, %v4935_v36 }
0x1588   :  { %v6072_v38 = vpop.eup %6071 }
0x1589   :  { %v1194_v39 = vadd.f32 1.0, %v6072_v38  ;;  %v6074_v40 = vpop.eup %6073 }
0x158b   :  { %6075 = vrcp.f32 %v1194_v39 }
0x1595   :  { %v6076_v41 = vpop.eup %6075 }
0x1596   :  { %v1197_v42 = vsel %vm6431_vm14, %v6074_v40, %v6076_v41 }
0x1597   :  { %1200 = vrot.lane.b32.xlu0 %v1197_v42, %s6174_s6  ;;  %v1198_v13 = vmul.f32 %v1197_v42, %v1107_v4  ;;  %v4933_v4 = vld [vmem:[%s7309_s0 + $0x60] sm:$0xff] }
0x1598   :  { %v5869_v34 = vpack.c.bf16 %v4934_v29, %v4933_v4  ;;  %v4949_v4 = vld [vmem:[%s7309_s0 + $0xb0] sm:$0xff]  ;;  %v4950_v29 = vld [vmem:[%s7309_s0 + $0xb8] sm:$0xff] }
0x1599   :  { %v5884_v35 = vpack.c.bf16 %v4950_v29, %v4949_v4 }
0x1609   :  { %v1201_v43 = vpop.permute.xlu0 %1200 }
0x160a   :  { %v1203_v44 = vmul.f32 %v1201_v43, %v1197_v42 }
0x160c   :  { %1205 = vrot.lane.b32.xlu1 %v1203_v44, %s6175_s11 }
0x167e   :  { %v1206_v45 = vpop.permute.xlu1 %1205 }
0x167f   :  { %v1208_v46 = vadd.f32 %v1206_v45, %v1198_v13 }
0x1681   :  { %6077 = vtanh.f32 %v1208_v46 }
0x168b   :  { %v6078_v52 = vpop.eup %6077 }
0x168c   :  { %1211 = vrot.lane.b32.xlu0 %v6078_v52, %s6174_s6 }
0x16fe   :  { %v1212_v54 = vpop.permute.xlu0 %1211 }
0x16ff   :  { %v1214_v55 = vmul.f32 %v1212_v54, %v1197_v42 }
0x1701   :  { %v1308_v56 = vrot.slane %v1214_v55, 2  ;;  %1227 = vrot.lane.b32.xlu1 %v1214_v55, %s6175_s11 }
0x1703   :  { %1309 = vrot.lane.b32.xlu0 %v1308_v56, %s6175_s11 }
0x1773   :  { %v1228_v58 = vpop.permute.xlu1 %1227 }
0x1774   :  { %5390 = vmatmul.mubr.msk.f32.vlgmr.msra.gmra.mrb[14].mxu0 %vm403_vm15, %v1228_v58 }
0x1775   :  { %v1310_v59 = vpop.permute.xlu0 %1309  ;;  %5402 = vmatprep.mubr.msk.f32.mxu0 %vm1311_vm3, %v4898_v57 }
0x1776   :  { %5392 = vmatprep.subr.msk.mxu1 %vm1324_vm4, %v1310_v59  ;;  %5400 = vmatprep.subr.msk.mxu0 %vm1324_vm4, %v1310_v59 }
0x1777   :  { %5393 = vmatpush3.msk.msra.mxu1 %vm1324_vm4, %v1310_v59  ;;  %5401 = vmatpush3.msk.msra.mxu0 %vm1324_vm4, %v1310_v59 }
0x1778   :  { %5395 = vmatmul.mubr.msk.f32.vlgmr.msra.gmra.mrb[18].mxu1 %vm1311_vm3, %v1305_v60  ;;  %5403 = vmatmul.mubr.msk.f32.vlgmr.msra.gmra.mrb[16].mxu0 %vm1311_vm3, %v4899_v11 }
0x1779   :  { %5408 = vmatprep.subr.msk.mxu1 %vm1324_vm4, %v1310_v59  ;;  %5405 = vmatprep.mubr.msk.f32.mxu0 %vm1311_vm3, %v4900_v61 }
0x177a   :  { %5409 = vmatpush3.msk.msra.mxu1 %vm1324_vm4, %v1310_v59  ;;  %5397 = vmatprep.mubr.msk.f32.mxu1 %vm1311_vm3, %v1306_v8 }
0x177b   :  { %5850 = vmatprep.subr.bf16.mxu0 %v6171_v14  ;;  %5856 = vmatprep.subr.bf16.mxu1 %v6171_v14 }
0x177c   :  { %5406 = vmatmul.mubr.msk.f32.gmra.mrb[18].mxu0 %vm1311_vm3, %v4901_v63  ;;  %5398 = vmatmul.mubr.msk.f32.gmra.mrb[20].mxu1 %vm1311_vm3, %v1307_v0 }
0x177d   :  { %5410 = vmatprep.mubr.msk.f32.mxu1 %vm1311_vm3, %v4907_v3  ;;  %5852 = vmatpush3.bf16.msra.mxu0 %v5851_v1 }
0x177e   :  { %5853 = vmatprep.subr.bf16.mxu0 %v6171_v14  ;;  %5424 = vmatprep.mubr.msk.f32.mxu0 %vm6172_vm2, %v6173_v19 }
0x1780   :  { %5411 = vmatmul.mubr.msk.f32.vlgmr.msra.gmra.mrb[22].mxu1 %vm1311_vm3, %v4908_v7  ;;  %v4948_v7 = vld [vmem:[%s7309_s0 + $0xa8] sm:$0xff] }
0x1781   :  { %5413 = vmatprep.mubr.msk.f32.mxu1 %vm1311_vm3, %v4909_v12  ;;  %5858 = vmatpush3.bf16.msra.mxu1 %v5857_v9 }
0x1782   :  { %5859 = vmatprep.subr.bf16.mxu1 %v6171_v14  ;;  %5855 = vmatpush3.bf16.msra.mxu0 %v5854_v23 }
0x1783   :  { %5862 = vmatprep.subr.bf16.mxu0 %v6171_v14 }
0x1784   :  { %5414 = vmatmul.mubr.msk.f32.gmra.mrb[24].mxu1 %vm1311_vm3, %v4910_v15  ;;  %vm4125_vm3 = vcmp.lt.s32.totalorder %v6415_v2, 4 }
0x1785   :  { %5441 = vmatprep.mubr.msk.f32.mxu1 %vm6172_vm2, %v6173_v19  ;;  %5861 = vmatpush3.bf16.msra.mxu1 %v5860_v25 }
0x1786   :  { %5868 = vmatprep.subr.bf16.mxu1 %v6171_v14 }
0x1847   :  { %v6630_v26 = vpop.f32.mrb[14].mxu0 }
0x1848   :  { %v5391_v16 = vpop.f32.mrb[15].mxu0 }
0x1849   :  { %v5881_v16 = vpack.c.bf16 %v4948_v7, %v4947_v6 }
0x184b   :  { %v5396_v31 = vpop.f32.mrb[18].mxu1  ;;  %v5404_v32 = vpop.f32.mrb[16].mxu0 }
0x184c   :  { %v1906_v38 = vrot.slane %v5396_v31, 2  ;;  %v2205_v39 = vrot.slane %v5396_v31, 4  ;;  %v2005_v40 = vrot.slane %v5404_v32, 2  ;;  %v1393_v41 = vpop.f32.mrb[19].mxu1  ;;  %v1495_v42 = vpop.f32.mrb[17].mxu0  ;;  %v2307_v43 = vrot.slane %v5404_v32, 4 }
0x184d   :  { %v1905_v44 = vrot.slane %v1393_v41, 2  ;;  %v2204_v13 = vrot.slane %v1393_v41, 4  ;;  %v2004_v45 = vrot.slane %v1495_v42, 2  ;;  %5425 = vmatmul.mubr.msk.f32.vlgmr.msra.gmra.mrb[20].mxu0 %vm403_vm15, %v1495_v42  ;;  %5442 = vmatmul.mubr.msk.f32.vlgmr.msra.gmra.mrb[26].mxu1 %vm403_vm15, %v1393_v41  ;;  %v2306_v46 = vrot.slane %v1495_v42, 4  ;;  %v4961_v41 = vld [vmem:[%s7309_s0 + $0xe0] sm:$0xff]  ;;  %v4962_v42 = vld [vmem:[%s7309_s0 + $0xe8] sm:$0xff] }
0x184e   :  { %5427 = vmatprep.mubr.msk.f32.mxu0 %vm6172_vm2, %v6173_v19  ;;  %5444 = vmatprep.mubr.msk.f32.mxu1 %vm6172_vm2, %v6173_v19 }
0x184f   :  { %v1907_v48 = vsel %vm1324_vm4, %v1905_v44, %v1906_v38  ;;  %v6664_v49 = vsel %vm2203_vm6, %v2204_v13, %v2205_v39  ;;  %v6667_v50 = vsel %vm1324_vm4, %v2004_v45, %v2005_v40  ;;  %v5407_v51 = vpop.f32.mrb[18].mxu0  ;;  %5864 = vmatpush3.bf16.msra.mxu0 %v5863_v33  ;;  %v5399_v52 = vpop.f32.mrb[20].mxu1  ;;  %5870 = vmatpush3.bf16.msra.mxu1 %v5869_v34  ;;  %v4956_v13 = vld [vmem:[%s7309_s0 + $0xd0] sm:$0xff]  ;;  %v4957_v45 = vld [vmem:[%s7309_s0 + $0xd8] sm:$0xff] }
0x1850   :  { %v6670_v53 = vsel %vm2203_vm6, %v2306_v46, %v2307_v43  ;;  %v2311_v54 = vrot.slane %v5407_v51, 4  ;;  %v6672_v55 = vpop.f32.mrb[19].mxu0  ;;  %v2209_v56 = vrot.slane %v5399_v52, 4  ;;  %v6674_v57 = vpop.f32.mrb[21].mxu1  ;;  %5865 = vmatprep.subr.bf16.mxu0 %v6171_v14  ;;  %5871 = vmatprep.subr.bf16.mxu1 %v6171_v14  ;;  %v5878_v34 = vpack.c.bf16 %v4943_v28, %v4942_v22  ;;  %v4963_v46 = vld [vmem:[%s7309_s0 + $0xf0] sm:$0xff]  ;;  %v4969_v51 = vld [vmem:[%s7309_s0 + $0x108] sm:$0xff] }
0x1851   :  { %v2007_v58 = vrot.slane %v6672_v55, 2  ;;  %v2309_v59 = vrot.slane %v6672_v55, 4  ;;  %5428 = vmatmul.mubr.msk.f32.gmra.mrb[22].mxu0 %vm403_vm15, %v5404_v32  ;;  %5445 = vmatmul.mubr.msk.f32.gmra.mrb[28].mxu1 %vm403_vm15, %v5396_v31  ;;  %v1908_v60 = vrot.slane %v6674_v57, 2  ;;  %v2207_v11 = vrot.slane %v6674_v57, 4 }
0x1852   :  { %5430 = vmatprep.mubr.msk.f32.mxu0 %vm6172_vm2, %v6173_v19  ;;  %5447 = vmatprep.mubr.msk.f32.mxu1 %vm6172_vm2, %v6173_v19  ;;  %v5893_v44 = vpack.c.bf16 %v4962_v42, %v4961_v41 }
0x1853   :  { %5867 = vmatpush3.bf16.msra.mxu0 %v5866_v10  ;;  %5873 = vmatpush3.bf16.msra.mxu1 %v5872_v47  ;;  %v5412_v61 = vpop.f32.mrb[22].mxu1  ;;  %v1909_v18 = vsel %vm1324_vm4, %v1906_v38, %v1908_v60  ;;  %v6697_v8 = vsel %vm1324_vm4, %v2005_v40, %v2007_v58  ;;  %v6700_v63 = vsel %vm2203_vm6, %v2205_v39, %v2207_v11  ;;  %v4954_v39 = vld [vmem:[%s7309_s0 + $0xc0] sm:$0xff]  ;;  %v4955_v40 = vld [vmem:[%s7309_s0 + $0xc8] sm:$0xff]  ;;  %v4964_v10 = vld [vmem:[%s7309_s0 + $0xf8] sm:$0xff] }
0x1854   :  { %v2104_v0 = vrot.slane %v5412_v61, 2  ;;  %v2409_v1 = vrot.slane %v5412_v61, 4  ;;  %v1597_v3 = vpop.f32.mrb[23].mxu1  ;;  %5874 = vmatprep.subr.bf16.mxu0 %v6171_v14  ;;  %5880 = vmatprep.subr.bf16.mxu1 %v6171_v14  ;;  %v6714_v9 = vsel %vm2203_vm6, %v2307_v43, %v2309_v59  ;;  %v6717_v12 = vsel %vm2203_vm6, %v2207_v11, %v2209_v56  ;;  %v4971_v56 = vld [vmem:[%s7309_s0 + $0x118] sm:$0xff] }
0x1855   :  { %5431 = vmatmul.mubr.msk.f32.gmra.mrb[24].mxu0 %vm403_vm15, %v6672_v55  ;;  %5448 = vmatmul.mubr.msk.f32.gmra.mrb[30].mxu1 %vm403_vm15, %v6674_v57  ;;  %v2103_v15 = vrot.slane %v1597_v3, 2  ;;  %v2408_v20 = vrot.slane %v1597_v3, 4  ;;  %v6724_v21 = vsel %vm2203_vm6, %v2309_v59, %v2311_v54  ;;  %v5887_v43 = vpack.c.bf16 %v4955_v40, %v4954_v39  ;;  %v4970_v54 = vld [vmem:[%s7309_s0 + $0x110] sm:$0xff]  ;;  %v4977_v59 = vld [vmem:[%s7266_s13 + $0x18] sm:$0xff] }
0x1856   :  { %5458 = vmatprep.mubr.msk.f32.mxu0 %vm6172_vm2, %v6173_v19  ;;  %5475 = vmatprep.mubr.msk.f32.mxu1 %vm6172_vm2, %v6173_v19  ;;  %v5890_v47 = vpack.c.bf16 %v4957_v45, %v4956_v13  ;;  %v5902_v55 = vpack.c.bf16 %v4971_v56, %v4970_v54 }
0x1857   :  { %v2105_v23 = vsel %vm1324_vm4, %v2103_v15, %v2104_v0  ;;  %v6735_v24 = vsel %vm2203_vm6, %v2408_v20, %v2409_v1  ;;  %v5415_v25 = vpop.f32.mrb[24].mxu1 }
0x1858   :  { %v2413_v30 = vrot.slane %v5415_v25, 4  ;;  %v1607_v31 = vpop.f32.mrb[25].mxu1 }
0x1859   :  { %5459 = vmatmul.mubr.msk.f32.vlgmr.msra.gmra.mrb[26].mxu0 %vm403_vm15, %v1597_v3  ;;  %5476 = vmatmul.mubr.msk.f32.vlgmr.msra.gmra.mrb[32].mxu1 %vm403_vm15, %v1907_v48  ;;  %v2106_v32 = vrot.slane %v1607_v31, 2  ;;  %v2411_v33 = vrot.slane %v1607_v31, 4  ;;  %v5896_v48 = vpack.c.bf16 %v4964_v10, %v4963_v46 }
0x185a   :  { %5461 = vmatprep.mubr.msk.f32.mxu0 %vm6172_vm2, %v6173_v19  ;;  %5478 = vmatprep.mubr.msk.f32.mxu1 %vm6172_vm2, %v6173_v19 }
0x185b   :  { %5876 = vmatpush3.bf16.msra.mxu0 %v5875_v27  ;;  %5882 = vmatpush3.bf16.msra.mxu1 %v5881_v16  ;;  %v2107_v36 = vsel %vm1324_vm4, %v2104_v0, %v2106_v32  ;;  %v6754_v37 = vsel %vm2203_vm6, %v2409_v1, %v2411_v33  ;;  %v6757_v38 = vsel %vm2203_vm6, %v2411_v33, %v2413_v30 }
0x185c   :  { %5877 = vmatprep.subr.bf16.mxu0 %v6171_v14  ;;  %5883 = vmatprep.subr.bf16.mxu1 %v6171_v14 }
0x185d   :  { %5462 = vmatmul.mubr.msk.f32.gmra.mrb[28].mxu0 %vm403_vm15, %v5412_v61  ;;  %5479 = vmatmul.mubr.msk.f32.gmra.mrb[34].mxu1 %vm403_vm15, %v1909_v18 }
0x185e   :  { %5464 = vmatprep.mubr.msk.f32.mxu0 %vm6172_vm2, %v6173_v19  ;;  %5481 = vmatprep.mubr.msk.f32.mxu1 %vm6172_vm2, %v6173_v19 }
0x185f   :  { %5879 = vmatpush3.bf16.msra.mxu0 %v5878_v34  ;;  %5885 = vmatpush3.bf16.msra.mxu1 %v5884_v35 }
0x1860   :  { %5886 = vmatprep.subr.bf16.mxu0 %v6171_v14  ;;  %5892 = vmatprep.subr.bf16.mxu1 %v6171_v14 }
0x1861   :  { %5465 = vmatmul.mubr.msk.f32.gmra.mrb[30].mxu0 %vm403_vm15, %v1607_v31  ;;  %5482 = vmatmul.mubr.msk.f32.gmra.mrb[36].mxu1 %vm403_vm15, %v1908_v60 }
0x1862   :  { %5492 = vmatprep.mubr.msk.f32.mxu0 %vm6172_vm2, %v6173_v19  ;;  %5509 = vmatprep.mubr.msk.f32.mxu1 %vm6172_vm2, %v6173_v19 }
0x1865   :  { %5493 = vmatmul.mubr.msk.f32.vlgmr.msra.gmra.mrb[32].mxu0 %vm403_vm15, %v6667_v50  ;;  %5510 = vmatmul.mubr.msk.f32.vlgmr.msra.gmra.mrb[38].mxu1 %vm403_vm15, %v2105_v23  ;;  %v4968_v50 = vld [vmem:[%s7309_s0 + $0x100] sm:$0xff] }
0x1866   :  { %5495 = vmatprep.mubr.msk.f32.mxu0 %vm6172_vm2, %v6173_v19  ;;  %5512 = vmatprep.mubr.msk.f32.mxu1 %vm6172_vm2, %v6173_v19  ;;  %v5899_v52 = vpack.c.bf16 %v4969_v51, %v4968_v50 }
0x1867   :  { %5888 = vmatpush3.bf16.msra.mxu0 %v5887_v43  ;;  %5894 = vmatpush3.bf16.msra.mxu1 %v5893_v44 }
0x1868   :  { %5889 = vmatprep.subr.bf16.mxu0 %v6171_v14  ;;  %5895 = vmatprep.subr.bf16.mxu1 %v6171_v14 }
0x1869   :  { %5496 = vmatmul.mubr.msk.f32.gmra.mrb[34].mxu0 %vm403_vm15, %v6697_v8  ;;  %5513 = vmatmul.mubr.msk.f32.gmra.mrb[40].mxu1 %vm403_vm15, %v2107_v36 }
0x186a   :  { %5498 = vmatprep.mubr.msk.f32.mxu0 %vm6172_vm2, %v6173_v19  ;;  %5515 = vmatprep.mubr.msk.f32.mxu1 %vm6172_vm2, %v6173_v19 }
0x186b   :  { %5891 = vmatpush3.bf16.msra.mxu0 %v5890_v47  ;;  %5897 = vmatpush3.bf16.msra.mxu1 %v5896_v48 }
0x186c   :  { %5898 = vmatprep.subr.bf16.mxu0 %v6171_v14  ;;  %5904 = vmatprep.subr.bf16.mxu1 %v6171_v14 }
0x186d   :  { %5499 = vmatmul.mubr.msk.f32.gmra.mrb[36].mxu0 %vm403_vm15, %v2007_v58  ;;  %5516 = vmatmul.mubr.msk.f32.gmra.mrb[42].mxu1 %vm403_vm15, %v2106_v32  ;;  %v4976_v58 = vld [vmem:[%s7266_s13 + $0x10] sm:$0xff] }
0x186e   :  { %5526 = vmatprep.mubr.msk.f32.mxu0 %vm6172_vm2, %v6173_v19  ;;  %5543 = vmatprep.mubr.msk.f32.mxu1 %vm6172_vm2, %v6173_v19  ;;  %v5905_v60 = vpack.c.bf16 %v4977_v59, %v4976_v58 }
0x1871   :  { %5527 = vmatmul.mubr.msk.f32.vlgmr.msra.gmra.mrb[38].mxu0 %vm403_vm15, %v6664_v49  ;;  %5544 = vmatmul.mubr.msk.f32.vlgmr.msra.gmra.mrb[44].mxu1 %vm403_vm15, %v6670_v53  ;;  %v2523_v49 = vld [vmem:[%s7266_s13] sm:$0xff]  ;;  %v2524_v53 = vld [vmem:[%s7266_s13 + $0x8] sm:$0xff] }
0x1872   :  { %5529 = vmatprep.mubr.msk.f32.mxu0 %vm6172_vm2, %v6173_v19  ;;  %5546 = vmatprep.mubr.msk.f32.mxu1 %vm6172_vm2, %v6173_v19  ;;  %v5908_v57 = vpack.c.bf16 %v2524_v53, %v2523_v49 }
0x1873   :  { %5900 = vmatpush3.bf16.msra.mxu0 %v5899_v52  ;;  %5906 = vmatpush3.bf16.msra.mxu1 %v5905_v60 }
0x1874   :  { %5901 = vmatprep.subr.bf16.mxu0 %v6171_v14  ;;  %5910 = vmatprep.subr.bf16.mxu1 %v6171_v14 }
0x1875   :  { %5530 = vmatmul.mubr.msk.f32.gmra.mrb[40].mxu0 %vm403_vm15, %v6700_v63  ;;  %5547 = vmatmul.mubr.msk.f32.gmra.mrb[46].mxu1 %vm403_vm15, %v6714_v9 }
0x1876   :  { %5532 = vmatprep.mubr.msk.f32.mxu0 %vm6172_vm2, %v6173_v19  ;;  %5549 = vmatprep.mubr.msk.f32.mxu1 %vm6172_vm2, %v6173_v19 }
0x1877   :  { %5903 = vmatpush3.bf16.msra.mxu0 %v5902_v55 }
0x1878   :  { %5907 = vmatprep.subr.bf16.mxu0 %v6171_v14 }
0x1879   :  { %5533 = vmatmul.mubr.msk.f32.gmra.mrb[42].mxu0 %vm403_vm15, %v6717_v12  ;;  %5550 = vmatmul.mubr.msk.f32.gmra.mrb[48].mxu1 %vm403_vm15, %v6724_v21 }
0x187a   :  { %5560 = vmatprep.mubr.msk.f32.mxu0 %vm6172_vm2, %v6173_v19  ;;  %5573 = vmatprep.mubr.msk.f32.mxu1 %vm6172_vm2, %v6173_v19 }
0x187d   :  { %5561 = vmatmul.mubr.msk.f32.vlgmr.msra.gmra.mrb[44].mxu0 %vm403_vm15, %v6735_v24 }
0x187e   :  { %5563 = vmatprep.mubr.msk.f32.mxu0 %vm6172_vm2, %v6173_v19  ;;  %5909 = vmatpush3.bf16.msra.mxu0 %v5908_v57 }
0x187f   :  { %5913 = vmatprep.subr.bf16.mxu0 %v6171_v14 }
0x1881   :  { %5564 = vmatmul.mubr.msk.f32.gmra.mrb[46].mxu0 %vm403_vm15, %v6754_v37 }
0x1882   :  { %5566 = vmatprep.mubr.msk.f32.mxu0 %vm6172_vm2, %v6173_v19 }
0x1885   :  { %5567 = vmatmul.mubr.msk.f32.gmra.mrb[48].mxu0 %vm403_vm15, %v6757_v38 }
0x1886   :  { %5586 = vmatprep.mubr.msk.f32.mxu0 %vm6172_vm2, %v6173_v19 }
0x1920   :  { %v1700_v11 = vpop.f32.mrb[20].mxu0  ;;  %v1789_v61 = vpop.f32.mrb[26].mxu1 }
0x1921   :  { %v5426_v62 = vpop.f32.mrb[21].mxu0  ;;  %v1790_v18 = vadd.f32 %v1789_v61, %v1700_v11  ;;  %v5443_v8 = vpop.f32.mrb[27].mxu1 }
0x1924   :  { %v1705_v63 = vpop.f32.mrb[22].mxu0  ;;  %v1794_v0 = vpop.f32.mrb[28].mxu1 }
0x1925   :  { %v1795_v1 = vadd.f32 %v1794_v0, %v1705_v63  ;;  %v5429_v3 = vpop.f32.mrb[23].mxu0  ;;  %v5446_v5 = vpop.f32.mrb[29].mxu1 }
0x1928   :  { %v1710_v6 = vpop.f32.mrb[24].mxu0  ;;  %v1799_v7 = vpop.f32.mrb[30].mxu1 }
0x1929   :  { %v1800_v9 = vadd.f32 %v1799_v7, %v1710_v6  ;;  %v5432_v12 = vpop.f32.mrb[25].mxu0  ;;  %v5449_v15 = vpop.f32.mrb[31].mxu1  ;;  %v4975_v7 = vld [vmem:[%s7265_s12] ss:$0 sm:$0xff] }
0x192a   :  { %v2838_v15 = vld [vmem:[%s7269_s16] sm:$0xff] }
0x192c   :  { %v1883_v20 = vpop.f32.mrb[26].mxu0  ;;  %v1982_v21 = vpop.f32.mrb[32].mxu1 }
0x192d   :  { %v1897_v22 = vadd.f32 %v1883_v20, %v1790_v18  ;;  %v5477_v23 = vpop.f32.mrb[33].mxu1  ;;  %v5460_v24 = vpop.f32.mrb[27].mxu0  ;;  %v2839_v20 = vld [vmem:[%s7269_s16 + $0x8] sm:$0xff] }
0x192f   :  { %v1996_v25 = vadd.f32 %v1982_v21, %v1897_v22 }
0x1930   :  { %v1888_v27 = vpop.f32.mrb[28].mxu0  ;;  %v1987_v16 = vpop.f32.mrb[34].mxu1 }
0x1931   :  { %v1898_v28 = vadd.f32 %v1888_v27, %v1795_v1  ;;  %v5463_v4 = vpop.f32.mrb[29].mxu0  ;;  %v5480_v29 = vpop.f32.mrb[35].mxu1  ;;  %v5914_v27 = vpack.c.bf16 %v2839_v20, %v2838_v15  ;;  %v4989_v15 = vld [vmem:[%s7267_s14] ss:$0 sm:$0xff] }
0x1932   :  { %v4891_v4 = vld [vmem:[%s7310_s3] ss:$0 sm:$0xff]  ;;  %s7312_s3 = sld [smem:[#allocation8_spill]] }
0x1933   :  { %v1997_v30 = vadd.f32 %v1987_v16, %v1898_v28 }
0x1934   :  { %v1893_v31 = vpop.f32.mrb[30].mxu0  ;;  %v1992_v32 = vpop.f32.mrb[36].mxu1 }
0x1935   :  { %v1899_v33 = vadd.f32 %v1893_v31, %v1800_v9  ;;  %v5483_v34 = vpop.f32.mrb[37].mxu1  ;;  %v5466_v35 = vpop.f32.mrb[31].mxu0 }
0x1936   :  { %v4985_v34 = vld [vmem:[%s7266_s13 + $0x28] sm:$0xff]  ;;  %v1298_v35 = vadd.f32 %v4891_v4, %v6630_v26 }
0x1937   :  { %v1998_v36 = vadd.f32 %v1992_v32, %v1899_v33  ;;  %v4984_v33 = vld [vmem:[%s7266_s13 + $0x20] sm:$0xff] }
0x1938   :  { %v2081_v37 = vpop.f32.mrb[32].mxu0  ;;  %v2180_v38 = vpop.f32.mrb[38].mxu1  ;;  %vm1301_vm10 = vcmp.gt.f32.partialorder %v1298_v35, 0.0 }
0x1939   :  { %v2095_v39 = vadd.f32 %v2081_v37, %v1996_v25  ;;  %v5494_v40 = vpop.f32.mrb[33].mxu0  ;;  %v5511_v41 = vpop.f32.mrb[39].mxu1 }
0x193b   :  { %v2194_v42 = vadd.f32 %v2180_v38, %v2095_v39 }
0x193c   :  { %v2086_v43 = vpop.f32.mrb[34].mxu0  ;;  %v2185_v44 = vpop.f32.mrb[40].mxu1 }
0x193d   :  { %v2096_v13 = vadd.f32 %v2086_v43, %v1997_v30  ;;  %v5497_v45 = vpop.f32.mrb[35].mxu0  ;;  %v5514_v46 = vpop.f32.mrb[41].mxu1  ;;  %v5911_v43 = vpack.c.bf16 %v4985_v34, %v4984_v33 }
0x193e   :  { %v1302_v45 = vmul.f32 0.1, %v1298_v35 }
0x193f   :  { %v2195_v10 = vadd.f32 %v2185_v44, %v2096_v13 }
0x1940   :  { %v2091_v47 = vpop.f32.mrb[36].mxu0  ;;  %v2190_v48 = vpop.f32.mrb[42].mxu1 }
0x1941   :  { %v2097_v50 = vadd.f32 %v2091_v47, %v1998_v36  ;;  %v5500_v51 = vpop.f32.mrb[37].mxu0  ;;  %v5517_v52 = vpop.f32.mrb[43].mxu1 }
0x1942   :  { %v2921_v51 = vld [vmem:[%s7272_s19] sm:$0xff]  ;;  %v2922_v52 = vld [vmem:[%s7272_s19 + $0x8] sm:$0xff] }
0x1943   :  { %v2196_v54 = vadd.f32 %v2190_v48, %v2097_v50  ;;  %v1303_v50 = vsel %vm1301_vm10, %v1298_v35, %v1302_v45 }
0x1944   :  { %v2283_v56 = vpop.f32.mrb[38].mxu0  ;;  %v2385_v55 = vpop.f32.mrb[44].mxu1 }
0x1945   :  { %v2297_v49 = vadd.f32 %v2283_v56, %v2194_v42  ;;  %v5528_v53 = vpop.f32.mrb[39].mxu0  ;;  %v5545_v57 = vpop.f32.mrb[45].mxu1  ;;  %v3001_v56 = vld [vmem:[%s7273_s20] sm:$0x7] }
0x1946   :  { %v3081_v53 = vld [vmem:[%s7312_s3] sm:$0x3] }
0x1947   :  { %v2399_v58 = vadd.f32 %v2385_v55, %v2297_v49  ;;  %v3000_v55 = vld [vmem:[%s7311_s1] sm:$0x3] }
0x1948   :  { %v2288_v59 = vpop.f32.mrb[40].mxu0  ;;  %v2390_v60 = vpop.f32.mrb[46].mxu1  ;;  %v3082_v49 = vld [vmem:[%s7274_s21] sm:$0x3] }
0x1949   :  { %v2298_v11 = vadd.f32 %v2288_v59, %v2195_v10  ;;  %v5531_v61 = vpop.f32.mrb[41].mxu0  ;;  %v5548_v62 = vpop.f32.mrb[47].mxu1  ;;  %v3160_v57 = vld [vmem:[%s7268_s15] sm:$0xff] }
0x194b   :  { %v2400_v18 = vadd.f32 %v2390_v60, %v2298_v11 }
0x194c   :  { %v2293_v8 = vpop.f32.mrb[42].mxu0  ;;  %v2395_v63 = vpop.f32.mrb[48].mxu1 }
0x194d   :  { %v2299_v0 = vadd.f32 %v2293_v8, %v2196_v54  ;;  %v5534_v1 = vpop.f32.mrb[43].mxu0  ;;  %v5551_v3 = vpop.f32.mrb[49].mxu1  ;;  %v5917_v54 = vpack.c.bf16 %v2922_v52, %v2921_v51  ;;  %v5014_v51 = vld [vmem:[%s7271_s18 + $0x20] sm:$0xff] }
0x194e   :  { %v3938_v52 = vld [vmem:[%s7275_s22] sm:$0xff] }
0x194f   :  { %v2401_v5 = vadd.f32 %v2395_v63, %v2299_v0 }
0x1950   :  { %v2487_v6 = vpop.f32.mrb[44].mxu0 }
0x1951   :  { %v2501_v9 = vadd.f32 %v2487_v6, %v2399_v58  ;;  %v5562_v12 = vpop.f32.mrb[45].mxu0  ;;  %v3235_v58 = vld [vmem:[%s7271_s18] sm:$0xff] }
0x1953   :  { %v2511_v21 = vadd.f32 %v4975_v7, %v2501_v9 }
0x1954   :  { %v2492_v22 = vpop.f32.mrb[46].mxu0 }
0x1955   :  { %vm2514_vm7 = vcmp.gt.f32.partialorder %v2511_v21, 0.0  ;;  %v2517_v23 = vmul.f32 0.1, %v2511_v21  ;;  %v2502_v24 = vadd.f32 %v2492_v22, %v2400_v18  ;;  %v5565_v25 = vpop.f32.mrb[47].mxu0 }
0x1957   :  { %v2520_v16 = vsel %vm2514_vm7, %v2511_v21, %v2517_v23  ;;  %v2512_v28 = vadd.f32 %v4975_v7, %v2502_v24  ;;  %vm3931_vm7 = vcmask 9216  }
0x1958   :  { %v2497_v29 = vpop.f32.mrb[48].mxu0  ;;  %5587 = vmatmul.mubr.msk.f32.vlgmr.msra.gmra.mrb[50].mxu0 %vm269_vm5, %v2520_v16  ;;  %v2531_v38 = vrot.slane %v2520_v16, 2  ;;  %v2711_v39 = vrot.slane %v2520_v16, 4  ;;  %v5000_v16 = vld [vmem:[%s7268_s15 + $0x8] sm:$0xff] }
0x1959   :  { %v2518_v30 = vmul.f32 0.1, %v2512_v28  ;;  %v2503_v31 = vadd.f32 %v2497_v29, %v2401_v5  ;;  %v5568_v32 = vpop.f32.mrb[49].mxu0  ;;  %5589 = vmatprep.mubr.msk.f32.mxu0 %vm6172_vm2, %v6173_v19  ;;  %vm2515_vm8 = vcmp.gt.f32.partialorder %v2512_v28, 0.0  ;;  %5915 = vmatpush3.bf16.msra.mxu0 %v5914_v27  ;;  %v5002_v29 = vld [vmem:[%s7271_s18 + $0x8] sm:$0xff] }
0x195a   :  { %5632 = vmatprep.subr.mxu0 %v6173_v19 }
0x195b   :  { %v2513_v36 = vadd.f32 %v4975_v7, %v2503_v31  ;;  %v2521_v37 = vsel %vm2515_vm8, %v2512_v28, %v2518_v30 }
0x195c   :  { %v2532_v40 = vrot.slane %v2521_v37, 2  ;;  %5590 = vmatmul.mubr.msk.f32.gmra.mrb[52].mxu0 %vm269_vm5, %v2521_v37  ;;  %v2712_v41 = vrot.slane %v2521_v37, 4 }
0x195d   :  { %v2519_v42 = vmul.f32 0.1, %v2513_v36  ;;  %5592 = vmatprep.mubr.msk.f32.mxu0 %vm6172_vm2, %v6173_v19  ;;  %vm2516_vm9 = vcmp.gt.f32.partialorder %v2513_v36, 0.0 }
0x195e   :  { %v2533_v44 = vsel %vm1324_vm4, %v2531_v38, %v2532_v40  ;;  %v2713_v13 = vsel %vm2203_vm6, %v2711_v39, %v2712_v41 }
0x195f   :  { %5574 = vmatmul.mubr.msk.f32.vlgmr.msra.gmra.mrb[50].mxu1 %vm269_vm5, %v2533_v44  ;;  %v2522_v26 = vsel %vm2516_vm9, %v2513_v36, %v2519_v42  ;;  %v5004_v42 = vld [vmem:[%s7268_s15 + $0x10] sm:$0xff] }
0x1960   :  { %v2534_v46 = vrot.slane %v2522_v26, 2  ;;  %5593 = vmatmul.mubr.msk.f32.gmra.mrb[54].mxu0 %vm269_vm5, %v2522_v26  ;;  %v2714_v10 = vrot.slane %v2522_v26, 4  ;;  %5576 = vmatprep.mubr.msk.f32.mxu1 %vm6172_vm2, %v6173_v19  ;;  %v5006_v44 = vld [vmem:[%s7271_s18 + $0x10] sm:$0xff] }
0x1961   :  { %5912 = vmatpush3.bf16.msra.mxu1 %v5911_v43  ;;  %5612 = vmatprep.mubr.msk.f32.mxu0 %vm6172_vm2, %v6173_v19 }
0x1962   :  { %v2535_v47 = vsel %vm1324_vm4, %v2532_v40, %v2534_v46  ;;  %v2715_v48 = vsel %vm2203_vm6, %v2712_v41, %v2714_v10  ;;  %5916 = vmatprep.subr.bf16.mxu1 %v6171_v14  ;;  %vm4124_vm4 = vcmp.lt.s32.totalorder %v6415_v2, 2  ;;  %vm4131_vm6 = vcmask 33792  }
0x1963   :  { %5577 = vmatmul.mubr.msk.f32.gmra.mrb[52].mxu1 %vm269_vm5, %v2535_v47 }
0x1964   :  { %5613 = vmatmul.mubr.msk.f32.vlgmr.msra.gmra.mrb[56].mxu0 %vm269_vm5, %v1303_v50  ;;  %5579 = vmatprep.mubr.msk.f32.mxu1 %vm6172_vm2, %v6173_v19 }
0x1965   :  { %5634 = vmatprep.mubr.msk.f32.mxu0 %vm6172_vm2, %v6173_v19  ;;  %5633 = vmatpush3.msra.mxu0 %v3160_v57 }
0x1966   :  { %5642 = vmatprep.subr.mxu0 %v6173_v19 }
0x1967   :  { %5580 = vmatmul.mubr.msk.f32.gmra.mrb[54].mxu1 %vm269_vm5, %v2534_v46  ;;  %v5008_v46 = vld [vmem:[%s7268_s15 + $0x18] sm:$0xff] }
0x1968   :  { %5599 = vmatprep.mubr.msk.f32.mxu1 %vm6172_vm2, %v6173_v19 }
0x196b   :  { %5600 = vmatmul.mubr.msk.f32.vlgmr.msra.gmra.mrb[56].mxu1 %vm269_vm5, %v2713_v13 }
0x196c   :  { %5602 = vmatprep.mubr.msk.f32.mxu1 %vm6172_vm2, %v6173_v19  ;;  %5918 = vmatpush3.bf16.msra.mxu1 %v5917_v54  ;;  %v3939_v54 = vld [vmem:[%s7275_s22 + $0x8] sm:$0xff] }
0x196d   :  { %5622 = vmatprep.subr.mxu1 %v6173_v19 }
0x196f   :  { %5603 = vmatmul.mubr.msk.f32.gmra.mrb[58].mxu1 %vm269_vm5, %v2715_v48 }
0x1970   :  { %5605 = vmatprep.mubr.msk.f32.mxu1 %vm6172_vm2, %v6173_v19 }
0x1973   :  { %5606 = vmatmul.mubr.msk.f32.gmra.mrb[60].mxu1 %vm269_vm5, %v2714_v10  ;;  %v5010_v10 = vld [vmem:[%s7271_s18 + $0x18] sm:$0xff] }
0x1974   :  { %5619 = vmatprep.mubr.msk.f32.mxu1 %vm6172_vm2, %v6173_v19 }
0x1977   :  { %5620 = vmatmul.mubr.msk.f32.vlgmr.msra.gmra.mrb[62].mxu1 %vm269_vm5, %v1303_v50  ;;  %v5012_v50 = vld [vmem:[%s7268_s15 + $0x20] sm:$0xff] }
0x1978   :  { %5624 = vmatprep.mubr.msk.f32.mxu1 %vm6172_vm2, %v6173_v19  ;;  %5623 = vmatpush3.msk.msra.mxu1 %vm3006_vm11, %v3001_v56  ;;  %v7049_v56 = vpack.c.bf16 %v3939_v54, %v3938_v52 }
0x1979   :  { %5627 = vmatprep.subr.mxu1 %v6173_v19 }
0x197f   :  { %5625 = vmatmul.mubr.msk.f32.vlgmr.msra.gmra.mrb[62].mxu1 %vm3002_vm12, %v3000_v55 }
0x1980   :  { %5629 = vmatprep.mubr.msk.f32.mxu1 %vm6172_vm2, %v6173_v19  ;;  %5628 = vmatpush3.msk.msra.mxu1 %vm127_vm0, %v3082_v49  ;;  %v3940_v49 = vld [vmem:[%s7275_s22 + $0x10] sm:$0xff] }
0x1981   :  { %5637 = vmatprep.subr.mxu1 %v6173_v19 }
0x1987   :  { %5630 = vmatmul.mubr.msk.f32.vlgmr.msra.gmra.mrb[62].mxu1 %vm102_vm1, %v3081_v53  ;;  %vm3161_vm1 = vcmask 64512   ;;  %v3941_v53 = vld [vmem:[%s7275_s22 + $0x18] sm:$0xff] }
0x1988   :  { %5639 = vmatprep.mubr.msk.f32.mxu1 %vm6172_vm2, %v6173_v19  ;;  %5638 = vmatpush3.msra.mxu1 %v3235_v58  ;;  %v7060_v57 = vpack.c.bf16 %v3941_v53, %v3940_v49 }
0x1989   :  { %5647 = vmatprep.subr.mxu1 %v6173_v19 }
0x1a2b   :  { %v2694_v59 = vpop.f32.mrb[50].mxu0 }
0x1a2c   :  { %v5588_v60 = vpop.f32.mrb[51].mxu0 }
0x1a2f   :  { %v2699_v11 = vpop.f32.mrb[52].mxu0 }
0x1a30   :  { %v5591_v61 = vpop.f32.mrb[53].mxu0 }
0x1a31   :  { %v4993_v61 = vld [vmem:[%s7276_s23] ss:$0 sm:$0xff] }
0x1a32   :  { %v2608_v62 = vpop.f32.mrb[50].mxu1 }
0x1a33   :  { %v2695_v18 = vadd.f32 %v2694_v59, %v2608_v62  ;;  %v5575_v8 = vpop.f32.mrb[51].mxu1  ;;  %v2704_v63 = vpop.f32.mrb[54].mxu0 }
0x1a34   :  { %v5594_v0 = vpop.f32.mrb[55].mxu0 }
0x1a36   :  { %v2613_v1 = vpop.f32.mrb[52].mxu1 }
0x1a37   :  { %v2700_v3 = vadd.f32 %v2699_v11, %v2613_v1  ;;  %v5578_v5 = vpop.f32.mrb[53].mxu1 }
0x1a3a   :  { %v2618_v6 = vpop.f32.mrb[54].mxu1 }
0x1a3b   :  { %v2705_v7 = vadd.f32 %v2704_v63, %v2618_v6  ;;  %v5581_v9 = vpop.f32.mrb[55].mxu1 }
0x1a3e   :  { %v2788_v12 = vpop.f32.mrb[56].mxu1 }
0x1a3f   :  { %v2802_v20 = vadd.f32 %v2788_v12, %v2695_v18  ;;  %v5601_v21 = vpop.f32.mrb[57].mxu1 }
0x1a41   :  { %v2812_v22 = vadd.f32 %v4989_v15, %v2802_v20 }
0x1a42   :  { %v2793_v23 = vpop.f32.mrb[58].mxu1 }
0x1a43   :  { %vm2815_vm0 = vcmp.gt.f32.partialorder %v2812_v22, 0.0  ;;  %v2818_v24 = vmul.f32 0.1, %v2812_v22  ;;  %v2803_v25 = vadd.f32 %v2793_v23, %v2700_v3  ;;  %v5604_v27 = vpop.f32.mrb[59].mxu1  ;;  %v3942_v23 = vld [vmem:[%s7277_s24] sm:$0xff] }
0x1a45   :  { %v2813_v28 = vadd.f32 %v4989_v15, %v2803_v25  ;;  %v2821_v4 = vsel %vm2815_vm0, %v2812_v22, %v2818_v24  ;;  %v3943_v24 = vld [vmem:[%s7277_s24 + $0x8] sm:$0xff]  ;;  %v3944_v25 = vld [vmem:[%s7277_s24 + $0x10] sm:$0xff] }
0x1a46   :  { %v2798_v30 = vpop.f32.mrb[60].mxu1  ;;  %v2825_v31 = vrot.slane %v2821_v4, 2  ;;  %5635 = vmatmul.mubr.msk.f32.vlgmr.msra.gmra.mrb[56].mxu0 %vm3161_vm1, %v2821_v4  ;;  %5640 = vmatmul.mubr.msk.f32.vlgmr.msra.gmra.mrb[62].mxu1 %vm3161_vm1, %v2821_v4  ;;  %v7097_v27 = vpack.c.bf16 %v3943_v24, %v3942_v23 }
0x1a47   :  { %vm2816_vm5 = vcmp.gt.f32.partialorder %v2813_v28, 0.0  ;;  %v2819_v32 = vmul.f32 0.1, %v2813_v28  ;;  %v2804_v33 = vadd.f32 %v2798_v30, %v2705_v7  ;;  %v5607_v34 = vpop.f32.mrb[61].mxu1  ;;  %5643 = vmatpush3.msra.mxu0 %v5000_v16  ;;  %5644 = vmatprep.mubr.msk.f32.mxu0 %vm6172_vm2, %v6173_v19  ;;  %v3945_v16 = vld [vmem:[%s7277_s24 + $0x18] sm:$0xff] }
0x1a48   :  { %v2827_v35 = vmax.f32 %v2821_v4, %v2825_v31  ;;  %5648 = vmatpush3.msra.mxu1 %v5002_v29  ;;  %5649 = vmatprep.mubr.msk.f32.mxu1 %vm6172_vm2, %v6173_v19 }
0x1a49   :  { %v2822_v36 = vsel %vm2816_vm5, %v2813_v28, %v2819_v32  ;;  %v2814_v37 = vadd.f32 %v4989_v15, %v2804_v33  ;;  %5652 = vmatprep.subr.mxu0 %v6173_v19  ;;  %5657 = vmatprep.subr.mxu1 %v6173_v19  ;;  %v7103_v28 = vpack.c.bf16 %v3945_v16, %v3944_v25  ;;  %v7127_v32 = vld [vmem:[%s7278_s25] ss:$0 sm:$0xff] }
0x1a4a   :  { %v2829_v38 = vrot.slane %v2822_v36, 2  ;;  %v3310_v41 = vrot.slane %v2827_v35, 2 }
0x1a4b   :  { %vm2817_vm13 = vcmp.gt.f32.partialorder %v2814_v37, 0.0  ;;  %v2820_v39 = vmul.f32 0.1, %v2814_v37 }
0x1a4c   :  { %v2831_v40 = vmax.f32 %v2821_v4, %v2829_v38  ;;  %v2832_v47 = vmax.f32 %v2822_v36, %v2829_v38 }
0x1a4d   :  { %v2823_v43 = vsel %vm2817_vm13, %v2814_v37, %v2820_v39 }
0x1a4e   :  { %v2834_v13 = vrot.slane %v2823_v43, 2  ;;  %5645 = vmatmul.mubr.msk.f32.vlgmr.msra.gmra.mrb[56].mxu0 %vm3161_vm1, %v3310_v41  ;;  %5650 = vmatmul.mubr.msk.f32.vlgmr.msra.gmra.mrb[62].mxu1 %vm3161_vm1, %v3310_v41  ;;  %v3460_v26 = vrot.slane %v2831_v40, 6  ;;  %v3610_v48 = vrot.slane %v2832_v47, 2 }
0x1a4f   :  { %5653 = vmatpush3.msra.mxu0 %v5004_v42  ;;  %5654 = vmatprep.mubr.msk.f32.mxu0 %vm6172_vm2, %v6173_v19 }
0x1a50   :  { %v2836_v45 = vmax.f32 %v2822_v36, %v2834_v13  ;;  %5658 = vmatpush3.msra.mxu1 %v5006_v44  ;;  %5659 = vmatprep.mubr.msk.f32.mxu1 %vm6172_vm2, %v6173_v19 }
0x1a51   :  { %5662 = vmatprep.subr.mxu0 %v6173_v19  ;;  %5667 = vmatprep.subr.mxu1 %v6173_v19 }
0x1a52   :  { %v3760_v55 = vrot.slane %v2836_v45, 6 }
0x1a56   :  { %5655 = vmatmul.mubr.msk.f32.vlgmr.msra.gmra.mrb[56].mxu0 %vm3161_vm1, %v3460_v26  ;;  %5660 = vmatmul.mubr.msk.f32.vlgmr.msra.gmra.mrb[62].mxu1 %vm3161_vm1, %v3460_v26 }
0x1a57   :  { %5663 = vmatpush3.msra.mxu0 %v5008_v46  ;;  %5664 = vmatprep.mubr.msk.f32.mxu0 %vm6172_vm2, %v6173_v19 }
0x1a58   :  { %5668 = vmatpush3.msra.mxu1 %v5010_v10  ;;  %5669 = vmatprep.mubr.msk.f32.mxu1 %vm6172_vm2, %v6173_v19 }
0x1a59   :  { %5672 = vmatprep.subr.mxu0 %v6173_v19  ;;  %5677 = vmatprep.subr.mxu1 %v6173_v19 }
0x1a5e   :  { %5665 = vmatmul.mubr.msk.f32.vlgmr.msra.gmra.mrb[56].mxu0 %vm3161_vm1, %v3610_v48  ;;  %5670 = vmatmul.mubr.msk.f32.vlgmr.msra.gmra.mrb[62].mxu1 %vm3161_vm1, %v3610_v48 }
0x1a5f   :  { %5673 = vmatpush3.msra.mxu0 %v5012_v50  ;;  %5674 = vmatprep.mubr.msk.f32.mxu0 %vm6172_vm2, %v6173_v19 }
0x1a60   :  { %5678 = vmatpush3.msra.mxu1 %v5014_v51  ;;  %5679 = vmatprep.mubr.msk.f32.mxu1 %vm6172_vm2, %v6173_v19 }
0x1a61   :  { %5919 = vmatprep.subr.bf16.mxu0 %v6171_v14  ;;  %5931 = vmatprep.subr.bf16.mxu1 %v6171_v14 }
0x1a66   :  { %5675 = vmatmul.mubr.msk.f32.vlgmr.msra.gmra.mrb[56].mxu0 %vm3161_vm1, %v3760_v55  ;;  %5680 = vmatmul.mubr.msk.f32.vlgmr.msra.gmra.mrb[62].mxu1 %vm3161_vm1, %v3760_v55 }
0x1a67   :  { %5921 = vmatpush3.bf16.msra.mxu0 %v7049_v56  ;;  %5690 = vmatprep.mubr.msk.f32.mxu0 %vm6172_vm2, %v6173_v19 }
0x1a68   :  { %5922 = vmatprep.subr.bf16.mxu0 %v6171_v14  ;;  %5933 = vmatpush3.bf16.msra.mxu1 %v7049_v56 }
0x1a69   :  { %5934 = vmatprep.subr.bf16.mxu1 %v6171_v14  ;;  %5712 = vmatprep.mubr.msk.f32.mxu1 %vm6172_vm2, %v6173_v19 }
0x1a6b   :  { %5924 = vmatpush3.bf16.msra.mxu0 %v7060_v57 }
0x1a6c   :  { %5925 = vmatprep.subr.bf16.mxu0 %v6171_v14  ;;  %5936 = vmatpush3.bf16.msra.mxu1 %v7060_v57 }
0x1a6d   :  { %5943 = vmatprep.subr.bf16.mxu1 %v6171_v14 }
0x1a6e   :  { %5691 = vmatmul.mubr.f32.vlgmr.msra.gmra.mrb[58].mxu0 %v6173_v19 }
0x1a6f   :  { %5701 = vmatprep.mubr.msk.f32.mxu0 %vm6172_vm2, %v6173_v19  ;;  %5927 = vmatpush3.bf16.msra.mxu0 %v7097_v27 }
0x1a70   :  { %5928 = vmatprep.subr.bf16.mxu0 %v6171_v14 }
0x1a73   :  { %5930 = vmatpush3.bf16.msra.mxu0 %v7103_v28 }
0x1a74   :  { %5937 = vmatprep.subr.bf16.mxu0 %v6171_v14 }
0x1b39   :  { %v7076_v58 = vpop.f32.mrb[56].mxu0  ;;  %v3902_v59 = vpop.f32.mrb[62].mxu1 }
0x1b3a   :  { %v5676_v60 = vpop.f32.mrb[57].mxu0  ;;  %v5681_v11 = vpop.f32.mrb[63].mxu1  ;;  %v7081_v62 = vadd.f32 %v4993_v61, %v3902_v59 }
0x1b41   :  { %v4013_v18 = vpop.f32.mrb[58].mxu0 }
0x1b42   :  { %v4017_v8 = vadd.f32 %v7081_v62, %v4013_v18  ;;  %v5692_v63 = vpop.f32.mrb[59].mxu0 }
0x1b44   :  { %v4019_v0 = vsub.f32 0.0, %v4017_v8 }
0x1b46   :  { %v4020_v1 = vmul.f32 1.442695, %v4019_v0 }
0x1b48   :  { %6079 = vpow2.f32 %v4020_v1 }
0x1b49   :  { %6081 = vtanh.f32 %v4017_v8 }
0x1b52   :  { %v6080_v3 = vpop.eup %6079 }
0x1b53   :  { %v4022_v5 = vadd.f32 1.0, %v6080_v3  ;;  %v6082_v6 = vpop.eup %6081 }
0x1b55   :  { %6083 = vrcp.f32 %v4022_v5 }
0x1b5f   :  { %v6084_v7 = vpop.eup %6083 }
0x1b60   :  { %v4025_v9 = vsel %vm6431_vm14, %v6082_v6, %v6084_v7 }
0x1b61   :  { %4028 = vrot.lane.b32.xlu1 %v4025_v9, %s6174_s6  ;;  %v4026_v20 = vmul.f32 0.0, %v4025_v9 }
0x1bd3   :  { %v4029_v12 = vpop.permute.xlu1 %4028 }
0x1bd4   :  { %v4031_v15 = vmul.f32 %v4029_v12, %v4025_v9 }
0x1bd6   :  { %4033 = vrot.lane.b32.xlu0 %v4031_v15, %s6175_s11 }
0x1c48   :  { %v4034_v21 = vpop.permute.xlu0 %4033 }
0x1c49   :  { %v4036_v22 = vadd.f32 %v4034_v21, %v4026_v20 }
0x1c4b   :  { %6085 = vtanh.f32 %v4036_v22 }
0x1c55   :  { %v6086_v4 = vpop.eup %6085 }
0x1c56   :  { %4039 = vrot.lane.b32.xlu1 %v6086_v4, %s6174_s6 }
0x1cc8   :  { %v4040_v29 = vpop.permute.xlu1 %4039 }
0x1cc9   :  { %v4042_v30 = vmul.f32 %v4040_v29, %v4025_v9 }
0x1ccb   :  { %4050 = vrot.lane.b32.xlu0 %v4042_v30, %s6175_s11 }
0x1d3d   :  { %v4051_v31 = vpop.permute.xlu0 %4050 }
0x1d3e   :  { %5702 = vmatmul.mubr.msk.f32.vlgmr.msra.gmra.mrb[60].mxu0 %vm403_vm15, %v4051_v31  ;;  %5713 = vmatmul.mubr.msk.f32.vlgmr.msra.gmra.mrb[64].mxu1 %vm403_vm15, %v4051_v31 }
0x1d3f   :  { %5939 = vmatpush3.bf16.msra.mxu0 %v7097_v27  ;;  %5945 = vmatpush3.bf16.msra.mxu1 %v7049_v56 }
0x1d40   :  { %5940 = vmatprep.subr.bf16.mxu0 %v6171_v14  ;;  %5946 = vmatprep.subr.bf16.mxu1 %v6171_v14 }
0x1d41   :  { %5723 = vmatprep.mubr.msk.f32.mxu0 %vm6172_vm2, %v6173_v19  ;;  %5734 = vmatprep.mubr.msk.f32.mxu1 %vm6172_vm2, %v6173_v19 }
0x1d43   :  { %5942 = vmatpush3.bf16.msra.mxu0 %v7103_v28  ;;  %5948 = vmatpush3.bf16.msra.mxu1 %v7060_v57 }
0x1d44   :  { %5949 = vmatprep.subr.bf16.mxu0 %v6171_v14  ;;  %5955 = vmatprep.subr.bf16.mxu1 %v6171_v14 }
0x1e11   :  { %v4120_v33 = vpop.f32.mrb[60].mxu0  ;;  %v4199_v34 = vpop.f32.mrb[64].mxu1 }
0x1e12   :  { %v4121_v35 = vadd.f32 %v7127_v32, %v4120_v33  ;;  %v4203_v36 = vadd.f32 %v7081_v62, %v4199_v34  ;;  %v5703_v37 = vpop.f32.mrb[61].mxu0  ;;  %v5714_v38 = vpop.f32.mrb[65].mxu1 }
0x1e14   :  { %v4126_v39 = vmul.f32 1.442695, %v4121_v35  ;;  %v4205_v40 = vsub.f32 0.0, %v4203_v36  ;;  %6087 = vtanh.f32 %v4121_v35 }
0x1e16   :  { %6089 = vpow2.f32 %v4126_v39  ;;  %v4206_v41 = vmul.f32 1.442695, %v4205_v40 }
0x1e18   :  { %6091 = vpow2.f32 %v4206_v41 }
0x1e19   :  { %6093 = vtanh.f32 %v4203_v36 }
0x1e1e   :  { %v6088_v42 = vpop.eup %6087 }
0x1e20   :  { %v6090_v43 = vpop.eup %6089 }
0x1e21   :  { %v4129_v44 = vsel %vm4125_vm3, %v6090_v43, %v6088_v42 }
0x1e22   :  { %v6092_v13 = vpop.eup %6091  ;;  %v4130_v45 = vsel %vm4124_vm4, %v4121_v35, %v4129_v44 }
0x1e23   :  { %4132 = vst.msk [vmem:[#allocation2] sm:$0x3] %vm4131_vm6, %v4130_v45  ;;  %v4208_v26 = vadd.f32 1.0, %v6092_v13  ;;  %v6094_v46 = vpop.eup %6093 }
0x1e25   :  { %6095 = vrcp.f32 %v4208_v26 }
0x1e2f   :  { %v6096_v10 = vpop.eup %6095 }
0x1e30   :  { %v4211_v47 = vsel %vm6431_vm14, %v6094_v46, %v6096_v10 }
0x1e31   :  { %4214 = vrot.lane.b32.xlu1 %v4211_v47, %s6174_s6  ;;  %v4212_v51 = vmul.f32 %v4211_v47, %v4036_v22 }
0x1ea3   :  { %v4215_v48 = vpop.permute.xlu1 %4214 }
0x1ea4   :  { %v4217_v50 = vmul.f32 %v4215_v48, %v4211_v47 }
0x1ea6   :  { %4219 = vrot.lane.b32.xlu0 %v4217_v50, %s6175_s11 }
0x1f18   :  { %v4220_v52 = vpop.permute.xlu0 %4219 }
0x1f19   :  { %v4222_v54 = vadd.f32 %v4220_v52, %v4212_v51 }
0x1f1b   :  { %6097 = vtanh.f32 %v4222_v54 }
0x1f25   :  { %v6098_v55 = vpop.eup %6097 }
0x1f26   :  { %4225 = vrot.lane.b32.xlu1 %v6098_v55, %s6174_s6 }
0x1f98   :  { %v4226_v49 = vpop.permute.xlu1 %4225 }
0x1f99   :  { %v4228_v53 = vmul.f32 %v4226_v49, %v4211_v47 }
0x1f9b   :  { %4230 = vrot.lane.b32.xlu0 %v4228_v53, %s6175_s11 }
0x200d   :  { %v4231_v59 = vpop.permute.xlu0 %4230 }
0x200e   :  { %5724 = vmatmul.mubr.msk.f32.vlgmr.msra.gmra.mrb[62].mxu0 %vm403_vm15, %v4231_v59  ;;  %5735 = vmatmul.mubr.msk.f32.vlgmr.msra.gmra.mrb[66].mxu1 %vm403_vm15, %v4231_v59 }
0x200f   :  { %5951 = vmatpush3.bf16.msra.mxu0 %v7097_v27  ;;  %5957 = vmatpush3.bf16.msra.mxu1 %v7049_v56 }
0x2010   :  { %5952 = vmatprep.subr.bf16.mxu0 %v6171_v14  ;;  %5958 = vmatprep.subr.bf16.mxu1 %v6171_v14 }
0x2011   :  { %5745 = vmatprep.mubr.msk.f32.mxu0 %vm6172_vm2, %v6173_v19  ;;  %5756 = vmatprep.mubr.msk.f32.mxu1 %vm6172_vm2, %v6173_v19 }
0x2013   :  { %5954 = vmatpush3.bf16.msra.mxu0 %v7103_v28  ;;  %5960 = vmatpush3.bf16.msra.mxu1 %v7060_v57 }
0x2014   :  { %5961 = vmatprep.subr.bf16.mxu0 %v6171_v14  ;;  %5967 = vmatprep.subr.bf16.mxu1 %v6171_v14 }
0x20e1   :  { %v4300_v60 = vpop.f32.mrb[62].mxu0  ;;  %v4377_v11 = vpop.f32.mrb[66].mxu1 }
0x20e2   :  { %v4301_v61 = vadd.f32 %v7127_v32, %v4300_v60  ;;  %v4381_v18 = vadd.f32 %v7081_v62, %v4377_v11  ;;  %v5725_v8 = vpop.f32.mrb[63].mxu0  ;;  %v5736_v63 = vpop.f32.mrb[67].mxu1 }
0x20e4   :  { %v4304_v0 = vmul.f32 1.442695, %v4301_v61  ;;  %v4383_v1 = vsub.f32 0.0, %v4381_v18  ;;  %6099 = vtanh.f32 %v4301_v61 }
0x20e6   :  { %6101 = vpow2.f32 %v4304_v0  ;;  %v4384_v3 = vmul.f32 1.442695, %v4383_v1 }
0x20e8   :  { %6103 = vpow2.f32 %v4384_v3 }
0x20e9   :  { %6105 = vtanh.f32 %v4381_v18 }
0x20ee   :  { %v6100_v5 = vpop.eup %6099 }
0x20f0   :  { %v6102_v6 = vpop.eup %6101 }
0x20f1   :  { %v4307_v7 = vsel %vm4125_vm3, %v6102_v6, %v6100_v5 }
0x20f2   :  { %v6104_v9 = vpop.eup %6103  ;;  %v4308_v12 = vsel %vm4124_vm4, %v4301_v61, %v4307_v7 }
0x20f3   :  { %4310 = vst.msk [vmem:[#allocation2 + $0x2] sm:$0x3] %vm4131_vm6, %v4308_v12  ;;  %v4386_v15 = vadd.f32 1.0, %v6104_v9  ;;  %v6106_v20 = vpop.eup %6105 }
0x20f5   :  { %6107 = vrcp.f32 %v4386_v15 }
0x20ff   :  { %v6108_v21 = vpop.eup %6107 }
0x2100   :  { %v4389_v22 = vsel %vm6431_vm14, %v6106_v20, %v6108_v21 }
0x2101   :  { %4392 = vrot.lane.b32.xlu1 %v4389_v22, %s6174_s6  ;;  %v4390_v25 = vmul.f32 %v4389_v22, %v4222_v54 }
0x2173   :  { %v4393_v23 = vpop.permute.xlu1 %4392 }
0x2174   :  { %v4395_v24 = vmul.f32 %v4393_v23, %v4389_v22  ;;  %v4991_v23 = vld [vmem:[%s7270_s17] ss:$0 sm:$0xff]  ;;  %s6176_s17 = smov 125  }
0x2175   :  { %v5981_v17 = vadd.f32 %v4991_v23, %v7076_v58 }
0x2176   :  { %4397 = vrot.lane.b32.xlu0 %v4395_v24, %s6175_s11 }
0x21e8   :  { %v4398_v16 = vpop.permute.xlu0 %4397 }
0x21e9   :  { %v4400_v4 = vadd.f32 %v4398_v16, %v4390_v25 }
0x21eb   :  { %6109 = vtanh.f32 %v4400_v4 }
0x21f5   :  { %v6110_v29 = vpop.eup %6109 }
0x21f6   :  { %4403 = vrot.lane.b32.xlu1 %v6110_v29, %s6174_s6 }
0x2268   :  { %v4404_v30 = vpop.permute.xlu1 %4403 }
0x2269   :  { %v4406_v31 = vmul.f32 %v4404_v30, %v4389_v22 }
0x226b   :  { %4408 = vrot.lane.b32.xlu0 %v4406_v31, %s6175_s11 }
0x22dd   :  { %v4409_v33 = vpop.permute.xlu0 %4408 }
0x22de   :  { %5746 = vmatmul.mubr.msk.f32.vlgmr.msra.gmra.mrb[64].mxu0 %vm403_vm15, %v4409_v33  ;;  %5757 = vmatmul.mubr.msk.f32.vlgmr.msra.gmra.mrb[68].mxu1 %vm403_vm15, %v4409_v33 }
0x22df   :  { %5963 = vmatpush3.bf16.msra.mxu0 %v7097_v27  ;;  %5969 = vmatpush3.bf16.msra.mxu1 %v7049_v56 }
0x22e0   :  { %5964 = vmatprep.subr.bf16.mxu0 %v6171_v14  ;;  %5970 = vmatprep.subr.bf16.mxu1 %v6171_v14 }
0x22e1   :  { %5767 = vmatprep.mubr.msk.f32.mxu0 %vm6172_vm2, %v6173_v19  ;;  %5778 = vmatprep.mubr.msk.f32.mxu1 %vm6172_vm2, %v6173_v19 }
0x22e3   :  { %5966 = vmatpush3.bf16.msra.mxu0 %v7103_v28  ;;  %5972 = vmatpush3.bf16.msra.mxu1 %v7060_v57 }
0x22e4   :  { %5973 = vmatprep.subr.bf16.mxu0 %v6171_v14 }
0x23b1   :  { %v4478_v34 = vpop.f32.mrb[64].mxu0  ;;  %v4555_v35 = vpop.f32.mrb[68].mxu1 }
0x23b2   :  { %v4479_v56 = vadd.f32 %v7127_v32, %v4478_v34  ;;  %v4559_v36 = vadd.f32 %v7081_v62, %v4555_v35  ;;  %v5747_v37 = vpop.f32.mrb[65].mxu0  ;;  %v5758_v38 = vpop.f32.mrb[69].mxu1 }
0x23b4   :  { %v4482_v39 = vmul.f32 1.442695, %v4479_v56  ;;  %v4561_v40 = vsub.f32 0.0, %v4559_v36  ;;  %6111 = vtanh.f32 %v4479_v56 }
0x23b6   :  { %6113 = vpow2.f32 %v4482_v39  ;;  %v4562_v41 = vmul.f32 1.442695, %v4561_v40 }
0x23b8   :  { %6115 = vpow2.f32 %v4562_v41 }
0x23b9   :  { %6117 = vtanh.f32 %v4559_v36 }
0x23be   :  { %v6112_v42 = vpop.eup %6111 }
0x23c0   :  { %v6114_v43 = vpop.eup %6113 }
0x23c1   :  { %v4485_v57 = vsel %vm4125_vm3, %v6114_v43, %v6112_v42 }
0x23c2   :  { %v6116_v44 = vpop.eup %6115  ;;  %v4486_v13 = vsel %vm4124_vm4, %v4479_v56, %v4485_v57 }
0x23c3   :  { %4488 = vst.msk [vmem:[#allocation2 + $0x4] sm:$0x3] %vm4131_vm6, %v4486_v13  ;;  %v4564_v45 = vadd.f32 1.0, %v6116_v44  ;;  %v6118_v26 = vpop.eup %6117 }
0x23c5   :  { %6119 = vrcp.f32 %v4564_v45 }
0x23cf   :  { %v6120_v46 = vpop.eup %6119 }
0x23d0   :  { %v4567_v10 = vsel %vm6431_vm14, %v6118_v26, %v6120_v46 }
0x23d1   :  { %4570 = vrot.lane.b32.xlu1 %v4567_v10, %s6174_s6  ;;  %v4568_v50 = vmul.f32 %v4567_v10, %v4400_v4 }
0x2443   :  { %v4571_v47 = vpop.permute.xlu1 %4570 }
0x2444   :  { %v4573_v48 = vmul.f32 %v4571_v47, %v4567_v10 }
0x2446   :  { %4575 = vrot.lane.b32.xlu0 %v4573_v48, %s6175_s11 }
0x24b8   :  { %v4576_v51 = vpop.permute.xlu0 %4575 }
0x24b9   :  { %v4578_v52 = vadd.f32 %v4576_v51, %v4568_v50 }
0x24bb   :  { %6121 = vtanh.f32 %v4578_v52 }
0x24c5   :  { %v6122_v54 = vpop.eup %6121 }
0x24c6   :  { %4581 = vrot.lane.b32.xlu1 %v6122_v54, %s6174_s6 }
0x2538   :  { %v4582_v55 = vpop.permute.xlu1 %4581 }
0x2539   :  { %v4584_v49 = vmul.f32 %v4582_v55, %v4567_v10 }
0x253b   :  { %4586 = vrot.lane.b32.xlu0 %v4584_v49, %s6175_s11 }
0x25ad   :  { %v4587_v53 = vpop.permute.xlu0 %4586 }
0x25ae   :  { %5768 = vmatmul.mubr.msk.f32.vlgmr.msra.gmra.mrb[66].mxu0 %vm403_vm15, %v4587_v53  ;;  %5779 = vmatmul.mubr.msk.f32.vlgmr.msra.gmra.mrb[70].mxu1 %vm403_vm15, %v4587_v53 }
0x25af   :  { %5975 = vmatpush3.bf16.msra.mxu0 %v7097_v27  ;;  %5789 = vmatprep.mubr.msk.f32.mxu0 %vm6172_vm2, %v6173_v19  ;;  %vm3920_vm2 = vcmask 33816  }
0x25b0   :  { %5976 = vmatprep.subr.bf16.mxu0 %v6171_v14  ;;  %v3921_v24 = vsel %vm3920_vm2, %v5981_v17, -inf }
0x25b3   :  { %5978 = vmatpush3.bf16.msra.mxu0 %v7103_v28 }
0x2681   :  { %v4656_v59 = vpop.f32.mrb[66].mxu0  ;;  %v4733_v60 = vpop.f32.mrb[70].mxu1 }
0x2682   :  { %v4657_v11 = vadd.f32 %v7127_v32, %v4656_v59  ;;  %v4737_v61 = vadd.f32 %v7081_v62, %v4733_v60  ;;  %v5769_v18 = vpop.f32.mrb[67].mxu0  ;;  %v5780_v8 = vpop.f32.mrb[71].mxu1 }
0x2684   :  { %v4660_v63 = vmul.f32 1.442695, %v4657_v11  ;;  %v4739_v0 = vsub.f32 0.0, %v4737_v61  ;;  %6123 = vtanh.f32 %v4657_v11 }
0x2686   :  { %6125 = vpow2.f32 %v4660_v63  ;;  %v4740_v27 = vmul.f32 1.442695, %v4739_v0 }
0x2688   :  { %6127 = vpow2.f32 %v4740_v27 }
0x2689   :  { %6129 = vtanh.f32 %v4737_v61 }
0x268e   :  { %v6124_v1 = vpop.eup %6123 }
0x2690   :  { %v6126_v19 = vpop.eup %6125 }
0x2691   :  { %v4663_v14 = vsel %vm4125_vm3, %v6126_v19, %v6124_v1 }
0x2692   :  { %v6128_v28 = vpop.eup %6127  ;;  %v4664_v3 = vsel %vm4124_vm4, %v4657_v11, %v4663_v14 }
0x2693   :  { %4666 = vst.msk [vmem:[#allocation2 + $0x6] sm:$0x3] %vm4131_vm6, %v4664_v3  ;;  %v4742_v62 = vadd.f32 1.0, %v6128_v28  ;;  %v6130_v5 = vpop.eup %6129 }
0x2695   :  { %6131 = vrcp.f32 %v4742_v62 }
0x269f   :  { %v6132_v6 = vpop.eup %6131 }
0x26a0   :  { %v4745_v7 = vsel %vm6431_vm14, %v6130_v5, %v6132_v6  ;;  %vm3907_vm14 = vcmask 17408  }
0x26a1   :  { %4748 = vrot.lane.b32.xlu1 %v4745_v7, %s6174_s6  ;;  %v4746_v15 = vmul.f32 %v4745_v7, %v4578_v52  ;;  %v3908_v4 = vsel %vm3907_vm14, %v5981_v17, -inf }
0x2713   :  { %v4749_v9 = vpop.permute.xlu1 %4748 }
0x2714   :  { %v4751_v12 = vmul.f32 %v4749_v9, %v4745_v7 }
0x2716   :  { %4753 = vrot.lane.b32.xlu0 %v4751_v12, %s6175_s11 }
0x2788   :  { %v4754_v20 = vpop.permute.xlu0 %4753 }
0x2789   :  { %v4756_v21 = vadd.f32 %v4754_v20, %v4746_v15 }
0x278b   :  { %6133 = vtanh.f32 %v4756_v21 }
0x2795   :  { %v6134_v22 = vpop.eup %6133 }
0x2796   :  { %4759 = vrot.lane.b32.xlu1 %v6134_v22, %s6174_s6  ;;  %s6177_s6 = smov [#allocation2]  }
0x2797   :  { %s4850_s2 = sshll.u32 %s6177_s6, 4  ;;  %s4851_s2 = int_to_ptr.vmem [resolvable:$true] %s4850_s2 }
0x2798   :  { %s6147_s29 = scalar_lea.vmem %s4851_s2, 160  ;;  %p6152_p1 = scmp.lt.s32.totalorder %s4851_s2, %s4851_s2 }
0x2799   :  { %p6148_p0 = scmp.ne.s32.totalorder %s4851_s2, %s6147_s29  ;;  %p6153_p2 = scmp.lt.s32.totalorder %s6147_s29, %s6147_s29 }
0x279b   :  { %p6154_p3 = por %p6153_p2, %p6152_p1 }
0x279d   :  { %p6155_p4 = pnand %p6154_p3, %p6148_p0 }
0x27ba   :  { %3922 = vmax.xlane.f32.xlu1 %v3921_v24 }
0x2808   :  { %v4760_v25 = vpop.permute.xlu1 %4759 }
0x2809   :  { %v4762_v16 = vmul.f32 %v4760_v25, %v4745_v7 }
0x280b   :  { %4764 = vrot.lane.b32.xlu0 %v4762_v16, %s6175_s11 }
0x282a   :  { %3909 = vmax.xlane.f32.xlu0 %v3908_v4 }
0x2847   :  { %v3923_v29 = vpop.xlane.xlu1 %3922 }
0x2848   :  { %v3924_v30 = vsub.f32 %v5981_v17, %v3923_v29 }
0x284a   :  { %v3925_v31 = vmul.f32 1.442695, %v3924_v30 }
0x284c   :  { %6135 = vpow2.f32 %v3925_v31 }
0x2856   :  { %v6136_v33 = vpop.eup %6135 }
0x2857   :  { %3928 = vrot.lane.b32.xlu0 %v6136_v33, %s6176_s17 }
0x287d   :  { %v4765_v58 = vpop.permute.xlu0 %4764 }
0x287e   :  { %5790 = vmatmul.mubr.msk.f32.vlgmr.msra.gmra.mrb[68].mxu0 %vm403_vm15, %v4765_v58 }
0x28b7   :  { %v3910_v34 = vpop.xlane.xlu0 %3909 }
0x28b8   :  { %v3911_v35 = vsub.f32 %v5981_v17, %v3910_v34 }
0x28ba   :  { %v3912_v56 = vmul.f32 1.442695, %v3911_v35 }
0x28bc   :  { %6137 = vpow2.f32 %v3912_v56 }
0x28c6   :  { %v6138_v36 = vpop.eup %6137 }
0x28c7   :  { %v3914_v37 = vsel %vm3907_vm14, %v6138_v36, 0.0 }
0x28c8   :  { %3915 = vadd.xlane.f32.xlu1 %v3914_v37 }
0x28c9   :  { %v3929_v38 = vpop.permute.xlu0 %3928 }
0x28ca   :  { %v3932_v39 = vsel %vm3931_vm7, %v3929_v38, 0.0 }
0x28cc   :  { %3933 = vadd.xlane.f32.xlu1 %v3932_v39 }
0x2951   :  { %v4834_v40 = vpop.f32.mrb[68].mxu0 }
0x2952   :  { %v4835_v41 = vadd.f32 %v7127_v32, %v4834_v40  ;;  %v5791_v42 = vpop.f32.mrb[69].mxu0 }
0x2954   :  { %v4838_v43 = vmul.f32 1.442695, %v4835_v41  ;;  %6139 = vtanh.f32 %v4835_v41 }
0x2955   :  { %v3916_v57 = vpop.xlane.xlu1 %3915 }
0x2956   :  { %6141 = vpow2.f32 %v4838_v43 }
0x2957   :  { %6143 = vrcp.f32 %v3916_v57 }
0x2959   :  { %v3934_v44 = vpop.xlane.xlu1 %3933 }
0x295a   :  { %6145 = vrcp.f32 %v3934_v44 }
0x295e   :  { %v6140_v13 = vpop.eup %6139 }
0x2960   :  { %v6142_v45 = vpop.eup %6141 }
0x2961   :  { %v6144_v26 = vpop.eup %6143  ;;  %v4841_v46 = vsel %vm4125_vm3, %v6142_v45, %v6140_v13 }
0x2962   :  { %v4842_v32 = vsel %vm4124_vm4, %v4835_v41, %v4841_v46  ;;  %v3918_v10 = vmul.f32 %v6144_v26, %v6138_v36 }
0x2963   :  { %4844 = vst.msk [vmem:[#allocation2 + $0x8] sm:$0x3] %vm4131_vm6, %v4842_v32 }
0x2964   :  { %v6146_v47 = vpop.eup %6145  ;;  %3919 = vst.msk [vmem:[%s7280_s27] sm:$0x3] %vm3907_vm14, %v3918_v10 }
0x2965   :  { %6158 = shalt.err (!%p6155_p4)
}
0x2966   :  { %s6159_s15 = scalar_lea.hbm %s7279_s26, 160 }
0x2967   :  { %p6160_p5 = scmp.ne.s32.totalorder %s7279_s26, %s6159_s15  ;;  %p6163_p6 = scmp.lt.u32.totalorder %s6159_s15, %s7279_s26 }
0x2969   :  { %p6165_p7 = pnand %p6163_p6, %p6160_p5 }
0x296b   :  { %6168 = shalt.err (!%p6165_p7)
}
0x296c   :  { %s6178_s8 = smov 2   ;;  %v3936_v2 = vmul.f32 %v6146_v47, %v6136_v33 }
0x296d   :  { %4856 = dma.vmem_to_hbm [thread:$0]  %s4851_s2, 160, %s7279_s26, [#allocation3], %s6175_s11, %s6175_s11, %s6178_s8  }
0x296e   :  { %3937 = vst.msk [vmem:[%s7280_s27] sm:$0x3] %vm3920_vm2, %v3936_v2 }
0x296f   :  { %6169 = dma.done.wait [#allocation3], 160  }
0x2970   :  { %6170 = vsyncadd [#allocation3], 4294967136 }
0x2971   :  { %4864 = vsyncpa [#allocation3], 1 }

</bundles_post_ra>
